<compile_context>
chip_gen: v7x
topology: tpu7x:2x2x1
jax: 0.10.0
libtpu: 0.0.40
codegen_flags: <defaults>
</compile_context>

<pallas_src>
import jax
import jax.numpy as jnp
import numpy as np
from jax.experimental import pallas as pl
from jax.experimental.pallas import tpu as pltpu  # noqa: F401  (TPU backend)

BN_EPS = 1e-5
CHANNEL_MULT = 16
FC_OUT = 512


# ------------------------------ in-kernel helpers ------------------------------ #

def _deconv_taps(a_bf16, r_ref, w_ref):
    """One ConvTranspose2d layer as K row-placement matmuls + K per-tap GEMMs.

    a_bf16 : (H*N, W*Ci) bf16 activations, rows = (h, n), lanes = (w, ci).
    r_ref  : (K, OH*N, H*N) bf16 0/1 row-placement matrices (oh = s*h - p + kh).
    w_ref  : (K, W*Ci, OW*Co) bf16 per-tap GEMM weights (kw shift / stride folded in).
    Returns f32 (OH*N, OW*Co) with lanes = (ow, co).
    """
    k = r_ref.shape[0]
    acc = None
    for kh in range(k):
        g = jnp.dot(r_ref[kh], a_bf16, preferred_element_type=jnp.float32)
        g = g.astype(jnp.bfloat16)  # exact: rows are 0/1-selected copies of a_bf16
        t = jnp.dot(g, w_ref[kh], preferred_element_type=jnp.float32)
        acc = t if acc is None else acc + t
    return acc


def _bn2d_relu(acc, groups):
    """Training-mode BatchNorm2d (gamma=1, beta=0, batch stats) + ReLU.

    acc lanes are (ow, co) = `groups` blocks of Co channels; rows are (oh, n).
    Channel stats pool over rows (row mean) and over the OW lane blocks (static lane
    slices + adds), then broadcast back with a lane concat.  No grouping matmuls.
    """
    co = acc.shape[1] // groups
    cm = jnp.mean(acc, axis=0, keepdims=True)           # (1, OW*Co)
    cq = jnp.mean(acc * acc, axis=0, keepdims=True)
    chm = cm[:, :co]
    chq = cq[:, :co]
    for g in range(1, groups):
        chm = chm + cm[:, g * co:(g + 1) * co]
        chq = chq + cq[:, g * co:(g + 1) * co]
    chm = chm * (1.0 / groups)
    chq = chq * (1.0 / groups)
    inv = jax.lax.rsqrt(chq - chm * chm + BN_EPS)
    mean_b = jnp.concatenate([chm] * groups, axis=1)    # (1, OW*Co)
    inv_b = jnp.concatenate([inv] * groups, axis=1)
    return jnp.maximum((acc - mean_b) * inv_b, 0.0)


def decoder_kernel(x_ref, wfc_ref, fcb_ref, r1_ref, w1_ref, r2_ref, w2_ref,
                   r3_ref, w3_ref, r4_ref, w4_ref, o_ref):
    # fc (Linear + bias) + BatchNorm1d + ReLU (training-mode batch stats, gamma=1, beta=0).
    h = jnp.dot(x_ref[...].astype(jnp.bfloat16), wfc_ref[...],
                preferred_element_type=jnp.float32) + fcb_ref[...]
    mu = jnp.mean(h, axis=0, keepdims=True)
    var = jnp.mean(jnp.square(h - mu), axis=0, keepdims=True)
    a = jnp.maximum((h - mu) * jax.lax.rsqrt(var + BN_EPS), 0.0)
    a = a.astype(jnp.bfloat16)                                         # (N, 512)

    # ConvTranspose2d(512->64, k4, s1, p0) on the 1x1 input + BN2d + ReLU -> (4N, 4*64)
    a = _bn2d_relu(_deconv_taps(a, r1_ref, w1_ref), groups=4).astype(jnp.bfloat16)
    # ConvTranspose2d(64->32, k3, s2, p1) + BN2d + ReLU -> (7N, 7*32)
    a = _bn2d_relu(_deconv_taps(a, r2_ref, w2_ref), groups=7).astype(jnp.bfloat16)
    # ConvTranspose2d(32->16, k4, s2, p1) + BN2d + ReLU -> (14N, 14*16)
    a = _bn2d_relu(_deconv_taps(a, r3_ref, w3_ref), groups=14).astype(jnp.bfloat16)
    # ConvTranspose2d(16->1, k4, s2, p1) + Sigmoid -> (28N, 28), rows = (n, oh)
    acc = _deconv_taps(a, r4_ref, w4_ref)
    sig = pl.reciprocal(1.0 + jnp.exp(-acc), approx=True)   # divide rides the EUP slot
    o_ref[...] = jnp.minimum(sig, 1.0)


# ------------------------------ pallas_call wrapper ------------------------------ #

def _full_spec(shape):
    nd = len(shape)
    return pl.BlockSpec(shape, lambda *_: (0,) * nd)


def cnn_decoder_forward(x, wfc, fcb, r1, w1t, r2, w2t, r3, w3t, r4, w4t):
    n = x.shape[0]
    args = (x, wfc, fcb, r1, w1t, r2, w2t, r3, w3t, r4, w4t)
    out = pl.pallas_call(
        decoder_kernel,
        out_shape=jax.ShapeDtypeStruct((28 * n, 28), jnp.float32),
        in_specs=[_full_spec(a.shape) for a in args],
        out_specs=_full_spec((28 * n, 28)),
    )(*args)
    # Output rows are already (n, oh): a pure reshape gives NCHW.
    return out.reshape(n, 1, 28, 28)


# ------------------------------ one-time weight packing ------------------------------ #

def _tap_weights(wt, stride, pad, w_in, w_out):
    """PyTorch ConvTranspose2d weight (Ci, Co, K, K) -> (K, W*Ci, OW*Co) per-row-tap GEMMs.

    W'_kh[w*Ci+ci, ow*Co+co] = wt[ci, co, kh, ow - stride*w + pad] when that kw is valid.
    """
    wt = np.asarray(wt, np.float32)
    ci, co, k, _ = wt.shape
    out = np.zeros((k, w_in * ci, w_out * co), np.float32)
    for kh in range(k):
        for w in range(w_in):
            for ow in range(w_out):
                kw = ow - stride * w + pad
                if 0 <= kw < k:
                    out[kh, w * ci:(w + 1) * ci, ow * co:(ow + 1) * co] = wt[:, :, kh, kw]
    return jnp.asarray(out, jnp.bfloat16)


def _row_placement(k, stride, pad, h_in, h_out, n, out_row_major_n=False):
    """0/1 matrices (K, OH*N, H*N) placing input row (h, b) at output row oh = s*h - p + kh."""
    out = np.zeros((k, h_out * n, h_in * n), np.float32)
    for kh in range(k):
        for h in range(h_in):
            oh = stride * h - pad + kh
            if 0 <= oh < h_out:
                for b in range(n):
                    r_out = b * h_out + oh if out_row_major_n else oh * n + b
                    out[kh, r_out, h * n + b] = 1.0
    return jnp.asarray(out, jnp.bfloat16)


def prepare_decoder_params(fc_w, fc_b, w1, w2, w3, w4, batch):
    """One-time packing of PyTorch-layout weights into bf16 GEMM-ready operands."""
    n = int(batch)
    wfc = jnp.asarray(fc_w, jnp.float32).T.astype(jnp.bfloat16)        # (E, 512)
    fcb = jnp.asarray(fc_b, jnp.float32).reshape(1, -1)                # (1, 512), f32
    r1 = _row_placement(4, 1, 0, 1, 4, n)                              # (4, 4N, N)
    w1t = _tap_weights(w1, 1, 0, 1, 4)                                 # (4, 512, 256)
    r2 = _row_placement(3, 2, 1, 4, 7, n)                              # (3, 7N, 4N)
    w2t = _tap_weights(w2, 2, 1, 4, 7)                                 # (3, 256, 224)
    r3 = _row_placement(4, 2, 1, 7, 14, n)                             # (4, 14N, 7N)
    w3t = _tap_weights(w3, 2, 1, 7, 14)                                # (4, 224, 224)
    r4 = _row_placement(4, 2, 1, 14, 28, n, out_row_major_n=True)      # (4, 28N, 14N)
    w4t = _tap_weights(w4, 2, 1, 14, 28)                               # (4, 224, 28)
    return (wfc, fcb, r1, w1t, r2, w2t, r3, w3t, r4, w4t)


# --------------------------------------- main --------------------------------------- #

if __name__ == "__main__":
    key = jax.random.PRNGKey(0)
    emb, batch, cm = 32, 2, CHANNEL_MULT
    ks = jax.random.split(key, 7)

    x = jax.random.normal(ks[0], (batch, emb), jnp.float32)

    # Parameters with the exact shapes of the PyTorch module (MNIST 28x28 branch).
    fc_w = jax.random.normal(ks[1], (FC_OUT, emb), jnp.float32) * 0.05
    fc_b = jax.random.normal(ks[2], (FC_OUT,), jnp.float32) * 0.05
    w1 = jax.random.normal(ks[3], (FC_OUT, cm * 4, 4, 4), jnp.float32) * 0.05
    w2 = jax.random.normal(ks[4], (cm * 4, cm * 2, 3, 3), jnp.float32) * 0.05
    w3 = jax.random.normal(ks[5], (cm * 2, cm * 1, 4, 4), jnp.float32) * 0.05
    w4 = jax.random.normal(ks[6], (cm * 1, 1, 4, 4), jnp.float32) * 0.05
    # BatchNorm affine params default to gamma=1, beta=0 (training-mode batch stats).

    # Weight packing hoisted out of the per-call forward path (runs once).
    params = prepare_decoder_params(fc_w, fc_b, w1, w2, w3, w4, batch)

    fwd = jax.jit(cnn_decoder_forward)
    out = jax.block_until_ready(fwd(x, *params))

    assert out.shape == (batch, 1, 28, 28), out.shape
    assert bool(jnp.all(jnp.isfinite(out)))
    assert bool(jnp.all((out >= 0.0) & (out <= 1.0)))  # sigmoid output range
    print("KERNEL_OK")
</pallas_src>

<mosaic_0001>
module attributes {stable_mosaic.version = 11 : i64} {
  func.func @decoder_kernel(%arg0: memref<2x32xf32, #tpu.memory_space<vmem>>, %arg1: memref<32x512xbf16, #tpu.memory_space<vmem>>, %arg2: memref<1x512xf32, #tpu.memory_space<vmem>>, %arg3: memref<4x8x2xbf16, #tpu.memory_space<vmem>>, %arg4: memref<4x512x256xbf16, #tpu.memory_space<vmem>>, %arg5: memref<3x14x8xbf16, #tpu.memory_space<vmem>>, %arg6: memref<3x256x224xbf16, #tpu.memory_space<vmem>>, %arg7: memref<4x28x14xbf16, #tpu.memory_space<vmem>>, %arg8: memref<4x224x224xbf16, #tpu.memory_space<vmem>>, %arg9: memref<4x56x28xbf16, #tpu.memory_space<vmem>>, %arg10: memref<4x224x28xbf16, #tpu.memory_space<vmem>>, %arg11: memref<56x28xf32, #tpu.memory_space<vmem>>) attributes {dimension_semantics = [], scalar_prefetch = 0 : i64, scratch_operands = 0 : i64, tpu.core_type = #tpu.core_type<tc>} {
    %c0 = arith.constant 0 : index
    %c0_0 = arith.constant 0 : index
    %0 = vector.load %arg0[%c0, %c0_0] : memref<2x32xf32, #tpu.memory_space<vmem>>, vector<2x32xf32>
    %1 = arith.truncf %0 : vector<2x32xf32> to vector<2x32xbf16>
    %c0_1 = arith.constant 0 : index
    %c0_2 = arith.constant 0 : index
    %2 = vector.load %arg1[%c0_1, %c0_2] : memref<32x512xbf16, #tpu.memory_space<vmem>>, vector<32x512xbf16>
    %cst = arith.constant dense<0.000000e+00> : vector<2x512xf32>
    %3 = tpu.matmul %1, %2, %cst {dimension_numbers = #tpu.dot_dimension_numbers<[1], [0], [0], [1], [0, 0, 1, 1], [], []>} : vector<2x32xbf16>, vector<32x512xbf16>, vector<2x512xf32> -> vector<2x512xf32>
    %c0_3 = arith.constant 0 : index
    %c0_4 = arith.constant 0 : index
    %4 = vector.load %arg2[%c0_3, %c0_4] : memref<1x512xf32, #tpu.memory_space<vmem>>, vector<1x512xf32>
    %5 = vector.broadcast %4 : vector<1x512xf32> to vector<2x512xf32>
    %6 = arith.addf %3, %5 : vector<2x512xf32>
    %cst_5 = arith.constant dense<0.000000e+00> : vector<512xf32>
    %7 = vector.multi_reduction <add>, %6, %cst_5 [0] : vector<2x512xf32> to vector<512xf32>
    %8 = vector.shape_cast %7 : vector<512xf32> to vector<1x512xf32>
    %cst_6 = arith.constant 2.000000e+00 : f32
    %9 = vector.broadcast %cst_6 : f32 to vector<1x512xf32>
    %10 = arith.divf %8, %9 : vector<1x512xf32>
    %11 = vector.broadcast %10 : vector<1x512xf32> to vector<2x512xf32>
    %12 = arith.subf %6, %11 : vector<2x512xf32>
    %13 = arith.mulf %12, %12 : vector<2x512xf32>
    %cst_7 = arith.constant dense<0.000000e+00> : vector<512xf32>
    %14 = vector.multi_reduction <add>, %13, %cst_7 [0] : vector<2x512xf32> to vector<512xf32>
    %15 = vector.shape_cast %14 : vector<512xf32> to vector<1x512xf32>
    %cst_8 = arith.constant 2.000000e+00 : f32
    %16 = vector.broadcast %cst_8 : f32 to vector<1x512xf32>
    %17 = arith.divf %15, %16 : vector<1x512xf32>
    %18 = vector.broadcast %10 : vector<1x512xf32> to vector<2x512xf32>
    %19 = arith.subf %6, %18 : vector<2x512xf32>
    %cst_9 = arith.constant 9.99999974E-6 : f32
    %20 = vector.broadcast %cst_9 : f32 to vector<1x512xf32>
    %21 = arith.addf %17, %20 : vector<1x512xf32>
    %22 = math.rsqrt %21 : vector<1x512xf32>
    %23 = vector.broadcast %22 : vector<1x512xf32> to vector<2x512xf32>
    %24 = arith.mulf %19, %23 : vector<2x512xf32>
    %cst_10 = arith.constant 0.000000e+00 : f32
    %25 = vector.broadcast %cst_10 : f32 to vector<2x512xf32>
    %26 = arith.maximumf %24, %25 : vector<2x512xf32>
    %27 = arith.truncf %26 : vector<2x512xf32> to vector<2x512xbf16>
    %c0_11 = arith.constant 0 : index
    %c0_12 = arith.constant 0 : index
    %c0_13 = arith.constant 0 : index
    %28 = vector.load %arg3[%c0_11, %c0_12, %c0_13] : memref<4x8x2xbf16, #tpu.memory_space<vmem>>, vector<1x8x2xbf16>
    %29 = vector.shape_cast %28 : vector<1x8x2xbf16> to vector<8x2xbf16>
    %cst_14 = arith.constant dense<0.000000e+00> : vector<8x512xf32>
    %30 = tpu.matmul %29, %27, %cst_14 {dimension_numbers = #tpu.dot_dimension_numbers<[1], [0], [0], [1], [0, 0, 1, 1], [], []>} : vector<8x2xbf16>, vector<2x512xbf16>, vector<8x512xf32> -> vector<8x512xf32>
    %31 = arith.truncf %30 : vector<8x512xf32> to vector<8x512xbf16>
    %c0_15 = arith.constant 0 : index
    %c0_16 = arith.constant 0 : index
    %c0_17 = arith.constant 0 : index
    %32 = vector.load %arg4[%c0_15, %c0_16, %c0_17] : memref<4x512x256xbf16, #tpu.memory_space<vmem>>, vector<1x512x256xbf16>
    %33 = vector.shape_cast %32 : vector<1x512x256xbf16> to vector<512x256xbf16>
    %cst_18 = arith.constant dense<0.000000e+00> : vector<8x256xf32>
    %34 = tpu.matmul %31, %33, %cst_18 {dimension_numbers = #tpu.dot_dimension_numbers<[1], [0], [0], [1], [0, 0, 1, 1], [], []>} : vector<8x512xbf16>, vector<512x256xbf16>, vector<8x256xf32> -> vector<8x256xf32>
    %c1 = arith.constant 1 : index
    %c0_19 = arith.constant 0 : index
    %c0_20 = arith.constant 0 : index
    %35 = vector.load %arg3[%c1, %c0_19, %c0_20] : memref<4x8x2xbf16, #tpu.memory_space<vmem>>, vector<1x8x2xbf16>
    %36 = vector.shape_cast %35 : vector<1x8x2xbf16> to vector<8x2xbf16>
    %cst_21 = arith.constant dense<0.000000e+00> : vector<8x512xf32>
    %37 = tpu.matmul %36, %27, %cst_21 {dimension_numbers = #tpu.dot_dimension_numbers<[1], [0], [0], [1], [0, 0, 1, 1], [], []>} : vector<8x2xbf16>, vector<2x512xbf16>, vector<8x512xf32> -> vector<8x512xf32>
    %38 = arith.truncf %37 : vector<8x512xf32> to vector<8x512xbf16>
    %c1_22 = arith.constant 1 : index
    %c0_23 = arith.constant 0 : index
    %c0_24 = arith.constant 0 : index
    %39 = vector.load %arg4[%c1_22, %c0_23, %c0_24] : memref<4x512x256xbf16, #tpu.memory_space<vmem>>, vector<1x512x256xbf16>
    %40 = vector.shape_cast %39 : vector<1x512x256xbf16> to vector<512x256xbf16>
    %cst_25 = arith.constant dense<0.000000e+00> : vector<8x256xf32>
    %41 = tpu.matmul %38, %40, %cst_25 {dimension_numbers = #tpu.dot_dimension_numbers<[1], [0], [0], [1], [0, 0, 1, 1], [], []>} : vector<8x512xbf16>, vector<512x256xbf16>, vector<8x256xf32> -> vector<8x256xf32>
    %42 = arith.addf %34, %41 : vector<8x256xf32>
    %c2 = arith.constant 2 : index
    %c0_26 = arith.constant 0 : index
    %c0_27 = arith.constant 0 : index
    %43 = vector.load %arg3[%c2, %c0_26, %c0_27] : memref<4x8x2xbf16, #tpu.memory_space<vmem>>, vector<1x8x2xbf16>
    %44 = vector.shape_cast %43 : vector<1x8x2xbf16> to vector<8x2xbf16>
    %cst_28 = arith.constant dense<0.000000e+00> : vector<8x512xf32>
    %45 = tpu.matmul %44, %27, %cst_28 {dimension_numbers = #tpu.dot_dimension_numbers<[1], [0], [0], [1], [0, 0, 1, 1], [], []>} : vector<8x2xbf16>, vector<2x512xbf16>, vector<8x512xf32> -> vector<8x512xf32>
    %46 = arith.truncf %45 : vector<8x512xf32> to vector<8x512xbf16>
    %c2_29 = arith.constant 2 : index
    %c0_30 = arith.constant 0 : index
    %c0_31 = arith.constant 0 : index
    %47 = vector.load %arg4[%c2_29, %c0_30, %c0_31] : memref<4x512x256xbf16, #tpu.memory_space<vmem>>, vector<1x512x256xbf16>
    %48 = vector.shape_cast %47 : vector<1x512x256xbf16> to vector<512x256xbf16>
    %cst_32 = arith.constant dense<0.000000e+00> : vector<8x256xf32>
    %49 = tpu.matmul %46, %48, %cst_32 {dimension_numbers = #tpu.dot_dimension_numbers<[1], [0], [0], [1], [0, 0, 1, 1], [], []>} : vector<8x512xbf16>, vector<512x256xbf16>, vector<8x256xf32> -> vector<8x256xf32>
    %50 = arith.addf %42, %49 : vector<8x256xf32>
    %c3 = arith.constant 3 : index
    %c0_33 = arith.constant 0 : index
    %c0_34 = arith.constant 0 : index
    %51 = vector.load %arg3[%c3, %c0_33, %c0_34] : memref<4x8x2xbf16, #tpu.memory_space<vmem>>, vector<1x8x2xbf16>
    %52 = vector.shape_cast %51 : vector<1x8x2xbf16> to vector<8x2xbf16>
    %cst_35 = arith.constant dense<0.000000e+00> : vector<8x512xf32>
    %53 = tpu.matmul %52, %27, %cst_35 {dimension_numbers = #tpu.dot_dimension_numbers<[1], [0], [0], [1], [0, 0, 1, 1], [], []>} : vector<8x2xbf16>, vector<2x512xbf16>, vector<8x512xf32> -> vector<8x512xf32>
    %54 = arith.truncf %53 : vector<8x512xf32> to vector<8x512xbf16>
    %c3_36 = arith.constant 3 : index
    %c0_37 = arith.constant 0 : index
    %c0_38 = arith.constant 0 : index
    %55 = vector.load %arg4[%c3_36, %c0_37, %c0_38] : memref<4x512x256xbf16, #tpu.memory_space<vmem>>, vector<1x512x256xbf16>
    %56 = vector.shape_cast %55 : vector<1x512x256xbf16> to vector<512x256xbf16>
    %cst_39 = arith.constant dense<0.000000e+00> : vector<8x256xf32>
    %57 = tpu.matmul %54, %56, %cst_39 {dimension_numbers = #tpu.dot_dimension_numbers<[1], [0], [0], [1], [0, 0, 1, 1], [], []>} : vector<8x512xbf16>, vector<512x256xbf16>, vector<8x256xf32> -> vector<8x256xf32>
    %58 = arith.addf %50, %57 : vector<8x256xf32>
    %cst_40 = arith.constant dense<0.000000e+00> : vector<256xf32>
    %59 = vector.multi_reduction <add>, %58, %cst_40 [0] : vector<8x256xf32> to vector<256xf32>
    %60 = vector.shape_cast %59 : vector<256xf32> to vector<1x256xf32>
    %cst_41 = arith.constant 8.000000e+00 : f32
    %61 = vector.broadcast %cst_41 : f32 to vector<1x256xf32>
    %62 = arith.divf %60, %61 : vector<1x256xf32>
    %63 = arith.mulf %58, %58 : vector<8x256xf32>
    %cst_42 = arith.constant dense<0.000000e+00> : vector<256xf32>
    %64 = vector.multi_reduction <add>, %63, %cst_42 [0] : vector<8x256xf32> to vector<256xf32>
    %65 = vector.shape_cast %64 : vector<256xf32> to vector<1x256xf32>
    %cst_43 = arith.constant 8.000000e+00 : f32
    %66 = vector.broadcast %cst_43 : f32 to vector<1x256xf32>
    %67 = arith.divf %65, %66 : vector<1x256xf32>
    %68 = vector.extract_strided_slice %62 {offsets = [0, 0], sizes = [1, 64], strides = [1, 1]} : vector<1x256xf32> to vector<1x64xf32>
    %69 = vector.extract_strided_slice %67 {offsets = [0, 0], sizes = [1, 64], strides = [1, 1]} : vector<1x256xf32> to vector<1x64xf32>
    %70 = vector.extract_strided_slice %62 {offsets = [0, 64], sizes = [1, 64], strides = [1, 1]} : vector<1x256xf32> to vector<1x64xf32>
    %71 = arith.addf %68, %70 : vector<1x64xf32>
    %72 = vector.extract_strided_slice %67 {offsets = [0, 64], sizes = [1, 64], strides = [1, 1]} : vector<1x256xf32> to vector<1x64xf32>
    %73 = arith.addf %69, %72 : vector<1x64xf32>
    %74 = vector.extract_strided_slice %62 {offsets = [0, 128], sizes = [1, 64], strides = [1, 1]} : vector<1x256xf32> to vector<1x64xf32>
    %75 = arith.addf %71, %74 : vector<1x64xf32>
    %76 = vector.extract_strided_slice %67 {offsets = [0, 128], sizes = [1, 64], strides = [1, 1]} : vector<1x256xf32> to vector<1x64xf32>
    %77 = arith.addf %73, %76 : vector<1x64xf32>
    %78 = vector.extract_strided_slice %62 {offsets = [0, 192], sizes = [1, 64], strides = [1, 1]} : vector<1x256xf32> to vector<1x64xf32>
    %79 = arith.addf %75, %78 : vector<1x64xf32>
    %80 = vector.extract_strided_slice %67 {offsets = [0, 192], sizes = [1, 64], strides = [1, 1]} : vector<1x256xf32> to vector<1x64xf32>
    %81 = arith.addf %77, %80 : vector<1x64xf32>
    %cst_44 = arith.constant 2.500000e-01 : f32
    %82 = vector.broadcast %cst_44 : f32 to vector<1x64xf32>
    %83 = arith.mulf %79, %82 : vector<1x64xf32>
    %cst_45 = arith.constant 2.500000e-01 : f32
    %84 = vector.broadcast %cst_45 : f32 to vector<1x64xf32>
    %85 = arith.mulf %81, %84 : vector<1x64xf32>
    %86 = arith.mulf %83, %83 : vector<1x64xf32>
    %87 = arith.subf %85, %86 : vector<1x64xf32>
    %cst_46 = arith.constant 9.99999974E-6 : f32
    %88 = vector.broadcast %cst_46 : f32 to vector<1x64xf32>
    %89 = arith.addf %87, %88 : vector<1x64xf32>
    %90 = math.rsqrt %89 : vector<1x64xf32>
    %91 = tpu.concatenate %83, %83, %83, %83 in 1 : vector<1x64xf32>, vector<1x64xf32>, vector<1x64xf32>, vector<1x64xf32> -> vector<1x256xf32>
    %92 = tpu.concatenate %90, %90, %90, %90 in 1 : vector<1x64xf32>, vector<1x64xf32>, vector<1x64xf32>, vector<1x64xf32> -> vector<1x256xf32>
    %93 = vector.broadcast %91 : vector<1x256xf32> to vector<8x256xf32>
    %94 = arith.subf %58, %93 : vector<8x256xf32>
    %95 = vector.broadcast %92 : vector<1x256xf32> to vector<8x256xf32>
    %96 = arith.mulf %94, %95 : vector<8x256xf32>
    %cst_47 = arith.constant 0.000000e+00 : f32
    %97 = vector.broadcast %cst_47 : f32 to vector<8x256xf32>
    %98 = arith.maximumf %96, %97 : vector<8x256xf32>
    %99 = arith.truncf %98 : vector<8x256xf32> to vector<8x256xbf16>
    %c0_48 = arith.constant 0 : index
    %c0_49 = arith.constant 0 : index
    %c0_50 = arith.constant 0 : index
    %100 = vector.load %arg5[%c0_48, %c0_49, %c0_50] : memref<3x14x8xbf16, #tpu.memory_space<vmem>>, vector<1x14x8xbf16>
    %101 = vector.shape_cast %100 : vector<1x14x8xbf16> to vector<14x8xbf16>
    %cst_51 = arith.constant dense<0.000000e+00> : vector<14x256xf32>
    %102 = tpu.matmul %101, %99, %cst_51 {dimension_numbers = #tpu.dot_dimension_numbers<[1], [0], [0], [1], [0, 0, 1, 1], [], []>} : vector<14x8xbf16>, vector<8x256xbf16>, vector<14x256xf32> -> vector<14x256xf32>
    %103 = arith.truncf %102 : vector<14x256xf32> to vector<14x256xbf16>
    %c0_52 = arith.constant 0 : index
    %c0_53 = arith.constant 0 : index
    %c0_54 = arith.constant 0 : index
    %104 = vector.load %arg6[%c0_52, %c0_53, %c0_54] : memref<3x256x224xbf16, #tpu.memory_space<vmem>>, vector<1x256x224xbf16>
    %105 = vector.shape_cast %104 : vector<1x256x224xbf16> to vector<256x224xbf16>
    %cst_55 = arith.constant dense<0.000000e+00> : vector<14x224xf32>
    %106 = tpu.matmul %103, %105, %cst_55 {dimension_numbers = #tpu.dot_dimension_numbers<[1], [0], [0], [1], [0, 0, 1, 1], [], []>} : vector<14x256xbf16>, vector<256x224xbf16>, vector<14x224xf32> -> vector<14x224xf32>
    %c1_56 = arith.constant 1 : index
    %c0_57 = arith.constant 0 : index
    %c0_58 = arith.constant 0 : index
    %107 = vector.load %arg5[%c1_56, %c0_57, %c0_58] : memref<3x14x8xbf16, #tpu.memory_space<vmem>>, vector<1x14x8xbf16>
    %108 = vector.shape_cast %107 : vector<1x14x8xbf16> to vector<14x8xbf16>
    %cst_59 = arith.constant dense<0.000000e+00> : vector<14x256xf32>
    %109 = tpu.matmul %108, %99, %cst_59 {dimension_numbers = #tpu.dot_dimension_numbers<[1], [0], [0], [1], [0, 0, 1, 1], [], []>} : vector<14x8xbf16>, vector<8x256xbf16>, vector<14x256xf32> -> vector<14x256xf32>
    %110 = arith.truncf %109 : vector<14x256xf32> to vector<14x256xbf16>
    %c1_60 = arith.constant 1 : index
    %c0_61 = arith.constant 0 : index
    %c0_62 = arith.constant 0 : index
    %111 = vector.load %arg6[%c1_60, %c0_61, %c0_62] : memref<3x256x224xbf16, #tpu.memory_space<vmem>>, vector<1x256x224xbf16>
    %112 = vector.shape_cast %111 : vector<1x256x224xbf16> to vector<256x224xbf16>
    %cst_63 = arith.constant dense<0.000000e+00> : vector<14x224xf32>
    %113 = tpu.matmul %110, %112, %cst_63 {dimension_numbers = #tpu.dot_dimension_numbers<[1], [0], [0], [1], [0, 0, 1, 1], [], []>} : vector<14x256xbf16>, vector<256x224xbf16>, vector<14x224xf32> -> vector<14x224xf32>
    %114 = arith.addf %106, %113 : vector<14x224xf32>
    %c2_64 = arith.constant 2 : index
    %c0_65 = arith.constant 0 : index
    %c0_66 = arith.constant 0 : index
    %115 = vector.load %arg5[%c2_64, %c0_65, %c0_66] : memref<3x14x8xbf16, #tpu.memory_space<vmem>>, vector<1x14x8xbf16>
    %116 = vector.shape_cast %115 : vector<1x14x8xbf16> to vector<14x8xbf16>
    %cst_67 = arith.constant dense<0.000000e+00> : vector<14x256xf32>
    %117 = tpu.matmul %116, %99, %cst_67 {dimension_numbers = #tpu.dot_dimension_numbers<[1], [0], [0], [1], [0, 0, 1, 1], [], []>} : vector<14x8xbf16>, vector<8x256xbf16>, vector<14x256xf32> -> vector<14x256xf32>
    %118 = arith.truncf %117 : vector<14x256xf32> to vector<14x256xbf16>
    %c2_68 = arith.constant 2 : index
    %c0_69 = arith.constant 0 : index
    %c0_70 = arith.constant 0 : index
    %119 = vector.load %arg6[%c2_68, %c0_69, %c0_70] : memref<3x256x224xbf16, #tpu.memory_space<vmem>>, vector<1x256x224xbf16>
    %120 = vector.shape_cast %119 : vector<1x256x224xbf16> to vector<256x224xbf16>
    %cst_71 = arith.constant dense<0.000000e+00> : vector<14x224xf32>
    %121 = tpu.matmul %118, %120, %cst_71 {dimension_numbers = #tpu.dot_dimension_numbers<[1], [0], [0], [1], [0, 0, 1, 1], [], []>} : vector<14x256xbf16>, vector<256x224xbf16>, vector<14x224xf32> -> vector<14x224xf32>
    %122 = arith.addf %114, %121 : vector<14x224xf32>
    %cst_72 = arith.constant dense<0.000000e+00> : vector<224xf32>
    %123 = vector.multi_reduction <add>, %122, %cst_72 [0] : vector<14x224xf32> to vector<224xf32>
    %124 = vector.shape_cast %123 : vector<224xf32> to vector<1x224xf32>
    %cst_73 = arith.constant 1.400000e+01 : f32
    %125 = vector.broadcast %cst_73 : f32 to vector<1x224xf32>
    %126 = arith.divf %124, %125 : vector<1x224xf32>
    %127 = arith.mulf %122, %122 : vector<14x224xf32>
    %cst_74 = arith.constant dense<0.000000e+00> : vector<224xf32>
    %128 = vector.multi_reduction <add>, %127, %cst_74 [0] : vector<14x224xf32> to vector<224xf32>
    %129 = vector.shape_cast %128 : vector<224xf32> to vector<1x224xf32>
    %cst_75 = arith.constant 1.400000e+01 : f32
    %130 = vector.broadcast %cst_75 : f32 to vector<1x224xf32>
    %131 = arith.divf %129, %130 : vector<1x224xf32>
    %132 = vector.extract_strided_slice %126 {offsets = [0, 0], sizes = [1, 32], strides = [1, 1]} : vector<1x224xf32> to vector<1x32xf32>
    %133 = vector.extract_strided_slice %131 {offsets = [0, 0], sizes = [1, 32], strides = [1, 1]} : vector<1x224xf32> to vector<1x32xf32>
    %134 = vector.extract_strided_slice %126 {offsets = [0, 32], sizes = [1, 32], strides = [1, 1]} : vector<1x224xf32> to vector<1x32xf32>
    %135 = arith.addf %132, %134 : vector<1x32xf32>
    %136 = vector.extract_strided_slice %131 {offsets = [0, 32], sizes = [1, 32], strides = [1, 1]} : vector<1x224xf32> to vector<1x32xf32>
    %137 = arith.addf %133, %136 : vector<1x32xf32>
    %138 = vector.extract_strided_slice %126 {offsets = [0, 64], sizes = [1, 32], strides = [1, 1]} : vector<1x224xf32> to vector<1x32xf32>
    %139 = arith.addf %135, %138 : vector<1x32xf32>
    %140 = vector.extract_strided_slice %131 {offsets = [0, 64], sizes = [1, 32], strides = [1, 1]} : vector<1x224xf32> to vector<1x32xf32>
    %141 = arith.addf %137, %140 : vector<1x32xf32>
    %142 = vector.extract_strided_slice %126 {offsets = [0, 96], sizes = [1, 32], strides = [1, 1]} : vector<1x224xf32> to vector<1x32xf32>
    %143 = arith.addf %139, %142 : vector<1x32xf32>
    %144 = vector.extract_strided_slice %131 {offsets = [0, 96], sizes = [1, 32], strides = [1, 1]} : vector<1x224xf32> to vector<1x32xf32>
    %145 = arith.addf %141, %144 : vector<1x32xf32>
    %146 = vector.extract_strided_slice %126 {offsets = [0, 128], sizes = [1, 32], strides = [1, 1]} : vector<1x224xf32> to vector<1x32xf32>
    %147 = arith.addf %143, %146 : vector<1x32xf32>
    %148 = vector.extract_strided_slice %131 {offsets = [0, 128], sizes = [1, 32], strides = [1, 1]} : vector<1x224xf32> to vector<1x32xf32>
    %149 = arith.addf %145, %148 : vector<1x32xf32>
    %150 = vector.extract_strided_slice %126 {offsets = [0, 160], sizes = [1, 32], strides = [1, 1]} : vector<1x224xf32> to vector<1x32xf32>
    %151 = arith.addf %147, %150 : vector<1x32xf32>
    %152 = vector.extract_strided_slice %131 {offsets = [0, 160], sizes = [1, 32], strides = [1, 1]} : vector<1x224xf32> to vector<1x32xf32>
    %153 = arith.addf %149, %152 : vector<1x32xf32>
    %154 = vector.extract_strided_slice %126 {offsets = [0, 192], sizes = [1, 32], strides = [1, 1]} : vector<1x224xf32> to vector<1x32xf32>
    %155 = arith.addf %151, %154 : vector<1x32xf32>
    %156 = vector.extract_strided_slice %131 {offsets = [0, 192], sizes = [1, 32], strides = [1, 1]} : vector<1x224xf32> to vector<1x32xf32>
    %157 = arith.addf %153, %156 : vector<1x32xf32>
    %cst_76 = arith.constant 0.142857149 : f32
    %158 = vector.broadcast %cst_76 : f32 to vector<1x32xf32>
    %159 = arith.mulf %155, %158 : vector<1x32xf32>
    %cst_77 = arith.constant 0.142857149 : f32
    %160 = vector.broadcast %cst_77 : f32 to vector<1x32xf32>
    %161 = arith.mulf %157, %160 : vector<1x32xf32>
    %162 = arith.mulf %159, %159 : vector<1x32xf32>
    %163 = arith.subf %161, %162 : vector<1x32xf32>
    %cst_78 = arith.constant 9.99999974E-6 : f32
    %164 = vector.broadcast %cst_78 : f32 to vector<1x32xf32>
    %165 = arith.addf %163, %164 : vector<1x32xf32>
    %166 = math.rsqrt %165 : vector<1x32xf32>
    %167 = tpu.concatenate %159, %159, %159, %159, %159, %159, %159 in 1 : vector<1x32xf32>, vector<1x32xf32>, vector<1x32xf32>, vector<1x32xf32>, vector<1x32xf32>, vector<1x32xf32>, vector<1x32xf32> -> vector<1x224xf32>
    %168 = tpu.concatenate %166, %166, %166, %166, %166, %166, %166 in 1 : vector<1x32xf32>, vector<1x32xf32>, vector<1x32xf32>, vector<1x32xf32>, vector<1x32xf32>, vector<1x32xf32>, vector<1x32xf32> -> vector<1x224xf32>
    %169 = vector.broadcast %167 : vector<1x224xf32> to vector<14x224xf32>
    %170 = arith.subf %122, %169 : vector<14x224xf32>
    %171 = vector.broadcast %168 : vector<1x224xf32> to vector<14x224xf32>
    %172 = arith.mulf %170, %171 : vector<14x224xf32>
    %cst_79 = arith.constant 0.000000e+00 : f32
    %173 = vector.broadcast %cst_79 : f32 to vector<14x224xf32>
    %174 = arith.maximumf %172, %173 : vector<14x224xf32>
    %175 = arith.truncf %174 : vector<14x224xf32> to vector<14x224xbf16>
    %c0_80 = arith.constant 0 : index
    %c0_81 = arith.constant 0 : index
    %c0_82 = arith.constant 0 : index
    %176 = vector.load %arg7[%c0_80, %c0_81, %c0_82] : memref<4x28x14xbf16, #tpu.memory_space<vmem>>, vector<1x28x14xbf16>
    %177 = vector.shape_cast %176 : vector<1x28x14xbf16> to vector<28x14xbf16>
    %cst_83 = arith.constant dense<0.000000e+00> : vector<28x224xf32>
    %178 = tpu.matmul %177, %175, %cst_83 {dimension_numbers = #tpu.dot_dimension_numbers<[1], [0], [0], [1], [0, 0, 1, 1], [], []>} : vector<28x14xbf16>, vector<14x224xbf16>, vector<28x224xf32> -> vector<28x224xf32>
    %179 = arith.truncf %178 : vector<28x224xf32> to vector<28x224xbf16>
    %c0_84 = arith.constant 0 : index
    %c0_85 = arith.constant 0 : index
    %c0_86 = arith.constant 0 : index
    %180 = vector.load %arg8[%c0_84, %c0_85, %c0_86] : memref<4x224x224xbf16, #tpu.memory_space<vmem>>, vector<1x224x224xbf16>
    %181 = vector.shape_cast %180 : vector<1x224x224xbf16> to vector<224x224xbf16>
    %cst_87 = arith.constant dense<0.000000e+00> : vector<28x224xf32>
    %182 = tpu.matmul %179, %181, %cst_87 {dimension_numbers = #tpu.dot_dimension_numbers<[1], [0], [0], [1], [0, 0, 1, 1], [], []>} : vector<28x224xbf16>, vector<224x224xbf16>, vector<28x224xf32> -> vector<28x224xf32>
    %c1_88 = arith.constant 1 : index
    %c0_89 = arith.constant 0 : index
    %c0_90 = arith.constant 0 : index
    %183 = vector.load %arg7[%c1_88, %c0_89, %c0_90] : memref<4x28x14xbf16, #tpu.memory_space<vmem>>, vector<1x28x14xbf16>
    %184 = vector.shape_cast %183 : vector<1x28x14xbf16> to vector<28x14xbf16>
    %cst_91 = arith.constant dense<0.000000e+00> : vector<28x224xf32>
    %185 = tpu.matmul %184, %175, %cst_91 {dimension_numbers = #tpu.dot_dimension_numbers<[1], [0], [0], [1], [0, 0, 1, 1], [], []>} : vector<28x14xbf16>, vector<14x224xbf16>, vector<28x224xf32> -> vector<28x224xf32>
    %186 = arith.truncf %185 : vector<28x224xf32> to vector<28x224xbf16>
    %c1_92 = arith.constant 1 : index
    %c0_93 = arith.constant 0 : index
    %c0_94 = arith.constant 0 : index
    %187 = vector.load %arg8[%c1_92, %c0_93, %c0_94] : memref<4x224x224xbf16, #tpu.memory_space<vmem>>, vector<1x224x224xbf16>
    %188 = vector.shape_cast %187 : vector<1x224x224xbf16> to vector<224x224xbf16>
    %cst_95 = arith.constant dense<0.000000e+00> : vector<28x224xf32>
    %189 = tpu.matmul %186, %188, %cst_95 {dimension_numbers = #tpu.dot_dimension_numbers<[1], [0], [0], [1], [0, 0, 1, 1], [], []>} : vector<28x224xbf16>, vector<224x224xbf16>, vector<28x224xf32> -> vector<28x224xf32>
    %190 = arith.addf %182, %189 : vector<28x224xf32>
    %c2_96 = arith.constant 2 : index
    %c0_97 = arith.constant 0 : index
    %c0_98 = arith.constant 0 : index
    %191 = vector.load %arg7[%c2_96, %c0_97, %c0_98] : memref<4x28x14xbf16, #tpu.memory_space<vmem>>, vector<1x28x14xbf16>
    %192 = vector.shape_cast %191 : vector<1x28x14xbf16> to vector<28x14xbf16>
    %cst_99 = arith.constant dense<0.000000e+00> : vector<28x224xf32>
    %193 = tpu.matmul %192, %175, %cst_99 {dimension_numbers = #tpu.dot_dimension_numbers<[1], [0], [0], [1], [0, 0, 1, 1], [], []>} : vector<28x14xbf16>, vector<14x224xbf16>, vector<28x224xf32> -> vector<28x224xf32>
    %194 = arith.truncf %193 : vector<28x224xf32> to vector<28x224xbf16>
    %c2_100 = arith.constant 2 : index
    %c0_101 = arith.constant 0 : index
    %c0_102 = arith.constant 0 : index
    %195 = vector.load %arg8[%c2_100, %c0_101, %c0_102] : memref<4x224x224xbf16, #tpu.memory_space<vmem>>, vector<1x224x224xbf16>
    %196 = vector.shape_cast %195 : vector<1x224x224xbf16> to vector<224x224xbf16>
    %cst_103 = arith.constant dense<0.000000e+00> : vector<28x224xf32>
    %197 = tpu.matmul %194, %196, %cst_103 {dimension_numbers = #tpu.dot_dimension_numbers<[1], [0], [0], [1], [0, 0, 1, 1], [], []>} : vector<28x224xbf16>, vector<224x224xbf16>, vector<28x224xf32> -> vector<28x224xf32>
    %198 = arith.addf %190, %197 : vector<28x224xf32>
    %c3_104 = arith.constant 3 : index
    %c0_105 = arith.constant 0 : index
    %c0_106 = arith.constant 0 : index
    %199 = vector.load %arg7[%c3_104, %c0_105, %c0_106] : memref<4x28x14xbf16, #tpu.memory_space<vmem>>, vector<1x28x14xbf16>
    %200 = vector.shape_cast %199 : vector<1x28x14xbf16> to vector<28x14xbf16>
    %cst_107 = arith.constant dense<0.000000e+00> : vector<28x224xf32>
    %201 = tpu.matmul %200, %175, %cst_107 {dimension_numbers = #tpu.dot_dimension_numbers<[1], [0], [0], [1], [0, 0, 1, 1], [], []>} : vector<28x14xbf16>, vector<14x224xbf16>, vector<28x224xf32> -> vector<28x224xf32>
    %202 = arith.truncf %201 : vector<28x224xf32> to vector<28x224xbf16>
    %c3_108 = arith.constant 3 : index
    %c0_109 = arith.constant 0 : index
    %c0_110 = arith.constant 0 : index
    %203 = vector.load %arg8[%c3_108, %c0_109, %c0_110] : memref<4x224x224xbf16, #tpu.memory_space<vmem>>, vector<1x224x224xbf16>
    %204 = vector.shape_cast %203 : vector<1x224x224xbf16> to vector<224x224xbf16>
    %cst_111 = arith.constant dense<0.000000e+00> : vector<28x224xf32>
    %205 = tpu.matmul %202, %204, %cst_111 {dimension_numbers = #tpu.dot_dimension_numbers<[1], [0], [0], [1], [0, 0, 1, 1], [], []>} : vector<28x224xbf16>, vector<224x224xbf16>, vector<28x224xf32> -> vector<28x224xf32>
    %206 = arith.addf %198, %205 : vector<28x224xf32>
    %cst_112 = arith.constant dense<0.000000e+00> : vector<224xf32>
    %207 = vector.multi_reduction <add>, %206, %cst_112 [0] : vector<28x224xf32> to vector<224xf32>
    %208 = vector.shape_cast %207 : vector<224xf32> to vector<1x224xf32>
    %cst_113 = arith.constant 2.800000e+01 : f32
    %209 = vector.broadcast %cst_113 : f32 to vector<1x224xf32>
    %210 = arith.divf %208, %209 : vector<1x224xf32>
    %211 = arith.mulf %206, %206 : vector<28x224xf32>
    %cst_114 = arith.constant dense<0.000000e+00> : vector<224xf32>
    %212 = vector.multi_reduction <add>, %211, %cst_114 [0] : vector<28x224xf32> to vector<224xf32>
    %213 = vector.shape_cast %212 : vector<224xf32> to vector<1x224xf32>
    %cst_115 = arith.constant 2.800000e+01 : f32
    %214 = vector.broadcast %cst_115 : f32 to vector<1x224xf32>
    %215 = arith.divf %213, %214 : vector<1x224xf32>
    %216 = vector.extract_strided_slice %210 {offsets = [0, 0], sizes = [1, 16], strides = [1, 1]} : vector<1x224xf32> to vector<1x16xf32>
    %217 = vector.extract_strided_slice %215 {offsets = [0, 0], sizes = [1, 16], strides = [1, 1]} : vector<1x224xf32> to vector<1x16xf32>
    %218 = vector.extract_strided_slice %210 {offsets = [0, 16], sizes = [1, 16], strides = [1, 1]} : vector<1x224xf32> to vector<1x16xf32>
    %219 = arith.addf %216, %218 : vector<1x16xf32>
    %220 = vector.extract_strided_slice %215 {offsets = [0, 16], sizes = [1, 16], strides = [1, 1]} : vector<1x224xf32> to vector<1x16xf32>
    %221 = arith.addf %217, %220 : vector<1x16xf32>
    %222 = vector.extract_strided_slice %210 {offsets = [0, 32], sizes = [1, 16], strides = [1, 1]} : vector<1x224xf32> to vector<1x16xf32>
    %223 = arith.addf %219, %222 : vector<1x16xf32>
    %224 = vector.extract_strided_slice %215 {offsets = [0, 32], sizes = [1, 16], strides = [1, 1]} : vector<1x224xf32> to vector<1x16xf32>
    %225 = arith.addf %221, %224 : vector<1x16xf32>
    %226 = vector.extract_strided_slice %210 {offsets = [0, 48], sizes = [1, 16], strides = [1, 1]} : vector<1x224xf32> to vector<1x16xf32>
    %227 = arith.addf %223, %226 : vector<1x16xf32>
    %228 = vector.extract_strided_slice %215 {offsets = [0, 48], sizes = [1, 16], strides = [1, 1]} : vector<1x224xf32> to vector<1x16xf32>
    %229 = arith.addf %225, %228 : vector<1x16xf32>
    %230 = vector.extract_strided_slice %210 {offsets = [0, 64], sizes = [1, 16], strides = [1, 1]} : vector<1x224xf32> to vector<1x16xf32>
    %231 = arith.addf %227, %230 : vector<1x16xf32>
    %232 = vector.extract_strided_slice %215 {offsets = [0, 64], sizes = [1, 16], strides = [1, 1]} : vector<1x224xf32> to vector<1x16xf32>
    %233 = arith.addf %229, %232 : vector<1x16xf32>
    %234 = vector.extract_strided_slice %210 {offsets = [0, 80], sizes = [1, 16], strides = [1, 1]} : vector<1x224xf32> to vector<1x16xf32>
    %235 = arith.addf %231, %234 : vector<1x16xf32>
    %236 = vector.extract_strided_slice %215 {offsets = [0, 80], sizes = [1, 16], strides = [1, 1]} : vector<1x224xf32> to vector<1x16xf32>
    %237 = arith.addf %233, %236 : vector<1x16xf32>
    %238 = vector.extract_strided_slice %210 {offsets = [0, 96], sizes = [1, 16], strides = [1, 1]} : vector<1x224xf32> to vector<1x16xf32>
    %239 = arith.addf %235, %238 : vector<1x16xf32>
    %240 = vector.extract_strided_slice %215 {offsets = [0, 96], sizes = [1, 16], strides = [1, 1]} : vector<1x224xf32> to vector<1x16xf32>
    %241 = arith.addf %237, %240 : vector<1x16xf32>
    %242 = vector.extract_strided_slice %210 {offsets = [0, 112], sizes = [1, 16], strides = [1, 1]} : vector<1x224xf32> to vector<1x16xf32>
    %243 = arith.addf %239, %242 : vector<1x16xf32>
    %244 = vector.extract_strided_slice %215 {offsets = [0, 112], sizes = [1, 16], strides = [1, 1]} : vector<1x224xf32> to vector<1x16xf32>
    %245 = arith.addf %241, %244 : vector<1x16xf32>
    %246 = vector.extract_strided_slice %210 {offsets = [0, 128], sizes = [1, 16], strides = [1, 1]} : vector<1x224xf32> to vector<1x16xf32>
    %247 = arith.addf %243, %246 : vector<1x16xf32>
    %248 = vector.extract_strided_slice %215 {offsets = [0, 128], sizes = [1, 16], strides = [1, 1]} : vector<1x224xf32> to vector<1x16xf32>
    %249 = arith.addf %245, %248 : vector<1x16xf32>
    %250 = vector.extract_strided_slice %210 {offsets = [0, 144], sizes = [1, 16], strides = [1, 1]} : vector<1x224xf32> to vector<1x16xf32>
    %251 = arith.addf %247, %250 : vector<1x16xf32>
    %252 = vector.extract_strided_slice %215 {offsets = [0, 144], sizes = [1, 16], strides = [1, 1]} : vector<1x224xf32> to vector<1x16xf32>
    %253 = arith.addf %249, %252 : vector<1x16xf32>
    %254 = vector.extract_strided_slice %210 {offsets = [0, 160], sizes = [1, 16], strides = [1, 1]} : vector<1x224xf32> to vector<1x16xf32>
    %255 = arith.addf %251, %254 : vector<1x16xf32>
    %256 = vector.extract_strided_slice %215 {offsets = [0, 160], sizes = [1, 16], strides = [1, 1]} : vector<1x224xf32> to vector<1x16xf32>
    %257 = arith.addf %253, %256 : vector<1x16xf32>
    %258 = vector.extract_strided_slice %210 {offsets = [0, 176], sizes = [1, 16], strides = [1, 1]} : vector<1x224xf32> to vector<1x16xf32>
    %259 = arith.addf %255, %258 : vector<1x16xf32>
    %260 = vector.extract_strided_slice %215 {offsets = [0, 176], sizes = [1, 16], strides = [1, 1]} : vector<1x224xf32> to vector<1x16xf32>
    %261 = arith.addf %257, %260 : vector<1x16xf32>
    %262 = vector.extract_strided_slice %210 {offsets = [0, 192], sizes = [1, 16], strides = [1, 1]} : vector<1x224xf32> to vector<1x16xf32>
    %263 = arith.addf %259, %262 : vector<1x16xf32>
    %264 = vector.extract_strided_slice %215 {offsets = [0, 192], sizes = [1, 16], strides = [1, 1]} : vector<1x224xf32> to vector<1x16xf32>
    %265 = arith.addf %261, %264 : vector<1x16xf32>
    %266 = vector.extract_strided_slice %210 {offsets = [0, 208], sizes = [1, 16], strides = [1, 1]} : vector<1x224xf32> to vector<1x16xf32>
    %267 = arith.addf %263, %266 : vector<1x16xf32>
    %268 = vector.extract_strided_slice %215 {offsets = [0, 208], sizes = [1, 16], strides = [1, 1]} : vector<1x224xf32> to vector<1x16xf32>
    %269 = arith.addf %265, %268 : vector<1x16xf32>
    %cst_116 = arith.constant 0.0714285746 : f32
    %270 = vector.broadcast %cst_116 : f32 to vector<1x16xf32>
    %271 = arith.mulf %267, %270 : vector<1x16xf32>
    %cst_117 = arith.constant 0.0714285746 : f32
    %272 = vector.broadcast %cst_117 : f32 to vector<1x16xf32>
    %273 = arith.mulf %269, %272 : vector<1x16xf32>
    %274 = arith.mulf %271, %271 : vector<1x16xf32>
    %275 = arith.subf %273, %274 : vector<1x16xf32>
    %cst_118 = arith.constant 9.99999974E-6 : f32
    %276 = vector.broadcast %cst_118 : f32 to vector<1x16xf32>
    %277 = arith.addf %275, %276 : vector<1x16xf32>
    %278 = math.rsqrt %277 : vector<1x16xf32>
    %279 = tpu.concatenate %271, %271, %271, %271, %271, %271, %271, %271, %271, %271, %271, %271, %271, %271 in 1 : vector<1x16xf32>, vector<1x16xf32>, vector<1x16xf32>, vector<1x16xf32>, vector<1x16xf32>, vector<1x16xf32>, vector<1x16xf32>, vector<1x16xf32>, vector<1x16xf32>, vector<1x16xf32>, vector<1x16xf32>, vector<1x16xf32>, vector<1x16xf32>, vector<1x16xf32> -> vector<1x224xf32>
    %280 = tpu.concatenate %278, %278, %278, %278, %278, %278, %278, %278, %278, %278, %278, %278, %278, %278 in 1 : vector<1x16xf32>, vector<1x16xf32>, vector<1x16xf32>, vector<1x16xf32>, vector<1x16xf32>, vector<1x16xf32>, vector<1x16xf32>, vector<1x16xf32>, vector<1x16xf32>, vector<1x16xf32>, vector<1x16xf32>, vector<1x16xf32>, vector<1x16xf32>, vector<1x16xf32> -> vector<1x224xf32>
    %281 = vector.broadcast %279 : vector<1x224xf32> to vector<28x224xf32>
    %282 = arith.subf %206, %281 : vector<28x224xf32>
    %283 = vector.broadcast %280 : vector<1x224xf32> to vector<28x224xf32>
    %284 = arith.mulf %282, %283 : vector<28x224xf32>
    %cst_119 = arith.constant 0.000000e+00 : f32
    %285 = vector.broadcast %cst_119 : f32 to vector<28x224xf32>
    %286 = arith.maximumf %284, %285 : vector<28x224xf32>
    %287 = arith.truncf %286 : vector<28x224xf32> to vector<28x224xbf16>
    %c0_120 = arith.constant 0 : index
    %c0_121 = arith.constant 0 : index
    %c0_122 = arith.constant 0 : index
    %288 = vector.load %arg9[%c0_120, %c0_121, %c0_122] : memref<4x56x28xbf16, #tpu.memory_space<vmem>>, vector<1x56x28xbf16>
    %289 = vector.shape_cast %288 : vector<1x56x28xbf16> to vector<56x28xbf16>
    %cst_123 = arith.constant dense<0.000000e+00> : vector<56x224xf32>
    %290 = tpu.matmul %289, %287, %cst_123 {dimension_numbers = #tpu.dot_dimension_numbers<[1], [0], [0], [1], [0, 0, 1, 1], [], []>} : vector<56x28xbf16>, vector<28x224xbf16>, vector<56x224xf32> -> vector<56x224xf32>
    %291 = arith.truncf %290 : vector<56x224xf32> to vector<56x224xbf16>
    %c0_124 = arith.constant 0 : index
    %c0_125 = arith.constant 0 : index
    %c0_126 = arith.constant 0 : index
    %292 = vector.load %arg10[%c0_124, %c0_125, %c0_126] : memref<4x224x28xbf16, #tpu.memory_space<vmem>>, vector<1x224x28xbf16>
    %293 = vector.shape_cast %292 : vector<1x224x28xbf16> to vector<224x28xbf16>
    %cst_127 = arith.constant dense<0.000000e+00> : vector<56x28xf32>
    %294 = tpu.matmul %291, %293, %cst_127 {dimension_numbers = #tpu.dot_dimension_numbers<[1], [0], [0], [1], [0, 0, 1, 1], [], []>} : vector<56x224xbf16>, vector<224x28xbf16>, vector<56x28xf32> -> vector<56x28xf32>
    %c1_128 = arith.constant 1 : index
    %c0_129 = arith.constant 0 : index
    %c0_130 = arith.constant 0 : index
    %295 = vector.load %arg9[%c1_128, %c0_129, %c0_130] : memref<4x56x28xbf16, #tpu.memory_space<vmem>>, vector<1x56x28xbf16>
    %296 = vector.shape_cast %295 : vector<1x56x28xbf16> to vector<56x28xbf16>
    %cst_131 = arith.constant dense<0.000000e+00> : vector<56x224xf32>
    %297 = tpu.matmul %296, %287, %cst_131 {dimension_numbers = #tpu.dot_dimension_numbers<[1], [0], [0], [1], [0, 0, 1, 1], [], []>} : vector<56x28xbf16>, vector<28x224xbf16>, vector<56x224xf32> -> vector<56x224xf32>
    %298 = arith.truncf %297 : vector<56x224xf32> to vector<56x224xbf16>
    %c1_132 = arith.constant 1 : index
    %c0_133 = arith.constant 0 : index
    %c0_134 = arith.constant 0 : index
    %299 = vector.load %arg10[%c1_132, %c0_133, %c0_134] : memref<4x224x28xbf16, #tpu.memory_space<vmem>>, vector<1x224x28xbf16>
    %300 = vector.shape_cast %299 : vector<1x224x28xbf16> to vector<224x28xbf16>
    %cst_135 = arith.constant dense<0.000000e+00> : vector<56x28xf32>
    %301 = tpu.matmul %298, %300, %cst_135 {dimension_numbers = #tpu.dot_dimension_numbers<[1], [0], [0], [1], [0, 0, 1, 1], [], []>} : vector<56x224xbf16>, vector<224x28xbf16>, vector<56x28xf32> -> vector<56x28xf32>
    %302 = arith.addf %294, %301 : vector<56x28xf32>
    %c2_136 = arith.constant 2 : index
    %c0_137 = arith.constant 0 : index
    %c0_138 = arith.constant 0 : index
    %303 = vector.load %arg9[%c2_136, %c0_137, %c0_138] : memref<4x56x28xbf16, #tpu.memory_space<vmem>>, vector<1x56x28xbf16>
    %304 = vector.shape_cast %303 : vector<1x56x28xbf16> to vector<56x28xbf16>
    %cst_139 = arith.constant dense<0.000000e+00> : vector<56x224xf32>
    %305 = tpu.matmul %304, %287, %cst_139 {dimension_numbers = #tpu.dot_dimension_numbers<[1], [0], [0], [1], [0, 0, 1, 1], [], []>} : vector<56x28xbf16>, vector<28x224xbf16>, vector<56x224xf32> -> vector<56x224xf32>
    %306 = arith.truncf %305 : vector<56x224xf32> to vector<56x224xbf16>
    %c2_140 = arith.constant 2 : index
    %c0_141 = arith.constant 0 : index
    %c0_142 = arith.constant 0 : index
    %307 = vector.load %arg10[%c2_140, %c0_141, %c0_142] : memref<4x224x28xbf16, #tpu.memory_space<vmem>>, vector<1x224x28xbf16>
    %308 = vector.shape_cast %307 : vector<1x224x28xbf16> to vector<224x28xbf16>
    %cst_143 = arith.constant dense<0.000000e+00> : vector<56x28xf32>
    %309 = tpu.matmul %306, %308, %cst_143 {dimension_numbers = #tpu.dot_dimension_numbers<[1], [0], [0], [1], [0, 0, 1, 1], [], []>} : vector<56x224xbf16>, vector<224x28xbf16>, vector<56x28xf32> -> vector<56x28xf32>
    %310 = arith.addf %302, %309 : vector<56x28xf32>
    %c3_144 = arith.constant 3 : index
    %c0_145 = arith.constant 0 : index
    %c0_146 = arith.constant 0 : index
    %311 = vector.load %arg9[%c3_144, %c0_145, %c0_146] : memref<4x56x28xbf16, #tpu.memory_space<vmem>>, vector<1x56x28xbf16>
    %312 = vector.shape_cast %311 : vector<1x56x28xbf16> to vector<56x28xbf16>
    %cst_147 = arith.constant dense<0.000000e+00> : vector<56x224xf32>
    %313 = tpu.matmul %312, %287, %cst_147 {dimension_numbers = #tpu.dot_dimension_numbers<[1], [0], [0], [1], [0, 0, 1, 1], [], []>} : vector<56x28xbf16>, vector<28x224xbf16>, vector<56x224xf32> -> vector<56x224xf32>
    %314 = arith.truncf %313 : vector<56x224xf32> to vector<56x224xbf16>
    %c3_148 = arith.constant 3 : index
    %c0_149 = arith.constant 0 : index
    %c0_150 = arith.constant 0 : index
    %315 = vector.load %arg10[%c3_148, %c0_149, %c0_150] : memref<4x224x28xbf16, #tpu.memory_space<vmem>>, vector<1x224x28xbf16>
    %316 = vector.shape_cast %315 : vector<1x224x28xbf16> to vector<224x28xbf16>
    %cst_151 = arith.constant dense<0.000000e+00> : vector<56x28xf32>
    %317 = tpu.matmul %314, %316, %cst_151 {dimension_numbers = #tpu.dot_dimension_numbers<[1], [0], [0], [1], [0, 0, 1, 1], [], []>} : vector<56x224xbf16>, vector<224x28xbf16>, vector<56x28xf32> -> vector<56x28xf32>
    %318 = arith.addf %310, %317 : vector<56x28xf32>
    %cst_152 = arith.constant 0.000000e+00 : f32
    %319 = vector.broadcast %cst_152 : f32 to vector<56x28xf32>
    %320 = arith.subf %319, %318 : vector<56x28xf32>
    %321 = math.exp %320 : vector<56x28xf32>
    %cst_153 = arith.constant 1.000000e+00 : f32
    %322 = vector.broadcast %cst_153 : f32 to vector<56x28xf32>
    %323 = arith.addf %322, %321 : vector<56x28xf32>
    %324 = tpu.reciprocal %323 {approx = true} : vector<56x28xf32> -> vector<56x28xf32>
    %cst_154 = arith.constant 1.000000e+00 : f32
    %325 = vector.broadcast %cst_154 : f32 to vector<56x28xf32>
    %326 = arith.minimumf %324, %325 : vector<56x28xf32>
    %c0_155 = arith.constant 0 : index
    %c0_156 = arith.constant 0 : index
    %327 = vector.load %arg11[%c0_155, %c0_156] : memref<56x28xf32, #tpu.memory_space<vmem>>, vector<56x28xf32>
    tpu.vector_store %arg11[%c0_155, %c0_156], %326 {strides = array<i32>} : memref<56x28xf32, #tpu.memory_space<vmem>>, vector<56x28xf32>,
    return
  }
}

</mosaic_0001>

<bundles_post_ra>
// kernel: cnn_decoder_forward.1
= control target key start
LH: loop header
LB: loop body
LE: loop exit
PB: predicated region body
PF: predicated region fallthrough
CT: control target
= control target key end

     0   :  { %16 = vsyncpa [#allocation3], 0  ;;  %s10686_s0 = inlined_call_operand.vmem [shape: f32[2,32], index: 0, kind: input, shape index: {}]   ;;  %s10687_s1 = inlined_call_operand.vmem [shape: bf16[32,512], index: 1, kind: input, shape index: {}]   ;;  %s10688_s2 = inlined_call_operand.vmem [shape: f32[1,512], index: 2, kind: input, shape index: {}]   ;;  %s10689_s3 = inlined_call_operand.vmem [shape: bf16[4,8,2], index: 3, kind: input, shape index: {}]   ;;  %s10690_s4 = inlined_call_operand.vmem [shape: bf16[4,512,256], index: 4, kind: input, shape index: {}]   ;;  %s10691_s5 = inlined_call_operand.vmem [shape: bf16[3,14,8], index: 5, kind: input, shape index: {}]   ;;  %s10692_s6 = inlined_call_operand.vmem [shape: bf16[3,256,224], index: 6, kind: input, shape index: {}]   ;;  %s10693_s7 = inlined_call_operand.vmem [shape: bf16[4,28,14], index: 7, kind: input, shape index: {}]   ;;  %s10694_s8 = inlined_call_operand.hbm [shape: bf16[4,224,224], index: 8, kind: input, shape index: {}]   ;;  %s10695_s9 = inlined_call_operand.vmem [shape: bf16[4,56,28], index: 9, kind: input, shape index: {}]   ;;  %s10696_s10 = inlined_call_operand.vmem [shape: bf16[4,224,28], index: 10, kind: input, shape index: {}]   ;;  %s10697_s11 = inlined_call_operand.hbm [shape: f32[56,28], index: 11, kind: output, shape index: {}]  }
   0x1   :  { %17 = vsyncpa [#allocation4], 0  ;;  %s8523_s17 = smov [#allocation2]   ;;  %s8475_s21 = scalar_lea.hbm %s10694_s8, 14336 }
   0x2   :  { %s39_s18 = sshll.u32 %s8523_s17, 4  ;;  %p8476_p0 = scmp.ne.s32.totalorder %s10694_s8, %s8475_s21  ;;  %s40_s18 = int_to_ptr.vmem [resolvable:$true] %s39_s18 }
   0x3   :  { %p8479_p1 = scmp.lt.u32.totalorder %s8475_s21, %s10694_s8 }
   0x5   :  { %p8481_p2 = pnand %p8479_p1, %p8476_p0 }
   0x7   :  { %8484 = shalt.err (!%p8481_p2)
}
   0x8   :  { %s8485_s26 = scalar_lea.vmem %s40_s18, 14336  ;;  %p8490_p4 = scmp.lt.s32.totalorder %s40_s18, %s40_s18 }
   0x9   :  { %p8486_p3 = scmp.ne.s32.totalorder %s40_s18, %s8485_s26  ;;  %p8491_p5 = scmp.lt.s32.totalorder %s8485_s26, %s8485_s26 }
   0xb   :  { %p8492_p6 = por %p8491_p5, %p8490_p4 }
   0xd   :  { %p8493_p7 = pnand %p8492_p6, %p8486_p3 }
   0xf   :  { %8496 = shalt.err (!%p8493_p7)
}
  0x10   :  { %s8524_s27 = smov 128   ;;  %s8525_s28 = smov 8  }
  0x11   :  { %45 = dma.hbm_to_vmem [thread:$0]  %s10694_s8, 14336, %s40_s18, [#allocation3], %s8524_s27, %s8524_s27, %s8525_s28  }
  0x12   :  { %8519 = dma.done.wait [#allocation3], 14336  }
  0x13   :  { %8520 = vsyncadd [#allocation3], 4294952960  ;;  %v8526_v0 = vmov 0   ;;  %v7642_v1 = vld [vmem:[%s10687_s1 + $0x4] ss:$16 sps:$4 sm:$0xff]   ;;  %vm126_vm0 = vcmask 261120   ;;  %v66_v11 = vlaneseq }
  0x14   :  { %162 = vmatprep.mubr.bf16.mxu0 %v8526_v0  ;;  %203 = vmatprep.mubr.bf16.mxu1 %v8526_v0  ;;  %v7644_v2 = vld [vmem:[%s10687_s1 + $0xc] ss:$16 sps:$4 sm:$0xff]   ;;  %v7646_v3 = vld [vmem:[%s10687_s1] ss:$16 sps:$4 sm:$0xff]   ;;  %v7647_v4 = vld [vmem:[%s10687_s1 + $0x8] ss:$16 sps:$4 sm:$0xff]  }
  0x15   :  { %130 = vmatprep.subr.bf16.mxu0 %v7642_v1  ;;  %171 = vmatprep.subr.bf16.mxu1 %v7644_v2  ;;  %v7648_v5 = vld [vmem:[%s10687_s1 + $0x24] ss:$16 sps:$4 sm:$0xff]   ;;  %v7650_v6 = vld [vmem:[%s10687_s1 + $0x2c] ss:$16 sps:$4 sm:$0xff]   ;;  %v7652_v7 = vld [vmem:[%s10687_s1 + $0x20] ss:$16 sps:$4 sm:$0xff]  }
  0x16   :  { %131 = vmatpush1.bf16.msra.mxu0 %v7646_v3  ;;  %172 = vmatpush1.bf16.msra.mxu1 %v7647_v4  ;;  %v7653_v8 = vld [vmem:[%s10687_s1 + $0x28] ss:$16 sps:$4 sm:$0xff]   ;;  %v54_v9 = vld [vmem:[%s10686_s0] sm:$0x3]  ;;  %v67_v12 = vshrl.u32 %v66_v11, 7  ;;  %vm212_vm1 = vcmask 1041408  }
  0x17   :  { %132 = vmatprep.subr.bf16.mxu0 %v7648_v5  ;;  %173 = vmatprep.subr.bf16.mxu1 %v7650_v6  ;;  %v55_v10 = vpack.c.bf16 %v54_v9, %v54_v9  ;;  %v64_v13 = vld [vmem:[%s10688_s2] sm:$0xf]  ;;  %vm311_vm2 = vcmask 1040384   ;;  %vm307_vm3 = vcmask 15360   ;;  %vm2617_vm4 = vcmask 523264   ;;  %s8529_s30 = smov 32  }
  0x18   :  { %v8646_v14 = vsub.s32 0, %v67_v12  ;;  %v76_v15 = vsub.s32 2, %v67_v12  ;;  %v72_v16 = vsub.s32 1, %v67_v12  ;;  %v80_v17 = vsub.s32 3, %v67_v12  ;;  %s8531_s22 = smov 80   ;;  %s8532_s23 = smov 48  }
  0x19   :  { %vm2651_vm5 = vcmask 1043456   ;;  %vm2647_vm6 = vcmask 64512   ;;  %vm3526_vm7 = vcmask 1045504   ;;  %vm3535_vm8 = vcmask 785408   ;;  %s8533_s24 = smov 16  }
  0x1a   :  { %133 = vmatpush1.bf16.msra.mxu0 %v7652_v7  ;;  %174 = vmatpush1.bf16.msra.mxu1 %v7653_v8  ;;  %v69_v18 = vrot.slane %v64_v13, %v8646_v14  ;;  %v77_v19 = vrot.slane %v64_v13, %v76_v15  ;;  %v73_v20 = vrot.slane %v64_v13, %v72_v16  ;;  %vm3537_vm9 = vcmask 783360  }
  0x1b   :  { %v81_v21 = vrot.slane %v64_v13, %v80_v17  ;;  %vm3701_vm10 = vcmask 1046528   ;;  %vm3694_vm11 = vcmask 113664   ;;  %vm4941_vm12 = vcmask 781312  }
  0x1c   :  { %vm5116_vm13 = vcmask 130048   ;;  %vm5119_vm14 = vcmask 392192   ;;  %vm5122_vm15 = vcmask 654336  }
  0x1d   :  { %6517 = vmatmul.mubr.msk.bf16.vlgmr.msra.gmra.mrb[0].mxu0 %vm126_vm0, %v55_v10  ;;  %6518 = vmatmul.mubr.msk.bf16.vlgmr.msra.gmra.mrb[0].mxu1 %vm126_vm0, %v55_v10 }
  0x1e   :  { %356 = vmatprep.mubr.bf16.mxu0 %v8526_v0  ;;  %397 = vmatprep.mubr.bf16.mxu1 %v8526_v0 }
  0xf0   :  { %v164_v22 = vpop.f32.mrb[0].mxu0  ;;  %v205_v23 = vpop.f32.mrb[0].mxu1 }
  0xf1   :  { %v165_v24 = vadd.f32 %v164_v22, %v69_v18  ;;  %v206_v25 = vadd.f32 %v205_v23, %v77_v19  ;;  %v166_v26 = vpop.f32.mrb[1].mxu0  ;;  %v207_v27 = vpop.f32.mrb[1].mxu1 }
  0xf2   :  { %v167_v28 = vadd.f32 %v166_v26, %v73_v20  ;;  %v208_v29 = vadd.f32 %v207_v27, %v81_v21  ;;  %v168_v30 = vpop.f32.mrb[2].mxu0  ;;  %v209_v31 = vpop.f32.mrb[2].mxu1 }
  0xf3   :  { %v213_v32 = vsel %vm212_vm1, %v165_v24, 0.0  ;;  %v227_v33 = vsel %vm212_vm1, %v206_v25, 0.0  ;;  %v169_v34 = vpop.f32.mrb[3].mxu0  ;;  %v210_v35 = vpop.f32.mrb[3].mxu1 }
  0xf4   :  { %v214_v36 = vrot.slane %v213_v32, 4  ;;  %v228_v37 = vrot.slane %v227_v33, 4  ;;  %v220_v38 = vsel %vm212_vm1, %v167_v28, 0.0  ;;  %v234_v39 = vsel %vm212_vm1, %v208_v29, 0.0 }
  0xf5   :  { %v221_v40 = vrot.slane %v220_v38, 4  ;;  %v235_v41 = vrot.slane %v234_v39, 4 }
  0xf6   :  { %v215_v42 = vadd.f32 %v214_v36, %v213_v32  ;;  %v229_v43 = vadd.f32 %v228_v37, %v227_v33 }
  0xf7   :  { %v222_v44 = vadd.f32 %v221_v40, %v220_v38  ;;  %v236_v45 = vadd.f32 %v235_v41, %v234_v39 }
  0xf8   :  { %v216_v46 = vrot.slane %v215_v42, 2  ;;  %v230_v47 = vrot.slane %v229_v43, 2 }
  0xf9   :  { %v223_v48 = vrot.slane %v222_v44, 2  ;;  %v237_v49 = vrot.slane %v236_v45, 2 }
  0xfa   :  { %v217_v50 = vadd.f32 %v216_v46, %v215_v42  ;;  %v231_v51 = vadd.f32 %v230_v47, %v229_v43 }
  0xfb   :  { %v224_v52 = vadd.f32 %v223_v48, %v222_v44  ;;  %v238_v53 = vadd.f32 %v237_v49, %v236_v45 }
  0xfc   :  { %v218_v54 = vrot.slane %v217_v50, 1  ;;  %v232_v55 = vrot.slane %v231_v51, 1 }
  0xfd   :  { %v225_v56 = vrot.slane %v224_v52, 1  ;;  %v239_v57 = vrot.slane %v238_v53, 1 }
  0xfe   :  { %v219_v58 = vadd.f32 %v218_v54, %v217_v50  ;;  %v233_v59 = vadd.f32 %v232_v55, %v231_v51 }
  0xff   :  { %v226_v60 = vadd.f32 %v225_v56, %v224_v52  ;;  %v240_v61 = vadd.f32 %v239_v57, %v238_v53 }
 0x100   :  { %v242_v62 = vmul.f32 0.5, %v219_v58  ;;  %v244_v63 = vmul.f32 0.5, %v233_v59 }
 0x101   :  { %v243_v1 = vmul.f32 0.5, %v226_v60  ;;  %v245_v2 = vmul.f32 0.5, %v240_v61 }
 0x102   :  { %v246_v3 = vsub.f32 %v165_v24, %v242_v62  ;;  %v248_v4 = vsub.f32 %v206_v25, %v244_v63 }
 0x103   :  { %v247_v5 = vsub.f32 %v167_v28, %v243_v1  ;;  %v249_v6 = vsub.f32 %v208_v29, %v245_v2 }
 0x104   :  { %v250_v7 = vmul.f32 %v246_v3, %v246_v3  ;;  %v252_v8 = vmul.f32 %v248_v4, %v248_v4 }
 0x105   :  { %v251_v9 = vmul.f32 %v247_v5, %v247_v5  ;;  %v253_v10 = vmul.f32 %v249_v6, %v249_v6 }
 0x106   :  { %v254_v11 = vsel %vm212_vm1, %v250_v7, 0.0  ;;  %v268_v12 = vsel %vm212_vm1, %v252_v8, 0.0  ;;  %v7702_v7 = vld [vmem:[%s10690_s4 + $0x300] ss:$8 sps:$4 sm:$0xff]  }
 0x107   :  { %v255_v13 = vrot.slane %v254_v11, 4  ;;  %v269_v15 = vrot.slane %v268_v12, 4  ;;  %v261_v16 = vsel %vm212_vm1, %v251_v9, 0.0  ;;  %v275_v17 = vsel %vm212_vm1, %v253_v10, 0.0  ;;  %v7654_v8 = vld [vmem:[%s10690_s4 + $0x200] ss:$8 sps:$4 sm:$0xff]  }
 0x108   :  { %v262_v18 = vrot.slane %v261_v16, 4  ;;  %v276_v19 = vrot.slane %v275_v17, 4  ;;  %v7707_v9 = vld [vmem:[%s10690_s4 + $0x314] ss:$8 sps:$4 sm:$0xff]   ;;  %vm5125_vm1 = vcmask 916480  }
 0x109   :  { %v256_v20 = vadd.f32 %v255_v13, %v254_v11  ;;  %v270_v21 = vadd.f32 %v269_v15, %v268_v12  ;;  %v7659_v10 = vld [vmem:[%s10690_s4 + $0x214] ss:$8 sps:$4 sm:$0xff]   ;;  %v7705_v11 = vld [vmem:[%s10690_s4 + $0x310] ss:$8 sps:$4 sm:$0xff]   ;;  %v7710_v13 = vld [vmem:[%s10690_s4 + $0x324] ss:$8 sps:$4 sm:$0xff]  }
 0x10a   :  { %v263_v22 = vadd.f32 %v262_v18, %v261_v16  ;;  %v277_v23 = vadd.f32 %v276_v19, %v275_v17  ;;  %v7657_v12 = vld [vmem:[%s10690_s4 + $0x210] ss:$8 sps:$4 sm:$0xff]   ;;  %v7662_v15 = vld [vmem:[%s10690_s4 + $0x224] ss:$8 sps:$4 sm:$0xff]   ;;  %v7708_v16 = vld [vmem:[%s10690_s4 + $0x320] ss:$8 sps:$4 sm:$0xff]  }
 0x10b   :  { %v257_v24 = vrot.slane %v256_v20, 2  ;;  %v271_v25 = vrot.slane %v270_v21, 2  ;;  %v7660_v17 = vld [vmem:[%s10690_s4 + $0x220] ss:$8 sps:$4 sm:$0xff]   ;;  %v7713_v18 = vld [vmem:[%s10690_s4 + $0x334] ss:$8 sps:$4 sm:$0xff]  }
 0x10c   :  { %v264_v26 = vrot.slane %v263_v22, 2  ;;  %v278_v27 = vrot.slane %v277_v23, 2  ;;  %v7665_v19 = vld [vmem:[%s10690_s4 + $0x234] ss:$8 sps:$4 sm:$0xff]  }
 0x10d   :  { %v258_v28 = vadd.f32 %v257_v24, %v256_v20  ;;  %v272_v29 = vadd.f32 %v271_v25, %v270_v21  ;;  %v7711_v20 = vld [vmem:[%s10690_s4 + $0x330] ss:$8 sps:$4 sm:$0xff]   ;;  %v7714_v24 = vld [vmem:[%s10690_s4 + $0x340] ss:$8 sps:$4 sm:$0xff]  }
 0x10e   :  { %v265_v30 = vadd.f32 %v264_v26, %v263_v22  ;;  %v279_v31 = vadd.f32 %v278_v27, %v277_v23  ;;  %v7663_v21 = vld [vmem:[%s10690_s4 + $0x230] ss:$8 sps:$4 sm:$0xff]   ;;  %v7716_v22 = vld [vmem:[%s10690_s4 + $0x344] ss:$8 sps:$4 sm:$0xff]   ;;  %v7666_v25 = vld [vmem:[%s10690_s4 + $0x240] ss:$8 sps:$4 sm:$0xff]  }
 0x10f   :  { %v259_v32 = vrot.slane %v258_v28, 1  ;;  %v273_v33 = vrot.slane %v272_v29, 1  ;;  %v7668_v23 = vld [vmem:[%s10690_s4 + $0x244] ss:$8 sps:$4 sm:$0xff]   ;;  %v7719_v26 = vld [vmem:[%s10690_s4 + $0x354] ss:$8 sps:$4 sm:$0xff]  }
 0x110   :  { %v266_v34 = vrot.slane %v265_v30, 1  ;;  %v280_v35 = vrot.slane %v279_v31, 1  ;;  %v7671_v27 = vld [vmem:[%s10690_s4 + $0x254] ss:$8 sps:$4 sm:$0xff]  }
 0x111   :  { %v260_v36 = vadd.f32 %v259_v32, %v258_v28  ;;  %v274_v37 = vadd.f32 %v273_v33, %v272_v29  ;;  %v7717_v28 = vld [vmem:[%s10690_s4 + $0x350] ss:$8 sps:$4 sm:$0xff]   ;;  %v7720_v32 = vld [vmem:[%s10690_s4 + $0x360] ss:$8 sps:$4 sm:$0xff]  }
 0x112   :  { %v267_v38 = vadd.f32 %v266_v34, %v265_v30  ;;  %v281_v39 = vadd.f32 %v280_v35, %v279_v31  ;;  %v7669_v29 = vld [vmem:[%s10690_s4 + $0x250] ss:$8 sps:$4 sm:$0xff]   ;;  %v7722_v30 = vld [vmem:[%s10690_s4 + $0x364] ss:$8 sps:$4 sm:$0xff]   ;;  %v7672_v33 = vld [vmem:[%s10690_s4 + $0x260] ss:$8 sps:$4 sm:$0xff]  }
 0x113   :  { %v282_v40 = vmul.f32 0.5, %v260_v36  ;;  %v284_v41 = vmul.f32 0.5, %v274_v37  ;;  %v7674_v31 = vld [vmem:[%s10690_s4 + $0x264] ss:$8 sps:$4 sm:$0xff]   ;;  %v7725_v34 = vld [vmem:[%s10690_s4 + $0x374] ss:$8 sps:$4 sm:$0xff]  }
 0x114   :  { %v283_v42 = vmul.f32 0.5, %v267_v38  ;;  %v285_v43 = vmul.f32 0.5, %v281_v39  ;;  %v7677_v35 = vld [vmem:[%s10690_s4 + $0x274] ss:$8 sps:$4 sm:$0xff]   ;;  %v7723_v36 = vld [vmem:[%s10690_s4 + $0x370] ss:$8 sps:$4 sm:$0xff]  }
 0x115   :  { %v286_v44 = vadd.f32 1e-05, %v282_v40  ;;  %v288_v45 = vadd.f32 1e-05, %v284_v41  ;;  %v7675_v37 = vld [vmem:[%s10690_s4 + $0x270] ss:$8 sps:$4 sm:$0xff]  }
 0x116   :  { %v287_v46 = vadd.f32 1e-05, %v283_v42  ;;  %v289_v47 = vadd.f32 1e-05, %v285_v43  ;;  %v7728_v38 = vld [vmem:[%s10690_s4 + $0x384] ss:$8 sps:$4 sm:$0xff]  }
 0x117   :  { %8433 = vrsqrt.f32 %v286_v44  ;;  %v7680_v39 = vld [vmem:[%s10690_s4 + $0x284] ss:$8 sps:$4 sm:$0xff]   ;;  %v7726_v40 = vld [vmem:[%s10690_s4 + $0x380] ss:$8 sps:$4 sm:$0xff]   ;;  %v7731_v42 = vld [vmem:[%s10690_s4 + $0x394] ss:$8 sps:$4 sm:$0xff]  }
 0x118   :  { %8435 = vrsqrt.f32 %v288_v45  ;;  %v7678_v41 = vld [vmem:[%s10690_s4 + $0x280] ss:$8 sps:$4 sm:$0xff]   ;;  %v7683_v43 = vld [vmem:[%s10690_s4 + $0x294] ss:$8 sps:$4 sm:$0xff]   ;;  %v7729_v44 = vld [vmem:[%s10690_s4 + $0x390] ss:$8 sps:$4 sm:$0xff]  }
 0x119   :  { %8437 = vrsqrt.f32 %v287_v46  ;;  %v7681_v45 = vld [vmem:[%s10690_s4 + $0x290] ss:$8 sps:$4 sm:$0xff]   ;;  %v7734_v46 = vld [vmem:[%s10690_s4 + $0x3a4] ss:$8 sps:$4 sm:$0xff]  }
 0x11a   :  { %8439 = vrsqrt.f32 %v289_v47  ;;  %v7686_v47 = vld [vmem:[%s10690_s4 + $0x2a4] ss:$8 sps:$4 sm:$0xff]  }
 0x121   :  { %v8434_v48 = vpop.eup %8433 }
 0x122   :  { %v8436_v49 = vpop.eup %8435  ;;  %v294_v50 = vmul.f32 %v8434_v48, %v246_v3  ;;  %v306_v3 = vld [vmem:[%s10689_s3] sm:$0xf] }
 0x123   :  { %v8438_v51 = vpop.eup %8437  ;;  %v296_v52 = vmul.f32 %v8436_v49, %v248_v4  ;;  %v7656_v4 = vld [vmem:[%s10690_s4 + $0x204] ss:$8 sps:$4 sm:$0xff]   ;;  %v7732_v48 = vld [vmem:[%s10690_s4 + $0x3a0] ss:$8 sps:$4 sm:$0xff]  }
 0x124   :  { %v8440_v53 = vpop.eup %8439  ;;  %v298_v54 = vmax.f32 %v294_v50, 0.0  ;;  %v295_v55 = vmul.f32 %v8438_v51, %v247_v5  ;;  %v7704_v5 = vld [vmem:[%s10690_s4 + $0x304] ss:$8 sps:$4 sm:$0xff]   ;;  %v7684_v49 = vld [vmem:[%s10690_s4 + $0x2a0] ss:$8 sps:$4 sm:$0xff]  }
 0x125   :  { %v300_v56 = vmax.f32 %v296_v52, 0.0  ;;  %v297_v57 = vmul.f32 %v8440_v53, %v249_v6  ;;  %v6523_v6 = vld [vmem:[%s10689_s3 + $0x4] sm:$0xf]  ;;  %v7737_v50 = vld [vmem:[%s10690_s4 + $0x3b4] ss:$8 sps:$4 sm:$0xff]  }
 0x126   :  { %v299_v58 = vmax.f32 %v295_v55, 0.0  ;;  %v302_v59 = vpack.c.bf16 %v298_v54, %v298_v54  ;;  %v7689_v51 = vld [vmem:[%s10690_s4 + $0x2b4] ss:$8 sps:$4 sm:$0xff]   ;;  %v7735_v52 = vld [vmem:[%s10690_s4 + $0x3b0] ss:$8 sps:$4 sm:$0xff]  }
 0x127   :  { %v301_v60 = vmax.f32 %v297_v57, 0.0  ;;  %v304_v61 = vpack.c.bf16 %v300_v56, %v300_v56  ;;  %v7687_v53 = vld [vmem:[%s10690_s4 + $0x2b0] ss:$8 sps:$4 sm:$0xff]   ;;  %v7740_v54 = vld [vmem:[%s10690_s4 + $0x3c4] ss:$8 sps:$4 sm:$0xff]  }
 0x128   :  { %v8657_v62 = vpack.c.bf16 %v299_v58, %v299_v58  ;;  %v8660_v63 = vsel %vm311_vm2, %v302_v59, 0  ;;  %v7692_v55 = vld [vmem:[%s10690_s4 + $0x2c4] ss:$8 sps:$4 sm:$0xff]   ;;  %v7738_v56 = vld [vmem:[%s10690_s4 + $0x3c0] ss:$8 sps:$4 sm:$0xff]  }
 0x129   :  { %v8662_v1 = vpack.c.bf16 %v301_v60, %v301_v60  ;;  %v8665_v2 = vsel %vm311_vm2, %v304_v61, 0  ;;  %v7690_v57 = vld [vmem:[%s10690_s4 + $0x2c0] ss:$8 sps:$4 sm:$0xff]   ;;  %v7695_v58 = vld [vmem:[%s10690_s4 + $0x2d4] ss:$8 sps:$4 sm:$0xff]  }
 0x12a   :  { %6519 = vmatprep.subr.msk.bf16.mxu0 %vm311_vm2, %v8657_v62  ;;  %v7693_v59 = vld [vmem:[%s10690_s4 + $0x2d0] ss:$8 sps:$4 sm:$0xff]   ;;  %v7698_v60 = vld [vmem:[%s10690_s4 + $0x2e4] ss:$8 sps:$4 sm:$0xff]   ;;  %v7696_v61 = vld [vmem:[%s10690_s4 + $0x2e0] ss:$8 sps:$4 sm:$0xff]  }
 0x12b   :  { %6521 = vmatprep.subr.msk.bf16.mxu1 %vm311_vm2, %v8662_v1  ;;  %325 = vmatpush1.bf16.msra.mxu0 %v8660_v63 }
 0x12c   :  { %366 = vmatpush1.bf16.msra.mxu1 %v8665_v2  ;;  %6524 = vmatprep.subr.msk.bf16.mxu0 %vm311_vm2, %v8657_v62 }
 0x12d   :  { %6526 = vmatprep.subr.msk.bf16.mxu1 %vm311_vm2, %v8662_v1 }
 0x12e   :  { %6520 = vmatmul.mubr.msk.bf16.vlgmr.msra.gmra.mrb[4].mxu0 %vm307_vm3, %v306_v3 }
 0x12f   :  { %6522 = vmatmul.mubr.msk.bf16.vlgmr.msra.gmra.mrb[4].mxu1 %vm307_vm3, %v306_v3  ;;  %480 = vmatpush1.bf16.msra.mxu0 %v8660_v63  ;;  %v7701_v3 = vld [vmem:[%s10690_s4 + $0x2f4] ss:$8 sps:$4 sm:$0xff]  }
 0x130   :  { %521 = vmatpush1.bf16.msra.mxu1 %v8665_v2  ;;  %511 = vmatprep.mubr.bf16.mxu0 %v8526_v0 }
 0x131   :  { %552 = vmatprep.mubr.bf16.mxu1 %v8526_v0  ;;  %950 = vmatprep.subr.bf16.mxu1 %v7656_v4  ;;  %v7699_v4 = vld [vmem:[%s10690_s4 + $0x2f0] ss:$8 sps:$4 sm:$0xff]  }
 0x132   :  { %991 = vmatprep.subr.bf16.mxu0 %v7704_v5  ;;  %v7743_v5 = vld [vmem:[%s10690_s4 + $0x3d4] ss:$8 sps:$4 sm:$0xff]  }
 0x136   :  { %6525 = vmatmul.mubr.msk.bf16.vlgmr.msra.gmra.mrb[8].mxu0 %vm307_vm3, %v6523_v6 }
 0x137   :  { %6527 = vmatmul.mubr.msk.bf16.vlgmr.msra.gmra.mrb[8].mxu1 %vm307_vm3, %v6523_v6  ;;  %992 = vmatpush1.bf16.msra.mxu0 %v7702_v7  ;;  %v7741_v6 = vld [vmem:[%s10690_s4 + $0x3d0] ss:$8 sps:$4 sm:$0xff]   ;;  %v7744_v7 = vld [vmem:[%s10690_s4 + $0x3e0] ss:$8 sps:$4 sm:$0xff]  }
 0x138   :  { %951 = vmatpush1.bf16.msra.mxu1 %v7654_v8  ;;  %993 = vmatprep.subr.bf16.mxu0 %v7707_v9  ;;  %v7746_v8 = vld [vmem:[%s10690_s4 + $0x3e4] ss:$8 sps:$4 sm:$0xff]   ;;  %v7749_v9 = vld [vmem:[%s10690_s4 + $0x3f4] ss:$8 sps:$4 sm:$0xff]  }
 0x139   :  { %952 = vmatprep.subr.bf16.mxu1 %v7659_v10  ;;  %v7747_v10 = vld [vmem:[%s10690_s4 + $0x3f0] ss:$8 sps:$4 sm:$0xff]  }
 0x13b   :  { %994 = vmatpush1.bf16.msra.mxu0 %v7705_v11  ;;  %v7752_v11 = vld [vmem:[%s10690_s4 + $0x4] ss:$8 sps:$4 sm:$0xff]  }
 0x13c   :  { %953 = vmatpush1.bf16.msra.mxu1 %v7657_v12  ;;  %995 = vmatprep.subr.bf16.mxu0 %v7710_v13 }
 0x13d   :  { %954 = vmatprep.subr.bf16.mxu1 %v7662_v15 }
 0x13f   :  { %996 = vmatpush1.bf16.msra.mxu0 %v7708_v16 }
 0x140   :  { %955 = vmatpush1.bf16.msra.mxu1 %v7660_v17  ;;  %997 = vmatprep.subr.bf16.mxu0 %v7713_v18 }
 0x141   :  { %956 = vmatprep.subr.bf16.mxu1 %v7665_v19 }
 0x143   :  { %998 = vmatpush1.bf16.msra.mxu0 %v7711_v20 }
 0x144   :  { %957 = vmatpush1.bf16.msra.mxu1 %v7663_v21  ;;  %999 = vmatprep.subr.bf16.mxu0 %v7716_v22 }
 0x145   :  { %958 = vmatprep.subr.bf16.mxu1 %v7668_v23 }
 0x147   :  { %1000 = vmatpush1.bf16.msra.mxu0 %v7714_v24 }
 0x148   :  { %959 = vmatpush1.bf16.msra.mxu1 %v7666_v25  ;;  %1001 = vmatprep.subr.bf16.mxu0 %v7719_v26 }
 0x149   :  { %960 = vmatprep.subr.bf16.mxu1 %v7671_v27 }
 0x14b   :  { %1002 = vmatpush1.bf16.msra.mxu0 %v7717_v28 }
 0x14c   :  { %961 = vmatpush1.bf16.msra.mxu1 %v7669_v29  ;;  %1003 = vmatprep.subr.bf16.mxu0 %v7722_v30 }
 0x14d   :  { %962 = vmatprep.subr.bf16.mxu1 %v7674_v31  ;;  %v7750_v31 = vld [vmem:[%s10690_s4] ss:$8 sps:$4 sm:$0xff]  }
 0x14f   :  { %1004 = vmatpush1.bf16.msra.mxu0 %v7720_v32 }
 0x150   :  { %963 = vmatpush1.bf16.msra.mxu1 %v7672_v33  ;;  %1005 = vmatprep.subr.bf16.mxu0 %v7725_v34  ;;  %v7755_v33 = vld [vmem:[%s10690_s4 + $0x14] ss:$8 sps:$4 sm:$0xff]  }
 0x151   :  { %964 = vmatprep.subr.bf16.mxu1 %v7677_v35 }
 0x153   :  { %1006 = vmatpush1.bf16.msra.mxu0 %v7723_v36  ;;  %v7753_v36 = vld [vmem:[%s10690_s4 + $0x10] ss:$8 sps:$4 sm:$0xff]  }
 0x154   :  { %965 = vmatpush1.bf16.msra.mxu1 %v7675_v37  ;;  %1007 = vmatprep.subr.bf16.mxu0 %v7728_v38  ;;  %v7758_v37 = vld [vmem:[%s10690_s4 + $0x24] ss:$8 sps:$4 sm:$0xff]   ;;  %v6720_v38 = vld [vmem:[%s10689_s3 + $0x8] sm:$0xf] }
 0x155   :  { %966 = vmatprep.subr.bf16.mxu1 %v7680_v39  ;;  %v7756_v39 = vld [vmem:[%s10690_s4 + $0x20] ss:$8 sps:$4 sm:$0xff]  }
 0x157   :  { %1008 = vmatpush1.bf16.msra.mxu0 %v7726_v40  ;;  %v7761_v40 = vld [vmem:[%s10690_s4 + $0x34] ss:$8 sps:$4 sm:$0xff]  }
 0x158   :  { %967 = vmatpush1.bf16.msra.mxu1 %v7678_v41  ;;  %1009 = vmatprep.subr.bf16.mxu0 %v7731_v42  ;;  %v7759_v41 = vld [vmem:[%s10690_s4 + $0x30] ss:$8 sps:$4 sm:$0xff]   ;;  %v7764_v42 = vld [vmem:[%s10690_s4 + $0x44] ss:$8 sps:$4 sm:$0xff]  }
 0x159   :  { %968 = vmatprep.subr.bf16.mxu1 %v7683_v43  ;;  %v7762_v43 = vld [vmem:[%s10690_s4 + $0x40] ss:$8 sps:$4 sm:$0xff]  }
 0x15b   :  { %1010 = vmatpush1.bf16.msra.mxu0 %v7729_v44  ;;  %v7767_v44 = vld [vmem:[%s10690_s4 + $0x54] ss:$8 sps:$4 sm:$0xff]  }
 0x15c   :  { %969 = vmatpush1.bf16.msra.mxu1 %v7681_v45  ;;  %1011 = vmatprep.subr.bf16.mxu0 %v7734_v46  ;;  %v7770_v45 = vld [vmem:[%s10690_s4 + $0x64] ss:$8 sps:$4 sm:$0xff]  }
 0x15d   :  { %970 = vmatprep.subr.bf16.mxu1 %v7686_v47  ;;  %v6853_v46 = vld [vmem:[%s10689_s3 + $0xc] sm:$0xf]  ;;  %v7771_v47 = vld [vmem:[%s10690_s4 + $0x70] ss:$8 sps:$4 sm:$0xff]  }
 0x15f   :  { %1012 = vmatpush1.bf16.msra.mxu0 %v7732_v48  ;;  %v7776_v48 = vld [vmem:[%s10690_s4 + $0x84] ss:$8 sps:$4 sm:$0xff]  }
 0x160   :  { %971 = vmatpush1.bf16.msra.mxu1 %v7684_v49  ;;  %1013 = vmatprep.subr.bf16.mxu0 %v7737_v50  ;;  %v7774_v49 = vld [vmem:[%s10690_s4 + $0x80] ss:$8 sps:$4 sm:$0xff]   ;;  %v7777_v50 = vld [vmem:[%s10690_s4 + $0x90] ss:$8 sps:$4 sm:$0xff]  }
 0x161   :  { %972 = vmatprep.subr.bf16.mxu1 %v7689_v51  ;;  %v7782_v51 = vld [vmem:[%s10690_s4 + $0xa4] ss:$8 sps:$4 sm:$0xff]  }
 0x163   :  { %1014 = vmatpush1.bf16.msra.mxu0 %v7735_v52  ;;  %v7780_v52 = vld [vmem:[%s10690_s4 + $0xa0] ss:$8 sps:$4 sm:$0xff]  }
 0x164   :  { %973 = vmatpush1.bf16.msra.mxu1 %v7687_v53  ;;  %1015 = vmatprep.subr.bf16.mxu0 %v7740_v54  ;;  %v7785_v53 = vld [vmem:[%s10690_s4 + $0xb4] ss:$8 sps:$4 sm:$0xff]   ;;  %v7783_v54 = vld [vmem:[%s10690_s4 + $0xb0] ss:$8 sps:$4 sm:$0xff]  }
 0x165   :  { %974 = vmatprep.subr.bf16.mxu1 %v7692_v55  ;;  %v7788_v55 = vld [vmem:[%s10690_s4 + $0xc4] ss:$8 sps:$4 sm:$0xff]  }
 0x167   :  { %1016 = vmatpush1.bf16.msra.mxu0 %v7738_v56  ;;  %v7786_v56 = vld [vmem:[%s10690_s4 + $0xc0] ss:$8 sps:$4 sm:$0xff]  }
 0x168   :  { %975 = vmatpush1.bf16.msra.mxu1 %v7690_v57  ;;  %1017 = vmatprep.subr.bf16.mxu0 %v7743_v5  ;;  %v7791_v57 = vld [vmem:[%s10690_s4 + $0xd4] ss:$8 sps:$4 sm:$0xff]   ;;  %v7798_v5 = vld [vmem:[%s10690_s4 + $0x100] ss:$8 sps:$4 sm:$0xff]  }
 0x169   :  { %976 = vmatprep.subr.bf16.mxu1 %v7695_v58  ;;  %v7789_v58 = vld [vmem:[%s10690_s4 + $0xd0] ss:$8 sps:$4 sm:$0xff]  }
 0x16b   :  { %1018 = vmatpush1.bf16.msra.mxu0 %v7741_v6 }
 0x16c   :  { %977 = vmatpush1.bf16.msra.mxu1 %v7693_v59  ;;  %1019 = vmatprep.subr.bf16.mxu0 %v7746_v8  ;;  %v7794_v59 = vld [vmem:[%s10690_s4 + $0xe4] ss:$8 sps:$4 sm:$0xff]  }
 0x16d   :  { %978 = vmatprep.subr.bf16.mxu1 %v7698_v60  ;;  %v7792_v60 = vld [vmem:[%s10690_s4 + $0xe0] ss:$8 sps:$4 sm:$0xff]  }
 0x16f   :  { %1020 = vmatpush1.bf16.msra.mxu0 %v7744_v7  ;;  %v7803_v7 = vld [vmem:[%s10690_s4 + $0x114] ss:$8 sps:$4 sm:$0xff]  }
 0x170   :  { %979 = vmatpush1.bf16.msra.mxu1 %v7696_v61  ;;  %1021 = vmatprep.subr.bf16.mxu0 %v7749_v9  ;;  %v7797_v61 = vld [vmem:[%s10690_s4 + $0xf4] ss:$8 sps:$4 sm:$0xff]   ;;  %v7801_v9 = vld [vmem:[%s10690_s4 + $0x110] ss:$8 sps:$4 sm:$0xff]  }
 0x171   :  { %980 = vmatprep.subr.bf16.mxu1 %v7701_v3  ;;  %v7795_v3 = vld [vmem:[%s10690_s4 + $0xf0] ss:$8 sps:$4 sm:$0xff]  }
 0x173   :  { %1022 = vmatpush1.bf16.msra.mxu0 %v7747_v10  ;;  %v7806_v10 = vld [vmem:[%s10690_s4 + $0x124] ss:$8 sps:$4 sm:$0xff]  }
 0x174   :  { %981 = vmatpush1.bf16.msra.mxu1 %v7699_v4  ;;  %1352 = vmatprep.subr.bf16.mxu0 %v7752_v11  ;;  %v7800_v4 = vld [vmem:[%s10690_s4 + $0x104] ss:$8 sps:$4 sm:$0xff]   ;;  %v7804_v11 = vld [vmem:[%s10690_s4 + $0x120] ss:$8 sps:$4 sm:$0xff]  }
 0x175   :  { %6721 = vmatprep.subr.msk.bf16.mxu1 %vm311_vm2, %v8657_v62 }
 0x201   :  { %v8888_v12 = vpop.f32.mrb[4].mxu0 }
 0x202   :  { %v360_v13 = vpop.f32.mrb[5].mxu0  ;;  %v8890_v15 = vpop.f32.mrb[4].mxu1  ;;  %v406_v6 = vpack.c.bf16 %v8888_v12, %v8888_v12  ;;  %v7809_v12 = vld [vmem:[%s10690_s4 + $0x134] ss:$8 sps:$4 sm:$0xff]  }
 0x203   :  { %v362_v16 = vpop.f32.mrb[6].mxu0  ;;  %v8892_v17 = vpop.f32.mrb[5].mxu1  ;;  %v407_v35 = vpack.c.bf16 %v360_v13, %v360_v13  ;;  %v7807_v13 = vld [vmem:[%s10690_s4 + $0x130] ss:$8 sps:$4 sm:$0xff]  }
 0x204   :  { %v363_v18 = vpop.f32.mrb[7].mxu0  ;;  %v403_v19 = vpop.f32.mrb[6].mxu1  ;;  %v409_v8 = vpack.c.bf16 %v8892_v17, %v8892_v17  ;;  %v7812_v16 = vld [vmem:[%s10690_s4 + $0x144] ss:$8 sps:$4 sm:$0xff]   ;;  %v7810_v17 = vld [vmem:[%s10690_s4 + $0x140] ss:$8 sps:$4 sm:$0xff]  }
 0x205   :  { %v404_v20 = vpop.f32.mrb[7].mxu1  ;;  %v7815_v18 = vld [vmem:[%s10690_s4 + $0x154] ss:$8 sps:$4 sm:$0xff]   ;;  %v7813_v19 = vld [vmem:[%s10690_s4 + $0x150] ss:$8 sps:$4 sm:$0xff]  }
 0x206   :  { %v7818_v20 = vld [vmem:[%s10690_s4 + $0x164] ss:$8 sps:$4 sm:$0xff]  }
 0x209   :  { %v513_v21 = vpop.f32.mrb[8].mxu0 }
 0x20a   :  { %v554_v22 = vpop.f32.mrb[8].mxu1  ;;  %v515_v23 = vpop.f32.mrb[9].mxu0  ;;  %v561_v28 = vpack.c.bf16 %v513_v21, %v513_v21  ;;  %v7816_v21 = vld [vmem:[%s10690_s4 + $0x160] ss:$8 sps:$4 sm:$0xff]  }
 0x20b   :  { %v563_v24 = vpack.c.bf16 %v554_v22, %v554_v22  ;;  %v562_v25 = vpack.c.bf16 %v515_v23, %v515_v23  ;;  %v556_v26 = vpop.f32.mrb[9].mxu1  ;;  %v517_v27 = vpop.f32.mrb[10].mxu0  ;;  %v7821_v22 = vld [vmem:[%s10690_s4 + $0x174] ss:$8 sps:$4 sm:$0xff]   ;;  %v7819_v23 = vld [vmem:[%s10690_s4 + $0x170] ss:$8 sps:$4 sm:$0xff]  }
 0x20c   :  { %v564_v29 = vpack.c.bf16 %v556_v26, %v556_v26  ;;  %v518_v30 = vpop.f32.mrb[11].mxu0  ;;  %v558_v32 = vpop.f32.mrb[10].mxu1  ;;  %v7827_v26 = vld [vmem:[%s10690_s4 + $0x194] ss:$8 sps:$4 sm:$0xff]   ;;  %v7825_v27 = vld [vmem:[%s10690_s4 + $0x190] ss:$8 sps:$4 sm:$0xff]  }
 0x20d   :  { %982 = vmatprep.mubr.bf16.mxu1 %v562_v25  ;;  %v559_v34 = vpop.f32.mrb[11].mxu1  ;;  %v7822_v25 = vld [vmem:[%s10690_s4 + $0x180] ss:$8 sps:$4 sm:$0xff]   ;;  %v7833_v30 = vld [vmem:[%s10690_s4 + $0x1b4] ss:$8 sps:$4 sm:$0xff]  }
 0x20e   :  { %1023 = vmatprep.mubr.bf16.mxu0 %v564_v29  ;;  %983 = vmatmul.mubr.bf16.vlgmr.msra.gmra.mrb[12].mxu1 %v561_v28  ;;  %v7830_v28 = vld [vmem:[%s10690_s4 + $0x1a4] ss:$8 sps:$4 sm:$0xff]   ;;  %v7828_v29 = vld [vmem:[%s10690_s4 + $0x1a0] ss:$8 sps:$4 sm:$0xff]   ;;  %v7839_v34 = vld [vmem:[%s10690_s4 + $0x1d4] ss:$8 sps:$4 sm:$0xff]  }
 0x20f   :  { %1024 = vmatmul.mubr.bf16.vlgmr.msra.gmra.mrb[12].mxu0 %v563_v24  ;;  %1440 = vmatpush1.bf16.msra.mxu1 %v8660_v63  ;;  %v7824_v24 = vld [vmem:[%s10690_s4 + $0x184] ss:$8 sps:$4 sm:$0xff]  }
 0x210   :  { %1353 = vmatpush1.bf16.msra.mxu0 %v7750_v31  ;;  %1384 = vmatprep.mubr.bf16.mxu0 %v407_v35  ;;  %v7831_v31 = vld [vmem:[%s10690_s4 + $0x1b0] ss:$8 sps:$4 sm:$0xff]   ;;  %v7836_v32 = vld [vmem:[%s10690_s4 + $0x1c4] ss:$8 sps:$4 sm:$0xff]  }
 0x211   :  { %6723 = vmatprep.subr.msk.bf16.mxu1 %vm311_vm2, %v8662_v1  ;;  %1354 = vmatprep.subr.bf16.mxu0 %v7755_v33  ;;  %v7834_v33 = vld [vmem:[%s10690_s4 + $0x1c0] ss:$8 sps:$4 sm:$0xff]   ;;  %v7837_v35 = vld [vmem:[%s10690_s4 + $0x1d0] ss:$8 sps:$4 sm:$0xff]  }
 0x212   :  { %1471 = vmatprep.mubr.bf16.mxu1 %v8526_v0 }
 0x214   :  { %1355 = vmatpush1.bf16.msra.mxu0 %v7753_v36  ;;  %v7842_v36 = vld [vmem:[%s10690_s4 + $0x1e4] ss:$8 sps:$4 sm:$0xff]  }
 0x215   :  { %1356 = vmatprep.subr.bf16.mxu0 %v7758_v37  ;;  %v7840_v37 = vld [vmem:[%s10690_s4 + $0x1e0] ss:$8 sps:$4 sm:$0xff]  }
 0x216   :  { %6722 = vmatmul.mubr.msk.bf16.vlgmr.msra.gmra.mrb[16].mxu1 %vm307_vm3, %v6720_v38 }
 0x217   :  { %1481 = vmatpush1.bf16.msra.mxu1 %v8665_v2  ;;  %1512 = vmatprep.mubr.bf16.mxu1 %v8526_v0 }
 0x218   :  { %1357 = vmatpush1.bf16.msra.mxu0 %v7756_v39  ;;  %6854 = vmatprep.subr.msk.bf16.mxu1 %vm311_vm2, %v8657_v62  ;;  %v7765_v62 = vld [vmem:[%s10690_s4 + $0x50] ss:$8 sps:$4 sm:$0xff]  }
 0x219   :  { %1358 = vmatprep.subr.bf16.mxu0 %v7761_v40  ;;  %v7843_v39 = vld [vmem:[%s10690_s4 + $0x1f0] ss:$8 sps:$4 sm:$0xff]   ;;  %v7848_v40 = vld [vmem:[%s10690_s4 + $0x404] ss:$8 sps:$4 sm:$0xff]  }
 0x21c   :  { %1359 = vmatpush1.bf16.msra.mxu0 %v7759_v41  ;;  %v7846_v41 = vld [vmem:[%s10690_s4 + $0x400] ss:$8 sps:$4 sm:$0xff]  }
 0x21d   :  { %1360 = vmatprep.subr.bf16.mxu0 %v7764_v42  ;;  %v408_v42 = vpack.c.bf16 %v8890_v15, %v8890_v15  ;;  %v7852_v15 = vld [vmem:[%s10690_s4 + $0x420] ss:$8 sps:$4 sm:$0xff]  }
 0x21e   :  { %6724 = vmatmul.mubr.msk.bf16.vlgmr.msra.gmra.mrb[20].mxu1 %vm307_vm3, %v6720_v38  ;;  %v7845_v38 = vld [vmem:[%s10690_s4 + $0x1f4] ss:$8 sps:$4 sm:$0xff]  }
 0x21f   :  { %2000 = vmatpush1.bf16.msra.mxu1 %v8660_v63  ;;  %2031 = vmatprep.mubr.bf16.mxu1 %v8526_v0  ;;  %v7768_v63 = vld [vmem:[%s10690_s4 + $0x60] ss:$8 sps:$4 sm:$0xff]  }
 0x220   :  { %1361 = vmatpush1.bf16.msra.mxu0 %v7762_v43  ;;  %6856 = vmatprep.subr.msk.bf16.mxu1 %vm311_vm2, %v8662_v1  ;;  %v7773_v1 = vld [vmem:[%s10690_s4 + $0x74] ss:$8 sps:$4 sm:$0xff]  }
 0x221   :  { %1362 = vmatprep.subr.bf16.mxu0 %v7767_v44  ;;  %v7851_v43 = vld [vmem:[%s10690_s4 + $0x414] ss:$8 sps:$4 sm:$0xff]   ;;  %v7849_v44 = vld [vmem:[%s10690_s4 + $0x410] ss:$8 sps:$4 sm:$0xff]  }
 0x224   :  { %1363 = vmatpush1.bf16.msra.mxu0 %v7765_v62  ;;  %v7854_v62 = vld [vmem:[%s10690_s4 + $0x424] ss:$8 sps:$4 sm:$0xff]  }
 0x225   :  { %1364 = vmatprep.subr.bf16.mxu0 %v7770_v45  ;;  %v7857_v45 = vld [vmem:[%s10690_s4 + $0x434] ss:$8 sps:$4 sm:$0xff]  }
 0x226   :  { %6855 = vmatmul.mubr.msk.bf16.vlgmr.msra.gmra.mrb[24].mxu1 %vm307_vm3, %v6853_v46 }
 0x227   :  { %2041 = vmatpush1.bf16.msra.mxu1 %v8665_v2  ;;  %2072 = vmatprep.mubr.bf16.mxu1 %v8526_v0  ;;  %v7779_v2 = vld [vmem:[%s10690_s4 + $0x94] ss:$8 sps:$4 sm:$0xff]  }
 0x228   :  { %1365 = vmatpush1.bf16.msra.mxu0 %v7768_v63  ;;  %v7860_v63 = vld [vmem:[%s10690_s4 + $0x444] ss:$8 sps:$4 sm:$0xff]  }
 0x229   :  { %1366 = vmatprep.subr.bf16.mxu0 %v7773_v1  ;;  %v7858_v1 = vld [vmem:[%s10690_s4 + $0x440] ss:$8 sps:$4 sm:$0xff]  }
 0x22c   :  { %1367 = vmatpush1.bf16.msra.mxu0 %v7771_v47  ;;  %v7863_v47 = vld [vmem:[%s10690_s4 + $0x454] ss:$8 sps:$4 sm:$0xff]  }
 0x22d   :  { %1368 = vmatprep.subr.bf16.mxu0 %v7776_v48  ;;  %v7861_v48 = vld [vmem:[%s10690_s4 + $0x450] ss:$8 sps:$4 sm:$0xff]  }
 0x22e   :  { %6857 = vmatmul.mubr.msk.bf16.vlgmr.msra.gmra.mrb[28].mxu1 %vm307_vm3, %v6853_v46  ;;  %v7855_v46 = vld [vmem:[%s10690_s4 + $0x430] ss:$8 sps:$4 sm:$0xff]  }
 0x22f   :  { %2690 = vmatprep.mubr.bf16.mxu1 %v8526_v0 }
 0x230   :  { %1369 = vmatpush1.bf16.msra.mxu0 %v7774_v49  ;;  %v7866_v49 = vld [vmem:[%s10690_s4 + $0x464] ss:$8 sps:$4 sm:$0xff]  }
 0x231   :  { %1370 = vmatprep.subr.bf16.mxu0 %v7779_v2  ;;  %v7864_v2 = vld [vmem:[%s10690_s4 + $0x460] ss:$8 sps:$4 sm:$0xff]  }
 0x234   :  { %1371 = vmatpush1.bf16.msra.mxu0 %v7777_v50  ;;  %v7869_v50 = vld [vmem:[%s10690_s4 + $0x474] ss:$8 sps:$4 sm:$0xff]  }
 0x235   :  { %1372 = vmatprep.subr.bf16.mxu0 %v7782_v51  ;;  %v7867_v51 = vld [vmem:[%s10690_s4 + $0x470] ss:$8 sps:$4 sm:$0xff]  }
 0x238   :  { %1373 = vmatpush1.bf16.msra.mxu0 %v7780_v52  ;;  %v7872_v52 = vld [vmem:[%s10690_s4 + $0x484] ss:$8 sps:$4 sm:$0xff]  }
 0x239   :  { %1374 = vmatprep.subr.bf16.mxu0 %v7785_v53  ;;  %v7870_v53 = vld [vmem:[%s10690_s4 + $0x480] ss:$8 sps:$4 sm:$0xff]  }
 0x23c   :  { %1375 = vmatpush1.bf16.msra.mxu0 %v7783_v54  ;;  %v7875_v54 = vld [vmem:[%s10690_s4 + $0x494] ss:$8 sps:$4 sm:$0xff]  }
 0x23d   :  { %1376 = vmatprep.subr.bf16.mxu0 %v7788_v55  ;;  %v7873_v55 = vld [vmem:[%s10690_s4 + $0x490] ss:$8 sps:$4 sm:$0xff]  }
 0x240   :  { %1377 = vmatpush1.bf16.msra.mxu0 %v7786_v56  ;;  %v7878_v56 = vld [vmem:[%s10690_s4 + $0x4a4] ss:$8 sps:$4 sm:$0xff]  }
 0x241   :  { %1378 = vmatprep.subr.bf16.mxu0 %v7791_v57  ;;  %v7876_v57 = vld [vmem:[%s10690_s4 + $0x4a0] ss:$8 sps:$4 sm:$0xff]  }
 0x244   :  { %1379 = vmatpush1.bf16.msra.mxu0 %v7789_v58  ;;  %v7881_v58 = vld [vmem:[%s10690_s4 + $0x4b4] ss:$8 sps:$4 sm:$0xff]  }
 0x245   :  { %1380 = vmatprep.subr.bf16.mxu0 %v7794_v59  ;;  %v7879_v59 = vld [vmem:[%s10690_s4 + $0x4b0] ss:$8 sps:$4 sm:$0xff]  }
 0x248   :  { %1381 = vmatpush1.bf16.msra.mxu0 %v7792_v60  ;;  %v7884_v60 = vld [vmem:[%s10690_s4 + $0x4c4] ss:$8 sps:$4 sm:$0xff]  }
 0x249   :  { %1382 = vmatprep.subr.bf16.mxu0 %v7797_v61  ;;  %v7882_v61 = vld [vmem:[%s10690_s4 + $0x4c0] ss:$8 sps:$4 sm:$0xff]  }
 0x24c   :  { %1383 = vmatpush1.bf16.msra.mxu0 %v7795_v3  ;;  %v7887_v3 = vld [vmem:[%s10690_s4 + $0x4d4] ss:$8 sps:$4 sm:$0xff]  }
 0x24d   :  { %1393 = vmatprep.subr.bf16.mxu0 %v7800_v4  ;;  %v7885_v4 = vld [vmem:[%s10690_s4 + $0x4d0] ss:$8 sps:$4 sm:$0xff]  }
 0x24f   :  { %1385 = vmatmul.mubr.bf16.vlgmr.msra.gmra.mrb[12].mxu0 %v406_v6  ;;  %v7888_v6 = vld [vmem:[%s10690_s4 + $0x4e0] ss:$8 sps:$4 sm:$0xff]  }
 0x250   :  { %1394 = vmatpush1.bf16.msra.mxu0 %v7798_v5  ;;  %1425 = vmatprep.mubr.bf16.mxu0 %v409_v8  ;;  %v7890_v5 = vld [vmem:[%s10690_s4 + $0x4e4] ss:$8 sps:$4 sm:$0xff]   ;;  %v7891_v8 = vld [vmem:[%s10690_s4 + $0x4f0] ss:$8 sps:$4 sm:$0xff]  }
 0x251   :  { %1395 = vmatprep.subr.bf16.mxu0 %v7803_v7  ;;  %v7893_v7 = vld [vmem:[%s10690_s4 + $0x4f4] ss:$8 sps:$4 sm:$0xff]  }
 0x254   :  { %1396 = vmatpush1.bf16.msra.mxu0 %v7801_v9  ;;  %v7896_v9 = vld [vmem:[%s10690_s4 + $0x504] ss:$8 sps:$4 sm:$0xff]  }
 0x255   :  { %1397 = vmatprep.subr.bf16.mxu0 %v7806_v10 }
 0x258   :  { %1398 = vmatpush1.bf16.msra.mxu0 %v7804_v11 }
 0x259   :  { %1399 = vmatprep.subr.bf16.mxu0 %v7809_v12 }
 0x25c   :  { %1400 = vmatpush1.bf16.msra.mxu0 %v7807_v13 }
 0x25d   :  { %1401 = vmatprep.subr.bf16.mxu0 %v7812_v16 }
 0x260   :  { %1402 = vmatpush1.bf16.msra.mxu0 %v7810_v17 }
 0x261   :  { %1403 = vmatprep.subr.bf16.mxu0 %v7815_v18 }
 0x264   :  { %1404 = vmatpush1.bf16.msra.mxu0 %v7813_v19 }
 0x265   :  { %1405 = vmatprep.subr.bf16.mxu0 %v7818_v20  ;;  %v7894_v20 = vld [vmem:[%s10690_s4 + $0x500] ss:$8 sps:$4 sm:$0xff]  }
 0x268   :  { %1406 = vmatpush1.bf16.msra.mxu0 %v7816_v21 }
 0x269   :  { %1407 = vmatprep.subr.bf16.mxu0 %v7821_v22 }
 0x26c   :  { %1408 = vmatpush1.bf16.msra.mxu0 %v7819_v23  ;;  %v7899_v23 = vld [vmem:[%s10690_s4 + $0x514] ss:$8 sps:$4 sm:$0xff]  }
 0x26d   :  { %1409 = vmatprep.subr.bf16.mxu0 %v7824_v24  ;;  %v7897_v24 = vld [vmem:[%s10690_s4 + $0x510] ss:$8 sps:$4 sm:$0xff]  }
 0x270   :  { %1410 = vmatpush1.bf16.msra.mxu0 %v7822_v25  ;;  %v7902_v25 = vld [vmem:[%s10690_s4 + $0x524] ss:$8 sps:$4 sm:$0xff]  }
 0x271   :  { %1411 = vmatprep.subr.bf16.mxu0 %v7827_v26 }
 0x274   :  { %1412 = vmatpush1.bf16.msra.mxu0 %v7825_v27 }
 0x275   :  { %1413 = vmatprep.subr.bf16.mxu0 %v7830_v28  ;;  %v7900_v28 = vld [vmem:[%s10690_s4 + $0x520] ss:$8 sps:$4 sm:$0xff]  }
 0x278   :  { %1414 = vmatpush1.bf16.msra.mxu0 %v7828_v29 }
 0x279   :  { %1415 = vmatprep.subr.bf16.mxu0 %v7833_v30 }
 0x27c   :  { %1416 = vmatpush1.bf16.msra.mxu0 %v7831_v31  ;;  %v7905_v31 = vld [vmem:[%s10690_s4 + $0x534] ss:$8 sps:$4 sm:$0xff]  }
 0x27d   :  { %1417 = vmatprep.subr.bf16.mxu0 %v7836_v32 }
 0x280   :  { %1418 = vmatpush1.bf16.msra.mxu0 %v7834_v33  ;;  %v7903_v33 = vld [vmem:[%s10690_s4 + $0x530] ss:$8 sps:$4 sm:$0xff]  }
 0x281   :  { %1419 = vmatprep.subr.bf16.mxu0 %v7839_v34  ;;  %v7908_v34 = vld [vmem:[%s10690_s4 + $0x544] ss:$8 sps:$4 sm:$0xff]  }
 0x284   :  { %1420 = vmatpush1.bf16.msra.mxu0 %v7837_v35 }
 0x285   :  { %1421 = vmatprep.subr.bf16.mxu0 %v7842_v36 }
 0x288   :  { %1422 = vmatpush1.bf16.msra.mxu0 %v7840_v37  ;;  %v7906_v37 = vld [vmem:[%s10690_s4 + $0x540] ss:$8 sps:$4 sm:$0xff]  }
 0x289   :  { %1423 = vmatprep.subr.bf16.mxu0 %v7845_v38 }
 0x28c   :  { %1424 = vmatpush1.bf16.msra.mxu0 %v7843_v39  ;;  %v7911_v39 = vld [vmem:[%s10690_s4 + $0x554] ss:$8 sps:$4 sm:$0xff]  }
 0x28d   :  { %1910 = vmatprep.subr.bf16.mxu0 %v7848_v40 }
 0x28f   :  { %1426 = vmatmul.mubr.bf16.vlgmr.msra.gmra.mrb[12].mxu0 %v408_v42  ;;  %v7914_v42 = vld [vmem:[%s10690_s4 + $0x564] ss:$8 sps:$4 sm:$0xff]  }
 0x290   :  { %1911 = vmatpush1.bf16.msra.mxu0 %v7846_v41  ;;  %v7909_v41 = vld [vmem:[%s10690_s4 + $0x550] ss:$8 sps:$4 sm:$0xff]  }
 0x291   :  { %1912 = vmatprep.subr.bf16.mxu0 %v7851_v43  ;;  %v7912_v43 = vld [vmem:[%s10690_s4 + $0x560] ss:$8 sps:$4 sm:$0xff]  }
 0x294   :  { %1913 = vmatpush1.bf16.msra.mxu0 %v7849_v44  ;;  %v7917_v44 = vld [vmem:[%s10690_s4 + $0x574] ss:$8 sps:$4 sm:$0xff]  }
 0x295   :  { %1914 = vmatprep.subr.bf16.mxu0 %v7854_v62  ;;  %v7915_v62 = vld [vmem:[%s10690_s4 + $0x570] ss:$8 sps:$4 sm:$0xff]  }
 0x298   :  { %1915 = vmatpush1.bf16.msra.mxu0 %v7852_v15  ;;  %v7920_v15 = vld [vmem:[%s10690_s4 + $0x584] ss:$8 sps:$4 sm:$0xff]  }
 0x299   :  { %1916 = vmatprep.subr.bf16.mxu0 %v7857_v45  ;;  %v7918_v45 = vld [vmem:[%s10690_s4 + $0x580] ss:$8 sps:$4 sm:$0xff]  }
 0x29c   :  { %1917 = vmatpush1.bf16.msra.mxu0 %v7855_v46  ;;  %v7923_v46 = vld [vmem:[%s10690_s4 + $0x594] ss:$8 sps:$4 sm:$0xff]  }
 0x29d   :  { %1918 = vmatprep.subr.bf16.mxu0 %v7860_v63  ;;  %v7921_v63 = vld [vmem:[%s10690_s4 + $0x590] ss:$8 sps:$4 sm:$0xff]  }
 0x2a0   :  { %1919 = vmatpush1.bf16.msra.mxu0 %v7858_v1  ;;  %v7926_v1 = vld [vmem:[%s10690_s4 + $0x5a4] ss:$8 sps:$4 sm:$0xff]  }
 0x2a1   :  { %1920 = vmatprep.subr.bf16.mxu0 %v7863_v47  ;;  %v7924_v47 = vld [vmem:[%s10690_s4 + $0x5a0] ss:$8 sps:$4 sm:$0xff]  }
 0x2a4   :  { %1921 = vmatpush1.bf16.msra.mxu0 %v7861_v48  ;;  %v7929_v48 = vld [vmem:[%s10690_s4 + $0x5b4] ss:$8 sps:$4 sm:$0xff]  }
 0x2a5   :  { %1922 = vmatprep.subr.bf16.mxu0 %v7866_v49  ;;  %v7927_v49 = vld [vmem:[%s10690_s4 + $0x5b0] ss:$8 sps:$4 sm:$0xff]  }
 0x2a8   :  { %1923 = vmatpush1.bf16.msra.mxu0 %v7864_v2  ;;  %v7932_v2 = vld [vmem:[%s10690_s4 + $0x5c4] ss:$8 sps:$4 sm:$0xff]  }
 0x2a9   :  { %1924 = vmatprep.subr.bf16.mxu0 %v7869_v50  ;;  %v7930_v50 = vld [vmem:[%s10690_s4 + $0x5c0] ss:$8 sps:$4 sm:$0xff]  }
 0x2ac   :  { %1925 = vmatpush1.bf16.msra.mxu0 %v7867_v51  ;;  %v7935_v51 = vld [vmem:[%s10690_s4 + $0x5d4] ss:$8 sps:$4 sm:$0xff]  }
 0x2ad   :  { %1926 = vmatprep.subr.bf16.mxu0 %v7872_v52  ;;  %v7933_v52 = vld [vmem:[%s10690_s4 + $0x5d0] ss:$8 sps:$4 sm:$0xff]  }
 0x2b0   :  { %1927 = vmatpush1.bf16.msra.mxu0 %v7870_v53  ;;  %v7938_v53 = vld [vmem:[%s10690_s4 + $0x5e4] ss:$8 sps:$4 sm:$0xff]  }
 0x2b1   :  { %1928 = vmatprep.subr.bf16.mxu0 %v7875_v54  ;;  %v7936_v54 = vld [vmem:[%s10690_s4 + $0x5e0] ss:$8 sps:$4 sm:$0xff]  }
 0x2b4   :  { %1929 = vmatpush1.bf16.msra.mxu0 %v7873_v55 }
 0x2b5   :  { %1930 = vmatprep.subr.bf16.mxu0 %v7878_v56  ;;  %v7941_v56 = vld [vmem:[%s10690_s4 + $0x5f4] ss:$8 sps:$4 sm:$0xff]  }
 0x2b8   :  { %1931 = vmatpush1.bf16.msra.mxu0 %v7876_v57 }
 0x2b9   :  { %1932 = vmatprep.subr.bf16.mxu0 %v7881_v58 }
 0x2bc   :  { %1933 = vmatpush1.bf16.msra.mxu0 %v7879_v59 }
 0x2bd   :  { %1934 = vmatprep.subr.bf16.mxu0 %v7884_v60  ;;  %v7939_v60 = vld [vmem:[%s10690_s4 + $0x5f0] ss:$8 sps:$4 sm:$0xff]  }
 0x2c0   :  { %1935 = vmatpush1.bf16.msra.mxu0 %v7882_v61  ;;  %v7944_v61 = vld [vmem:[%s10690_s4 + $0x604] ss:$8 sps:$4 sm:$0xff]  }
 0x2c1   :  { %1936 = vmatprep.subr.bf16.mxu0 %v7887_v3 }
 0x2c4   :  { %1937 = vmatpush1.bf16.msra.mxu0 %v7885_v4  ;;  %v7942_v4 = vld [vmem:[%s10690_s4 + $0x600] ss:$8 sps:$4 sm:$0xff]  }
 0x2c5   :  { %1938 = vmatprep.subr.bf16.mxu0 %v7890_v5 }
 0x2c8   :  { %1939 = vmatpush1.bf16.msra.mxu0 %v7888_v6  ;;  %v7947_v6 = vld [vmem:[%s10690_s4 + $0x614] ss:$8 sps:$4 sm:$0xff]  }
 0x2c9   :  { %1940 = vmatprep.subr.bf16.mxu0 %v7893_v7  ;;  %v7945_v7 = vld [vmem:[%s10690_s4 + $0x610] ss:$8 sps:$4 sm:$0xff]  }
 0x2cc   :  { %1941 = vmatpush1.bf16.msra.mxu0 %v7891_v8  ;;  %v7950_v8 = vld [vmem:[%s10690_s4 + $0x624] ss:$8 sps:$4 sm:$0xff]  }
 0x2cd   :  { %1951 = vmatprep.subr.bf16.mxu0 %v7896_v9  ;;  %v7948_v9 = vld [vmem:[%s10690_s4 + $0x620] ss:$8 sps:$4 sm:$0xff]  }
 0x2e1   :  { %v9213_v10 = vpop.f32.mrb[12].mxu1 }
 0x2e2   :  { %v9215_v11 = vpop.f32.mrb[13].mxu1 }
 0x2e3   :  { %v988_v12 = vpop.f32.mrb[14].mxu1 }
 0x2e4   :  { %v989_v13 = vpop.f32.mrb[15].mxu1  ;;  %v7953_v12 = vld [vmem:[%s10690_s4 + $0x634] ss:$8 sps:$4 sm:$0xff]  }
 0x2e5   :  { %v7951_v13 = vld [vmem:[%s10690_s4 + $0x630] ss:$8 sps:$4 sm:$0xff]  }
 0x2e9   :  { %v1473_v16 = vpop.f32.mrb[16].mxu1 }
 0x2ea   :  { %v1475_v17 = vpop.f32.mrb[17].mxu1  ;;  %v1521_v21 = vpack.c.bf16 %v1473_v16, %v1473_v16  ;;  %v7956_v16 = vld [vmem:[%s10690_s4 + $0x644] ss:$8 sps:$4 sm:$0xff]  }
 0x2eb   :  { %v1522_v18 = vpack.c.bf16 %v1475_v17, %v1475_v17  ;;  %v1477_v19 = vpop.f32.mrb[18].mxu1  ;;  %v7954_v17 = vld [vmem:[%s10690_s4 + $0x640] ss:$8 sps:$4 sm:$0xff]  }
 0x2ec   :  { %v1478_v22 = vpop.f32.mrb[19].mxu1  ;;  %v7957_v19 = vld [vmem:[%s10690_s4 + $0x650] ss:$8 sps:$4 sm:$0xff]  }
 0x2ed   :  { %1942 = vmatprep.mubr.bf16.mxu0 %v1522_v18  ;;  %v7959_v18 = vld [vmem:[%s10690_s4 + $0x654] ss:$8 sps:$4 sm:$0xff]  }
 0x2ee   :  { %1943 = vmatmul.mubr.bf16.vlgmr.msra.gmra.mrb[12].mxu0 %v1521_v21  ;;  %v7960_v21 = vld [vmem:[%s10690_s4 + $0x660] ss:$8 sps:$4 sm:$0xff]   ;;  %v7965_v22 = vld [vmem:[%s10690_s4 + $0x674] ss:$8 sps:$4 sm:$0xff]  }
 0x2ef   :  { %1952 = vmatpush1.bf16.msra.mxu0 %v7894_v20  ;;  %v7962_v20 = vld [vmem:[%s10690_s4 + $0x664] ss:$8 sps:$4 sm:$0xff]  }
 0x2f0   :  { %1953 = vmatprep.subr.bf16.mxu0 %v7899_v23  ;;  %v7963_v23 = vld [vmem:[%s10690_s4 + $0x670] ss:$8 sps:$4 sm:$0xff]  }
 0x2f1   :  { %v9229_v26 = vpop.f32.mrb[20].mxu1 }
 0x2f2   :  { %v1516_v27 = vpop.f32.mrb[21].mxu1  ;;  %v1523_v3 = vpack.c.bf16 %v9229_v26, %v9229_v26  ;;  %v7971_v26 = vld [vmem:[%s10690_s4 + $0x694] ss:$8 sps:$4 sm:$0xff]  }
 0x2f3   :  { %1954 = vmatpush1.bf16.msra.mxu0 %v7897_v24  ;;  %v1524_v29 = vpack.c.bf16 %v1516_v27, %v1516_v27  ;;  %v1518_v30 = vpop.f32.mrb[22].mxu1  ;;  %v7968_v24 = vld [vmem:[%s10690_s4 + $0x684] ss:$8 sps:$4 sm:$0xff]   ;;  %v7969_v27 = vld [vmem:[%s10690_s4 + $0x690] ss:$8 sps:$4 sm:$0xff]  }
 0x2f4   :  { %1955 = vmatprep.subr.bf16.mxu0 %v7902_v25  ;;  %v1519_v32 = vpop.f32.mrb[23].mxu1  ;;  %v7966_v25 = vld [vmem:[%s10690_s4 + $0x680] ss:$8 sps:$4 sm:$0xff]   ;;  %v7977_v30 = vld [vmem:[%s10690_s4 + $0x6b4] ss:$8 sps:$4 sm:$0xff]  }
 0x2f5   :  { %1983 = vmatprep.mubr.bf16.mxu0 %v1524_v29  ;;  %v7972_v29 = vld [vmem:[%s10690_s4 + $0x6a0] ss:$8 sps:$4 sm:$0xff]   ;;  %v7980_v32 = vld [vmem:[%s10690_s4 + $0x6c4] ss:$8 sps:$4 sm:$0xff]  }
 0x2f7   :  { %1956 = vmatpush1.bf16.msra.mxu0 %v7900_v28  ;;  %v7974_v28 = vld [vmem:[%s10690_s4 + $0x6a4] ss:$8 sps:$4 sm:$0xff]  }
 0x2f8   :  { %1957 = vmatprep.subr.bf16.mxu0 %v7905_v31  ;;  %v7975_v31 = vld [vmem:[%s10690_s4 + $0x6b0] ss:$8 sps:$4 sm:$0xff]  }
 0x2f9   :  { %v9243_v35 = vpop.f32.mrb[24].mxu1 }
 0x2fa   :  { %v9245_v36 = vpop.f32.mrb[25].mxu1 }
 0x2fb   :  { %1958 = vmatpush1.bf16.msra.mxu0 %v7903_v33  ;;  %v2037_v38 = vpop.f32.mrb[26].mxu1  ;;  %v2082_v5 = vpack.c.bf16 %v9245_v36, %v9245_v36  ;;  %v7978_v33 = vld [vmem:[%s10690_s4 + $0x6c0] ss:$8 sps:$4 sm:$0xff]   ;;  %v7981_v36 = vld [vmem:[%s10690_s4 + $0x6d0] ss:$8 sps:$4 sm:$0xff]  }
 0x2fc   :  { %1959 = vmatprep.subr.bf16.mxu0 %v7908_v34  ;;  %v2038_v40 = vpop.f32.mrb[27].mxu1  ;;  %v7983_v34 = vld [vmem:[%s10690_s4 + $0x6d4] ss:$8 sps:$4 sm:$0xff]   ;;  %v7984_v38 = vld [vmem:[%s10690_s4 + $0x6e0] ss:$8 sps:$4 sm:$0xff]  }
 0x2fd   :  { %v7987_v40 = vld [vmem:[%s10690_s4 + $0x6f0] ss:$8 sps:$4 sm:$0xff]  }
 0x2ff   :  { %1960 = vmatpush1.bf16.msra.mxu0 %v7906_v37  ;;  %v7986_v37 = vld [vmem:[%s10690_s4 + $0x6e4] ss:$8 sps:$4 sm:$0xff]  }
 0x300   :  { %1961 = vmatprep.subr.bf16.mxu0 %v7911_v39  ;;  %v7989_v39 = vld [vmem:[%s10690_s4 + $0x6f4] ss:$8 sps:$4 sm:$0xff]  }
 0x301   :  { %v9310_v55 = vpop.f32.mrb[28].mxu1 }
 0x302   :  { %v9315_v57 = vpop.f32.mrb[29].mxu1 }
 0x303   :  { %1962 = vmatpush1.bf16.msra.mxu0 %v7909_v41  ;;  %v2078_v58 = vpop.f32.mrb[30].mxu1  ;;  %v7992_v41 = vld [vmem:[%s10690_s4 + $0x704] ss:$8 sps:$4 sm:$0xff]  }
 0x304   :  { %1963 = vmatprep.subr.bf16.mxu0 %v7914_v42  ;;  %v2079_v59 = vpop.f32.mrb[31].mxu1  ;;  %v2081_v42 = vpack.c.bf16 %v9243_v35, %v9243_v35  ;;  %v7998_v35 = vld [vmem:[%s10690_s4 + $0x724] ss:$8 sps:$4 sm:$0xff]  }
 0x305   :  { %v8022_v58 = vld [vmem:[%s10690_s4 + $0x7a4] ss:$8 sps:$4 sm:$0xff]   ;;  %v8020_v59 = vld [vmem:[%s10690_s4 + $0x7a0] ss:$8 sps:$4 sm:$0xff]  }
 0x307   :  { %1964 = vmatpush1.bf16.msra.mxu0 %v7912_v43  ;;  %v7990_v43 = vld [vmem:[%s10690_s4 + $0x700] ss:$8 sps:$4 sm:$0xff]  }
 0x308   :  { %1965 = vmatprep.subr.bf16.mxu0 %v7917_v44  ;;  %v2084_v44 = vpack.c.bf16 %v9315_v57, %v9315_v57  ;;  %v8017_v57 = vld [vmem:[%s10690_s4 + $0x790] ss:$8 sps:$4 sm:$0xff]  }
 0x30b   :  { %1966 = vmatpush1.bf16.msra.mxu0 %v7915_v62  ;;  %v7995_v62 = vld [vmem:[%s10690_s4 + $0x714] ss:$8 sps:$4 sm:$0xff]  }
 0x30c   :  { %1967 = vmatprep.subr.bf16.mxu0 %v7920_v15  ;;  %v7993_v15 = vld [vmem:[%s10690_s4 + $0x710] ss:$8 sps:$4 sm:$0xff]  }
 0x30f   :  { %1968 = vmatpush1.bf16.msra.mxu0 %v7918_v45  ;;  %v7996_v45 = vld [vmem:[%s10690_s4 + $0x720] ss:$8 sps:$4 sm:$0xff]  }
 0x310   :  { %1969 = vmatprep.subr.bf16.mxu0 %v7923_v46  ;;  %v8001_v46 = vld [vmem:[%s10690_s4 + $0x734] ss:$8 sps:$4 sm:$0xff]  }
 0x313   :  { %1970 = vmatpush1.bf16.msra.mxu0 %v7921_v63  ;;  %v7999_v63 = vld [vmem:[%s10690_s4 + $0x730] ss:$8 sps:$4 sm:$0xff]  }
 0x314   :  { %1971 = vmatprep.subr.bf16.mxu0 %v7926_v1  ;;  %v8004_v1 = vld [vmem:[%s10690_s4 + $0x744] ss:$8 sps:$4 sm:$0xff]  }
 0x317   :  { %1972 = vmatpush1.bf16.msra.mxu0 %v7924_v47  ;;  %v8002_v47 = vld [vmem:[%s10690_s4 + $0x740] ss:$8 sps:$4 sm:$0xff]  }
 0x318   :  { %1973 = vmatprep.subr.bf16.mxu0 %v7929_v48  ;;  %v8007_v48 = vld [vmem:[%s10690_s4 + $0x754] ss:$8 sps:$4 sm:$0xff]  }
 0x31b   :  { %1974 = vmatpush1.bf16.msra.mxu0 %v7927_v49  ;;  %v8005_v49 = vld [vmem:[%s10690_s4 + $0x750] ss:$8 sps:$4 sm:$0xff]  }
 0x31c   :  { %1975 = vmatprep.subr.bf16.mxu0 %v7932_v2  ;;  %v8010_v2 = vld [vmem:[%s10690_s4 + $0x764] ss:$8 sps:$4 sm:$0xff]  }
 0x31f   :  { %1976 = vmatpush1.bf16.msra.mxu0 %v7930_v50  ;;  %v8008_v50 = vld [vmem:[%s10690_s4 + $0x760] ss:$8 sps:$4 sm:$0xff]  }
 0x320   :  { %1977 = vmatprep.subr.bf16.mxu0 %v7935_v51  ;;  %v8013_v51 = vld [vmem:[%s10690_s4 + $0x774] ss:$8 sps:$4 sm:$0xff]  }
 0x323   :  { %1978 = vmatpush1.bf16.msra.mxu0 %v7933_v52  ;;  %v8011_v52 = vld [vmem:[%s10690_s4 + $0x770] ss:$8 sps:$4 sm:$0xff]  }
 0x324   :  { %1979 = vmatprep.subr.bf16.mxu0 %v7938_v53  ;;  %v8016_v53 = vld [vmem:[%s10690_s4 + $0x784] ss:$8 sps:$4 sm:$0xff]  }
 0x327   :  { %1980 = vmatpush1.bf16.msra.mxu0 %v7936_v54  ;;  %v8014_v54 = vld [vmem:[%s10690_s4 + $0x780] ss:$8 sps:$4 sm:$0xff]  }
 0x328   :  { %1981 = vmatprep.subr.bf16.mxu0 %v7941_v56  ;;  %v8019_v56 = vld [vmem:[%s10690_s4 + $0x794] ss:$8 sps:$4 sm:$0xff]  }
 0x32b   :  { %1982 = vmatpush1.bf16.msra.mxu0 %v7939_v60  ;;  %v8025_v60 = vld [vmem:[%s10690_s4 + $0x7b4] ss:$8 sps:$4 sm:$0xff]  }
 0x32c   :  { %2470 = vmatprep.subr.bf16.mxu0 %v7944_v61  ;;  %v8023_v61 = vld [vmem:[%s10690_s4 + $0x7b0] ss:$8 sps:$4 sm:$0xff]  }
 0x32e   :  { %1984 = vmatmul.mubr.bf16.vlgmr.msra.gmra.mrb[12].mxu0 %v1523_v3  ;;  %v8028_v3 = vld [vmem:[%s10690_s4 + $0x7c4] ss:$8 sps:$4 sm:$0xff]  }
 0x32f   :  { %2471 = vmatpush1.bf16.msra.mxu0 %v7942_v4  ;;  %2502 = vmatprep.mubr.bf16.mxu0 %v2082_v5  ;;  %v8026_v4 = vld [vmem:[%s10690_s4 + $0x7c0] ss:$8 sps:$4 sm:$0xff]   ;;  %v8031_v5 = vld [vmem:[%s10690_s4 + $0x7d4] ss:$8 sps:$4 sm:$0xff]  }
 0x330   :  { %2472 = vmatprep.subr.bf16.mxu0 %v7947_v6  ;;  %v8029_v6 = vld [vmem:[%s10690_s4 + $0x7d0] ss:$8 sps:$4 sm:$0xff]  }
 0x333   :  { %2473 = vmatpush1.bf16.msra.mxu0 %v7945_v7  ;;  %v8034_v7 = vld [vmem:[%s10690_s4 + $0x7e4] ss:$8 sps:$4 sm:$0xff]  }
 0x334   :  { %2474 = vmatprep.subr.bf16.mxu0 %v7950_v8  ;;  %v8032_v8 = vld [vmem:[%s10690_s4 + $0x7e0] ss:$8 sps:$4 sm:$0xff]  }
 0x337   :  { %2475 = vmatpush1.bf16.msra.mxu0 %v7948_v9  ;;  %v8037_v9 = vld [vmem:[%s10690_s4 + $0x7f4] ss:$8 sps:$4 sm:$0xff]  }
 0x338   :  { %2476 = vmatprep.subr.bf16.mxu0 %v7953_v12  ;;  %v8035_v12 = vld [vmem:[%s10690_s4 + $0x7f0] ss:$8 sps:$4 sm:$0xff]   ;;  %s8527_s4 = smov 64  }
 0x33b   :  { %2477 = vmatpush1.bf16.msra.mxu0 %v7951_v13  ;;  %v2083_v13 = vpack.c.bf16 %v9310_v55, %v9310_v55 }
 0x33c   :  { %2478 = vmatprep.subr.bf16.mxu0 %v7956_v16 }
 0x33f   :  { %2479 = vmatpush1.bf16.msra.mxu0 %v7954_v17 }
 0x340   :  { %2480 = vmatprep.subr.bf16.mxu0 %v7959_v18 }
 0x343   :  { %2481 = vmatpush1.bf16.msra.mxu0 %v7957_v19 }
 0x344   :  { %2482 = vmatprep.subr.bf16.mxu0 %v7962_v20 }
 0x347   :  { %2483 = vmatpush1.bf16.msra.mxu0 %v7960_v21 }
 0x348   :  { %2484 = vmatprep.subr.bf16.mxu0 %v7965_v22 }
 0x34b   :  { %2485 = vmatpush1.bf16.msra.mxu0 %v7963_v23 }
 0x34c   :  { %2486 = vmatprep.subr.bf16.mxu0 %v7968_v24 }
 0x34f   :  { %2487 = vmatpush1.bf16.msra.mxu0 %v7966_v25 }
 0x350   :  { %2488 = vmatprep.subr.bf16.mxu0 %v7971_v26 }
 0x353   :  { %2489 = vmatpush1.bf16.msra.mxu0 %v7969_v27 }
 0x354   :  { %2490 = vmatprep.subr.bf16.mxu0 %v7974_v28 }
 0x357   :  { %2491 = vmatpush1.bf16.msra.mxu0 %v7972_v29 }
 0x358   :  { %2492 = vmatprep.subr.bf16.mxu0 %v7977_v30 }
 0x35b   :  { %2493 = vmatpush1.bf16.msra.mxu0 %v7975_v31 }
 0x35c   :  { %2494 = vmatprep.subr.bf16.mxu0 %v7980_v32 }
 0x35f   :  { %2495 = vmatpush1.bf16.msra.mxu0 %v7978_v33 }
 0x360   :  { %2496 = vmatprep.subr.bf16.mxu0 %v7983_v34 }
 0x363   :  { %2497 = vmatpush1.bf16.msra.mxu0 %v7981_v36 }
 0x364   :  { %2498 = vmatprep.subr.bf16.mxu0 %v7986_v37 }
 0x367   :  { %2499 = vmatpush1.bf16.msra.mxu0 %v7984_v38 }
 0x368   :  { %2500 = vmatprep.subr.bf16.mxu0 %v7989_v39 }
 0x36b   :  { %2501 = vmatpush1.bf16.msra.mxu0 %v7987_v40 }
 0x36c   :  { %2511 = vmatprep.subr.bf16.mxu0 %v7992_v41 }
 0x36e   :  { %2503 = vmatmul.mubr.bf16.vlgmr.msra.gmra.mrb[12].mxu0 %v2081_v42 }
 0x36f   :  { %2512 = vmatpush1.bf16.msra.mxu0 %v7990_v43  ;;  %2543 = vmatprep.mubr.bf16.mxu0 %v2084_v44 }
 0x370   :  { %2513 = vmatprep.subr.bf16.mxu0 %v7995_v62 }
 0x373   :  { %2514 = vmatpush1.bf16.msra.mxu0 %v7993_v15 }
 0x374   :  { %2515 = vmatprep.subr.bf16.mxu0 %v7998_v35 }
 0x377   :  { %2516 = vmatpush1.bf16.msra.mxu0 %v7996_v45 }
 0x378   :  { %2517 = vmatprep.subr.bf16.mxu0 %v8001_v46 }
 0x37b   :  { %2518 = vmatpush1.bf16.msra.mxu0 %v7999_v63 }
 0x37c   :  { %2519 = vmatprep.subr.bf16.mxu0 %v8004_v1 }
 0x37f   :  { %2520 = vmatpush1.bf16.msra.mxu0 %v8002_v47 }
 0x380   :  { %2521 = vmatprep.subr.bf16.mxu0 %v8007_v48 }
 0x383   :  { %2522 = vmatpush1.bf16.msra.mxu0 %v8005_v49 }
 0x384   :  { %2523 = vmatprep.subr.bf16.mxu0 %v8010_v2 }
 0x387   :  { %2524 = vmatpush1.bf16.msra.mxu0 %v8008_v50 }
 0x388   :  { %2525 = vmatprep.subr.bf16.mxu0 %v8013_v51 }
 0x38b   :  { %2526 = vmatpush1.bf16.msra.mxu0 %v8011_v52 }
 0x38c   :  { %2527 = vmatprep.subr.bf16.mxu0 %v8016_v53 }
 0x38f   :  { %2528 = vmatpush1.bf16.msra.mxu0 %v8014_v54 }
 0x390   :  { %2529 = vmatprep.subr.bf16.mxu0 %v8019_v56 }
 0x393   :  { %2530 = vmatpush1.bf16.msra.mxu0 %v8017_v57 }
 0x394   :  { %2531 = vmatprep.subr.bf16.mxu0 %v8022_v58 }
 0x397   :  { %2532 = vmatpush1.bf16.msra.mxu0 %v8020_v59 }
 0x398   :  { %2533 = vmatprep.subr.bf16.mxu0 %v8025_v60 }
 0x39b   :  { %2534 = vmatpush1.bf16.msra.mxu0 %v8023_v61 }
 0x39c   :  { %2535 = vmatprep.subr.bf16.mxu0 %v8028_v3 }
 0x39f   :  { %2536 = vmatpush1.bf16.msra.mxu0 %v8026_v4 }
 0x3a0   :  { %2537 = vmatprep.subr.bf16.mxu0 %v8031_v5 }
 0x3a3   :  { %2538 = vmatpush1.bf16.msra.mxu0 %v8029_v6 }
 0x3a4   :  { %2539 = vmatprep.subr.bf16.mxu0 %v8034_v7 }
 0x3a7   :  { %2540 = vmatpush1.bf16.msra.mxu0 %v8032_v8 }
 0x3a8   :  { %2541 = vmatprep.subr.bf16.mxu0 %v8037_v9 }
 0x3ab   :  { %2542 = vmatpush1.bf16.msra.mxu0 %v8035_v12 }
 0x3ae   :  { %2544 = vmatmul.mubr.bf16.vlgmr.msra.gmra.mrb[12].mxu0 %v2083_v13 }
 0x3af   :  { %5276 = vmatprep.mubr.bf16.mxu0 %v8526_v0 }
 0x481   :  { %v2545_v16 = vpop.f32.mrb[12].mxu0 }
 0x482   :  { %v9524_v17 = vadd.f32 %v2545_v16, %v9213_v10  ;;  %v2547_v18 = vpop.f32.mrb[13].mxu0 }
 0x483   :  { %v9527_v19 = vadd.f32 %v2547_v18, %v9215_v11  ;;  %v2549_v20 = vpop.f32.mrb[14].mxu0 }
 0x484   :  { %v2569_v21 = vmul.f32 %v9524_v17, %v9524_v17  ;;  %v2550_v22 = vpop.f32.mrb[15].mxu0  ;;  %v2554_v23 = vrot.slane %v9524_v17, 4 }
 0x485   :  { %v2570_v55 = vmul.f32 %v9527_v19, %v9527_v19  ;;  %v2560_v24 = vrot.slane %v9527_v19, 4 }
 0x486   :  { %v2555_v25 = vadd.f32 %v9524_v17, %v2554_v23  ;;  %v2571_v10 = vrot.slane %v2569_v21, 4  ;;  %v8039_v23 = vld [vmem:[%s10691_s5 + $0x8] sm:$0x7f]  }
 0x487   :  { %v2561_v26 = vadd.f32 %v9527_v19, %v2560_v24  ;;  %v2577_v27 = vrot.slane %v2570_v55, 4  ;;  %v8045_v24 = vld [vmem:[%s10692_s6 + $0x114] ss:$8 sps:$4 sm:$0xff]  }
 0x488   :  { %v2556_v11 = vrot.slane %v2555_v25, 2  ;;  %v2572_v28 = vadd.f32 %v2571_v10, %v2569_v21  ;;  %v8048_v10 = vld [vmem:[%s10692_s6 + $0x124] ss:$8 sps:$4 sm:$0xff]  }
 0x489   :  { %v2562_v29 = vrot.slane %v2561_v26, 2  ;;  %v2578_v30 = vadd.f32 %v2577_v27, %v2570_v55  ;;  %v8040_v55 = vld [vmem:[%s10692_s6 + $0x100] ss:$8 sps:$4 sm:$0xff]   ;;  %v8051_v27 = vld [vmem:[%s10692_s6 + $0x134] ss:$8 sps:$4 sm:$0xff]  }
 0x48a   :  { %v2557_v31 = vadd.f32 %v2556_v11, %v2555_v25  ;;  %v2573_v32 = vrot.slane %v2572_v28, 2  ;;  %v8043_v25 = vld [vmem:[%s10692_s6 + $0x110] ss:$8 sps:$4 sm:$0xff]  }
 0x48b   :  { %v2563_v33 = vadd.f32 %v2562_v29, %v2561_v26  ;;  %v2579_v34 = vrot.slane %v2578_v30, 2  ;;  %v8046_v26 = vld [vmem:[%s10692_s6 + $0x120] ss:$8 sps:$4 sm:$0xff]   ;;  %v8049_v11 = vld [vmem:[%s10692_s6 + $0x130] ss:$8 sps:$4 sm:$0xff]  }
 0x48c   :  { %v2558_v36 = vrot.slane %v2557_v31, 1  ;;  %v2574_v37 = vadd.f32 %v2573_v32, %v2572_v28  ;;  %v8054_v28 = vld [vmem:[%s10692_s6 + $0x144] ss:$8 sps:$4 sm:$0xff]   ;;  %v8052_v29 = vld [vmem:[%s10692_s6 + $0x140] ss:$8 sps:$4 sm:$0xff]  }
 0x48d   :  { %v2564_v38 = vrot.slane %v2563_v33, 1  ;;  %v2580_v39 = vadd.f32 %v2579_v34, %v2578_v30  ;;  %v8057_v30 = vld [vmem:[%s10692_s6 + $0x154] ss:$8 sps:$4 sm:$0xff]   ;;  %v8060_v32 = vld [vmem:[%s10692_s6 + $0x164] ss:$8 sps:$4 sm:$0xff]  }
 0x48e   :  { %v2559_v40 = vadd.f32 %v2558_v36, %v2557_v31  ;;  %v2575_v41 = vrot.slane %v2574_v37, 1  ;;  %v8055_v31 = vld [vmem:[%s10692_s6 + $0x150] ss:$8 sps:$4 sm:$0xff]   ;;  %v8063_v34 = vld [vmem:[%s10692_s6 + $0x174] ss:$8 sps:$4 sm:$0xff]  }
 0x48f   :  { %v2565_v42 = vadd.f32 %v2564_v38, %v2563_v33  ;;  %v2581_v43 = vrot.slane %v2580_v39, 1  ;;  %v8058_v33 = vld [vmem:[%s10692_s6 + $0x160] ss:$8 sps:$4 sm:$0xff]   ;;  %v8061_v36 = vld [vmem:[%s10692_s6 + $0x170] ss:$8 sps:$4 sm:$0xff]  }
 0x490   :  { %v2567_v44 = vmul.f32 0.125, %v2559_v40  ;;  %v2576_v62 = vadd.f32 %v2575_v41, %v2574_v37  ;;  %v8066_v37 = vld [vmem:[%s10692_s6 + $0x184] ss:$8 sps:$4 sm:$0xff]   ;;  %v8064_v38 = vld [vmem:[%s10692_s6 + $0x180] ss:$8 sps:$4 sm:$0xff]  }
 0x491   :  { %v2568_v15 = vmul.f32 0.125, %v2565_v42  ;;  %v2582_v35 = vadd.f32 %v2581_v43, %v2580_v39  ;;  %v8069_v39 = vld [vmem:[%s10692_s6 + $0x194] ss:$8 sps:$4 sm:$0xff]   ;;  %v8067_v40 = vld [vmem:[%s10692_s6 + $0x190] ss:$8 sps:$4 sm:$0xff]  }
 0x492   :  { %2586 = vrot.lane.b32.xlu0 %v2567_v44, %s8527_s4  ;;  %v2583_v45 = vmul.f32 0.125, %v2576_v62  ;;  %v8072_v41 = vld [vmem:[%s10692_s6 + $0x1a4] ss:$8 sps:$4 sm:$0xff]   ;;  %v8070_v42 = vld [vmem:[%s10692_s6 + $0x1a0] ss:$8 sps:$4 sm:$0xff]  }
 0x493   :  { %2598 = vrot.lane.b32.xlu1 %v2568_v15, %s8527_s4  ;;  %v2584_v46 = vmul.f32 0.125, %v2582_v35  ;;  %v8075_v43 = vld [vmem:[%s10692_s6 + $0x1b4] ss:$8 sps:$4 sm:$0xff]   ;;  %v8078_v62 = vld [vmem:[%s10692_s6 + $0x1c4] ss:$8 sps:$4 sm:$0xff]  }
 0x494   :  { %v8081_v35 = vld [vmem:[%s10692_s6 + $0x1d4] ss:$8 sps:$4 sm:$0xff]  }
 0x496   :  { %2591 = vrot.lane.b32.xlu0 %v2583_v45, %s8527_s4 }
 0x497   :  { %2603 = vrot.lane.b32.xlu1 %v2584_v46, %s8527_s4 }
 0x504   :  { %v2587_v63 = vpop.permute.xlu0 %2586 }
 0x505   :  { %v2589_v1 = vadd.f32 %v2587_v63, %v2567_v44  ;;  %v2599_v47 = vpop.permute.xlu1 %2598  ;;  %v8073_v44 = vld [vmem:[%s10692_s6 + $0x1b0] ss:$8 sps:$4 sm:$0xff]   ;;  %v8084_v63 = vld [vmem:[%s10692_s6 + $0x1e4] ss:$8 sps:$4 sm:$0xff]  }
 0x507   :  { %v2595_v48 = vadd.f32 %v2589_v1, %v2568_v15  ;;  %v8076_v15 = vld [vmem:[%s10692_s6 + $0x1c0] ss:$8 sps:$4 sm:$0xff]   ;;  %v8087_v1 = vld [vmem:[%s10692_s6 + $0x1f4] ss:$8 sps:$4 sm:$0xff]  }
 0x508   :  { %v2592_v49 = vpop.permute.xlu0 %2591 }
 0x509   :  { %v2601_v2 = vadd.f32 %v2599_v47, %v2595_v48  ;;  %v2594_v50 = vadd.f32 %v2592_v49, %v2583_v45  ;;  %v2604_v53 = vpop.permute.xlu1 %2603  ;;  %v8079_v45 = vld [vmem:[%s10692_s6 + $0x1d0] ss:$8 sps:$4 sm:$0xff]   ;;  %v8090_v48 = vld [vmem:[%s10692_s6 + $0x4] ss:$8 sps:$4 sm:$0xff]  }
 0x50a   :  { %v8085_v47 = vld [vmem:[%s10692_s6 + $0x1f0] ss:$8 sps:$4 sm:$0xff]  }
 0x50b   :  { %v2607_v51 = vmul.f32 0.25, %v2601_v2  ;;  %v2596_v52 = vadd.f32 %v2594_v50, %v2584_v46  ;;  %v8082_v46 = vld [vmem:[%s10692_s6 + $0x1e0] ss:$8 sps:$4 sm:$0xff]  }
 0x50d   :  { %v2606_v54 = vadd.f32 %v2604_v53, %v2596_v52  ;;  %2614 = vrot.lane.b32.xlu0 %v2607_v51, %s8527_s4  ;;  %v2609_v57 = vmul.f32 %v2607_v51, %v2607_v51 }
 0x50f   :  { %v2608_v56 = vmul.f32 0.25, %v2606_v54 }
 0x511   :  { %v2610_v58 = vsub.f32 %v2608_v56, %v2609_v57 }
 0x513   :  { %v2611_v59 = vadd.f32 1e-05, %v2610_v58 }
 0x515   :  { %8441 = vrsqrt.f32 %v2611_v59 }
 0x51f   :  { %v8442_v60 = vpop.eup %8441 }
 0x520   :  { %2620 = vrot.lane.b32.xlu1 %v8442_v60, %s8527_s4 }
 0x57f   :  { %v2615_v61 = vpop.permute.xlu0 %2614 }
 0x580   :  { %v2618_v3 = vsel %vm2617_vm4, %v2607_v51, %v2615_v61  ;;  %v8088_v61 = vld [vmem:[%s10692_s6] ss:$8 sps:$4 sm:$0xff]  }
 0x581   :  { %v2627_v4 = vrot.slane %v2618_v3, %v8646_v14  ;;  %v8093_v3 = vld [vmem:[%s10692_s6 + $0x14] ss:$8 sps:$4 sm:$0xff]  }
 0x583   :  { %v2628_v7 = vsub.f32 %v9524_v17, %v2627_v4  ;;  %v2629_v8 = vsub.f32 %v9527_v19, %v2627_v4  ;;  %v8038_v17 = vld [vmem:[%s10691_s5] sm:$0x7f]   ;;  %v8091_v4 = vld [vmem:[%s10692_s6 + $0x10] ss:$8 sps:$4 sm:$0xff]  }
 0x584   :  { %v8042_v19 = vld [vmem:[%s10692_s6 + $0x104] ss:$8 sps:$4 sm:$0xff]  }
 0x592   :  { %v2621_v5 = vpop.permute.xlu1 %2620 }
 0x593   :  { %v2623_v6 = vsel %vm2617_vm4, %v8442_v60, %v2621_v5  ;;  %v8096_v5 = vld [vmem:[%s10692_s6 + $0x24] ss:$8 sps:$4 sm:$0xff]  }
 0x594   :  { %v2633_v9 = vrot.slane %v2623_v6, %v8646_v14  ;;  %v8094_v6 = vld [vmem:[%s10692_s6 + $0x20] ss:$8 sps:$4 sm:$0xff]  }
 0x596   :  { %v2634_v12 = vmul.f32 %v2633_v9, %v2628_v7  ;;  %v2635_v13 = vmul.f32 %v2633_v9, %v2629_v8  ;;  %v8099_v7 = vld [vmem:[%s10692_s6 + $0x34] ss:$8 sps:$4 sm:$0xff]   ;;  %v8097_v8 = vld [vmem:[%s10692_s6 + $0x30] ss:$8 sps:$4 sm:$0xff]   ;;  %v8102_v9 = vld [vmem:[%s10692_s6 + $0x44] ss:$8 sps:$4 sm:$0xff]  }
 0x598   :  { %v2636_v16 = vmax.f32 %v2634_v12, 0.0  ;;  %v2637_v18 = vmax.f32 %v2635_v13, 0.0  ;;  %v8100_v12 = vld [vmem:[%s10692_s6 + $0x40] ss:$8 sps:$4 sm:$0xff]   ;;  %v8105_v13 = vld [vmem:[%s10692_s6 + $0x54] ss:$8 sps:$4 sm:$0xff]  }
 0x59a   :  { %v9549_v20 = vpack.c.bf16 %v2637_v18, %v2637_v18  ;;  %v2638_v21 = vpack.c.bf16 %v2636_v16, %v2636_v16  ;;  %v8103_v16 = vld [vmem:[%s10692_s6 + $0x50] ss:$8 sps:$4 sm:$0xff]   ;;  %v8108_v18 = vld [vmem:[%s10692_s6 + $0x64] ss:$8 sps:$4 sm:$0xff]  }
 0x59c   :  { %6987 = vmatprep.subr.msk.bf16.mxu1 %vm2651_vm5, %v9549_v20  ;;  %v9554_v22 = vsel %vm2651_vm5, %v2638_v21, 0  ;;  %v8106_v21 = vld [vmem:[%s10692_s6 + $0x60] ss:$8 sps:$4 sm:$0xff]  }
 0x59d   :  { %2659 = vmatpush1.bf16.msra.mxu1 %v9554_v22 }
 0x59e   :  { %6992 = vmatprep.subr.msk.bf16.mxu1 %vm2651_vm5, %v9549_v20 }
 0x5a0   :  { %6988 = vmatmul.mubr.msk.bf16.vlgmr.msra.gmra.mrb[32].mxu1 %vm2647_vm6, %v8038_v17  ;;  %v8111_v17 = vld [vmem:[%s10692_s6 + $0x74] ss:$8 sps:$4 sm:$0xff]  }
 0x5a1   :  { %2747 = vmatpush1.bf16.msra.mxu1 %v9554_v22  ;;  %2778 = vmatprep.mubr.bf16.mxu1 %v8526_v0 }
 0x5a2   :  { %2984 = vmatprep.subr.bf16.mxu1 %v8042_v19  ;;  %v8109_v19 = vld [vmem:[%s10692_s6 + $0x70] ss:$8 sps:$4 sm:$0xff]  }
 0x5a8   :  { %6993 = vmatmul.mubr.msk.bf16.vlgmr.msra.gmra.mrb[36].mxu1 %vm2647_vm6, %v8039_v23  ;;  %v8114_v23 = vld [vmem:[%s10692_s6 + $0x84] ss:$8 sps:$4 sm:$0xff]  }
 0x5a9   :  { %2985 = vmatpush1.bf16.msra.mxu1 %v8040_v55  ;;  %v8112_v55 = vld [vmem:[%s10692_s6 + $0x80] ss:$8 sps:$4 sm:$0xff]  }
 0x5aa   :  { %2986 = vmatprep.subr.bf16.mxu1 %v8045_v24  ;;  %v8117_v24 = vld [vmem:[%s10692_s6 + $0x94] ss:$8 sps:$4 sm:$0xff]  }
 0x5ad   :  { %2987 = vmatpush1.bf16.msra.mxu1 %v8043_v25  ;;  %v8115_v25 = vld [vmem:[%s10692_s6 + $0x90] ss:$8 sps:$4 sm:$0xff]  }
 0x5ae   :  { %2988 = vmatprep.subr.bf16.mxu1 %v8048_v10  ;;  %v8120_v10 = vld [vmem:[%s10692_s6 + $0xa4] ss:$8 sps:$4 sm:$0xff]  }
 0x5b1   :  { %2989 = vmatpush1.bf16.msra.mxu1 %v8046_v26  ;;  %v8118_v26 = vld [vmem:[%s10692_s6 + $0xa0] ss:$8 sps:$4 sm:$0xff]  }
 0x5b2   :  { %2990 = vmatprep.subr.bf16.mxu1 %v8051_v27  ;;  %v8123_v27 = vld [vmem:[%s10692_s6 + $0xb4] ss:$8 sps:$4 sm:$0xff]  }
 0x5b5   :  { %2991 = vmatpush1.bf16.msra.mxu1 %v8049_v11  ;;  %v8121_v11 = vld [vmem:[%s10692_s6 + $0xb0] ss:$8 sps:$4 sm:$0xff]  }
 0x5b6   :  { %2992 = vmatprep.subr.bf16.mxu1 %v8054_v28  ;;  %v8126_v28 = vld [vmem:[%s10692_s6 + $0xc4] ss:$8 sps:$4 sm:$0xff]  }
 0x5b9   :  { %2993 = vmatpush1.bf16.msra.mxu1 %v8052_v29  ;;  %v8124_v29 = vld [vmem:[%s10692_s6 + $0xc0] ss:$8 sps:$4 sm:$0xff]  }
 0x5ba   :  { %2994 = vmatprep.subr.bf16.mxu1 %v8057_v30  ;;  %v8129_v30 = vld [vmem:[%s10692_s6 + $0xd4] ss:$8 sps:$4 sm:$0xff]  }
 0x5bd   :  { %2995 = vmatpush1.bf16.msra.mxu1 %v8055_v31  ;;  %v8127_v31 = vld [vmem:[%s10692_s6 + $0xd0] ss:$8 sps:$4 sm:$0xff]  }
 0x5be   :  { %2996 = vmatprep.subr.bf16.mxu1 %v8060_v32  ;;  %v8132_v32 = vld [vmem:[%s10692_s6 + $0xe4] ss:$8 sps:$4 sm:$0xff]  }
 0x5c1   :  { %2997 = vmatpush1.bf16.msra.mxu1 %v8058_v33  ;;  %v8130_v33 = vld [vmem:[%s10692_s6 + $0xe0] ss:$8 sps:$4 sm:$0xff]  }
 0x5c2   :  { %2998 = vmatprep.subr.bf16.mxu1 %v8063_v34  ;;  %v8135_v34 = vld [vmem:[%s10692_s6 + $0xf4] ss:$8 sps:$4 sm:$0xff]  }
 0x5c5   :  { %2999 = vmatpush1.bf16.msra.mxu1 %v8061_v36  ;;  %v8133_v36 = vld [vmem:[%s10692_s6 + $0xf0] ss:$8 sps:$4 sm:$0xff]  }
 0x5c6   :  { %3000 = vmatprep.subr.bf16.mxu1 %v8066_v37  ;;  %v8139_v37 = vld [vmem:[%s10692_s6 + $0x204] ss:$8 sps:$4 sm:$0xff]  }
 0x5c9   :  { %3001 = vmatpush1.bf16.msra.mxu1 %v8064_v38  ;;  %v8136_v38 = vld [vmem:[%s10691_s5 + $0x10] sm:$0x7f]  }
 0x5ca   :  { %3002 = vmatprep.subr.bf16.mxu1 %v8069_v39  ;;  %v8142_v39 = vld [vmem:[%s10692_s6 + $0x214] ss:$8 sps:$4 sm:$0xff]  }
 0x5cd   :  { %3003 = vmatpush1.bf16.msra.mxu1 %v8067_v40  ;;  %v8145_v40 = vld [vmem:[%s10692_s6 + $0x224] ss:$8 sps:$4 sm:$0xff]  }
 0x5ce   :  { %3004 = vmatprep.subr.bf16.mxu1 %v8072_v41  ;;  %v8143_v41 = vld [vmem:[%s10692_s6 + $0x220] ss:$8 sps:$4 sm:$0xff]  }
 0x5d1   :  { %3005 = vmatpush1.bf16.msra.mxu1 %v8070_v42  ;;  %v8148_v42 = vld [vmem:[%s10692_s6 + $0x234] ss:$8 sps:$4 sm:$0xff]  }
 0x5d2   :  { %3006 = vmatprep.subr.bf16.mxu1 %v8075_v43  ;;  %v8146_v43 = vld [vmem:[%s10692_s6 + $0x230] ss:$8 sps:$4 sm:$0xff]  }
 0x5d5   :  { %3007 = vmatpush1.bf16.msra.mxu1 %v8073_v44  ;;  %v8151_v44 = vld [vmem:[%s10692_s6 + $0x244] ss:$8 sps:$4 sm:$0xff]  }
 0x5d6   :  { %3008 = vmatprep.subr.bf16.mxu1 %v8078_v62  ;;  %v8149_v62 = vld [vmem:[%s10692_s6 + $0x240] ss:$8 sps:$4 sm:$0xff]  }
 0x5d9   :  { %3009 = vmatpush1.bf16.msra.mxu1 %v8076_v15  ;;  %v8154_v15 = vld [vmem:[%s10692_s6 + $0x254] ss:$8 sps:$4 sm:$0xff]  }
 0x5da   :  { %3010 = vmatprep.subr.bf16.mxu1 %v8081_v35  ;;  %v8152_v35 = vld [vmem:[%s10692_s6 + $0x250] ss:$8 sps:$4 sm:$0xff]  }
 0x5dd   :  { %3011 = vmatpush1.bf16.msra.mxu1 %v8079_v45  ;;  %v8157_v45 = vld [vmem:[%s10692_s6 + $0x264] ss:$8 sps:$4 sm:$0xff]  }
 0x5de   :  { %3012 = vmatprep.subr.bf16.mxu1 %v8084_v63  ;;  %v8160_v63 = vld [vmem:[%s10692_s6 + $0x274] ss:$8 sps:$4 sm:$0xff]  }
 0x5e1   :  { %3013 = vmatpush1.bf16.msra.mxu1 %v8082_v46  ;;  %v8155_v46 = vld [vmem:[%s10692_s6 + $0x260] ss:$8 sps:$4 sm:$0xff]  }
 0x5e2   :  { %3014 = vmatprep.subr.bf16.mxu1 %v8087_v1  ;;  %v8158_v1 = vld [vmem:[%s10692_s6 + $0x270] ss:$8 sps:$4 sm:$0xff]  }
 0x5e5   :  { %3015 = vmatpush1.bf16.msra.mxu1 %v8085_v47  ;;  %v8163_v47 = vld [vmem:[%s10692_s6 + $0x284] ss:$8 sps:$4 sm:$0xff]  }
 0x5e6   :  { %3187 = vmatprep.subr.bf16.mxu1 %v8090_v48  ;;  %v8161_v48 = vld [vmem:[%s10692_s6 + $0x280] ss:$8 sps:$4 sm:$0xff]  }
 0x673   :  { %v9668_v49 = vpop.f32.mrb[32].mxu1 }
 0x674   :  { %v2694_v2 = vpop.f32.mrb[33].mxu1 }
 0x675   :  { %v9670_v50 = vpop.f32.mrb[34].mxu1 }
 0x676   :  { %v2701_v51 = vpack.c.bf16 %v9670_v50, %v9668_v49  ;;  %v2698_v52 = vpop.f32.mrb[35].mxu1  ;;  %v8166_v49 = vld [vmem:[%s10692_s6 + $0x294] ss:$8 sps:$4 sm:$0xff]   ;;  %v8169_v50 = vld [vmem:[%s10692_s6 + $0x2a4] ss:$8 sps:$4 sm:$0xff]  }
 0x677   :  { %v2702_v53 = vpack.c.bf16 %v2698_v52, %v2694_v2  ;;  %v8164_v2 = vld [vmem:[%s10692_s6 + $0x290] ss:$8 sps:$4 sm:$0xff]   ;;  %v8172_v52 = vld [vmem:[%s10692_s6 + $0x2b4] ss:$8 sps:$4 sm:$0xff]  }
 0x67b   :  { %v2780_v54 = vpop.f32.mrb[36].mxu1 }
 0x67c   :  { %v2782_v56 = vpop.f32.mrb[37].mxu1 }
 0x67d   :  { %v2784_v57 = vpop.f32.mrb[38].mxu1 }
 0x67e   :  { %v2789_v58 = vpack.c.bf16 %v2784_v57, %v2780_v54  ;;  %v2786_v59 = vpop.f32.mrb[39].mxu1  ;;  %v8175_v54 = vld [vmem:[%s10692_s6 + $0x2c4] ss:$8 sps:$4 sm:$0xff]   ;;  %v8178_v57 = vld [vmem:[%s10692_s6 + $0x2d4] ss:$8 sps:$4 sm:$0xff]  }
 0x67f   :  { %v2790_v60 = vpack.c.bf16 %v2786_v59, %v2782_v56  ;;  %v8173_v56 = vld [vmem:[%s10692_s6 + $0x2c0] ss:$8 sps:$4 sm:$0xff]   ;;  %v8181_v59 = vld [vmem:[%s10692_s6 + $0x2e4] ss:$8 sps:$4 sm:$0xff]  }
 0x681   :  { %3016 = vmatprep.mubr.bf16.mxu1 %v2790_v60  ;;  %v8179_v60 = vld [vmem:[%s10692_s6 + $0x2e0] ss:$8 sps:$4 sm:$0xff]  }
 0x682   :  { %3017 = vmatmul.mubr.bf16.vlgmr.msra.gmra.mrb[40].mxu1 %v2789_v58  ;;  %v8176_v58 = vld [vmem:[%s10692_s6 + $0x2d0] ss:$8 sps:$4 sm:$0xff]  }
 0x683   :  { %3188 = vmatpush1.bf16.msra.mxu1 %v8088_v61  ;;  %3219 = vmatprep.mubr.bf16.mxu1 %v2702_v53  ;;  %v8170_v53 = vld [vmem:[%s10692_s6 + $0x2b0] ss:$8 sps:$4 sm:$0xff]   ;;  %v8184_v61 = vld [vmem:[%s10692_s6 + $0x2f4] ss:$8 sps:$4 sm:$0xff]  }
 0x684   :  { %3189 = vmatprep.subr.bf16.mxu1 %v8093_v3  ;;  %v8182_v3 = vld [vmem:[%s10692_s6 + $0x2f0] ss:$8 sps:$4 sm:$0xff]  }
 0x687   :  { %3190 = vmatpush1.bf16.msra.mxu1 %v8091_v4 }
 0x688   :  { %3191 = vmatprep.subr.bf16.mxu1 %v8096_v5 }
 0x68b   :  { %3192 = vmatpush1.bf16.msra.mxu1 %v8094_v6 }
 0x68c   :  { %3193 = vmatprep.subr.bf16.mxu1 %v8099_v7 }
 0x68f   :  { %3194 = vmatpush1.bf16.msra.mxu1 %v8097_v8 }
 0x690   :  { %3195 = vmatprep.subr.bf16.mxu1 %v8102_v9 }
 0x693   :  { %3196 = vmatpush1.bf16.msra.mxu1 %v8100_v12 }
 0x694   :  { %3197 = vmatprep.subr.bf16.mxu1 %v8105_v13 }
 0x697   :  { %3198 = vmatpush1.bf16.msra.mxu1 %v8103_v16 }
 0x698   :  { %3199 = vmatprep.subr.bf16.mxu1 %v8108_v18 }
 0x69b   :  { %3200 = vmatpush1.bf16.msra.mxu1 %v8106_v21 }
 0x69c   :  { %3201 = vmatprep.subr.bf16.mxu1 %v8111_v17 }
 0x69f   :  { %3202 = vmatpush1.bf16.msra.mxu1 %v8109_v19 }
 0x6a0   :  { %3203 = vmatprep.subr.bf16.mxu1 %v8114_v23 }
 0x6a3   :  { %3204 = vmatpush1.bf16.msra.mxu1 %v8112_v55 }
 0x6a4   :  { %3205 = vmatprep.subr.bf16.mxu1 %v8117_v24 }
 0x6a7   :  { %3206 = vmatpush1.bf16.msra.mxu1 %v8115_v25 }
 0x6a8   :  { %3207 = vmatprep.subr.bf16.mxu1 %v8120_v10 }
 0x6ab   :  { %3208 = vmatpush1.bf16.msra.mxu1 %v8118_v26 }
 0x6ac   :  { %3209 = vmatprep.subr.bf16.mxu1 %v8123_v27 }
 0x6af   :  { %3210 = vmatpush1.bf16.msra.mxu1 %v8121_v11 }
 0x6b0   :  { %3211 = vmatprep.subr.bf16.mxu1 %v8126_v28 }
 0x6b3   :  { %3212 = vmatpush1.bf16.msra.mxu1 %v8124_v29 }
 0x6b4   :  { %3213 = vmatprep.subr.bf16.mxu1 %v8129_v30 }
 0x6b7   :  { %3214 = vmatpush1.bf16.msra.mxu1 %v8127_v31 }
 0x6b8   :  { %3215 = vmatprep.subr.bf16.mxu1 %v8132_v32 }
 0x6bb   :  { %3216 = vmatpush1.bf16.msra.mxu1 %v8130_v33 }
 0x6bc   :  { %3217 = vmatprep.subr.bf16.mxu1 %v8135_v34 }
 0x6bf   :  { %3218 = vmatpush1.bf16.msra.mxu1 %v8133_v36 }
 0x6c0   :  { %7093 = vmatprep.subr.msk.bf16.mxu1 %vm2651_vm5, %v9549_v20  ;;  %v8137_v20 = vld [vmem:[%s10692_s6 + $0x200] ss:$8 sps:$4 sm:$0xff]  }
 0x6c2   :  { %3220 = vmatmul.mubr.bf16.vlgmr.msra.gmra.mrb[40].mxu1 %v2701_v51  ;;  %v8167_v51 = vld [vmem:[%s10692_s6 + $0x2a0] ss:$8 sps:$4 sm:$0xff]  }
 0x6c3   :  { %3242 = vmatpush1.bf16.msra.mxu1 %v9554_v22  ;;  %3273 = vmatprep.mubr.bf16.mxu1 %v8526_v0  ;;  %v8140_v22 = vld [vmem:[%s10692_s6 + $0x210] ss:$8 sps:$4 sm:$0xff]   ;;  %s8528_s6 = smov 96  }
 0x6c4   :  { %3479 = vmatprep.subr.bf16.mxu1 %v8139_v37 }
 0x6ca   :  { %7094 = vmatmul.mubr.msk.bf16.vlgmr.msra.gmra.mrb[44].mxu1 %vm2647_vm6, %v8136_v38 }
 0x6cb   :  { %3480 = vmatpush1.bf16.msra.mxu1 %v8137_v20 }
 0x6cc   :  { %3481 = vmatprep.subr.bf16.mxu1 %v8142_v39 }
 0x6cf   :  { %3482 = vmatpush1.bf16.msra.mxu1 %v8140_v22 }
 0x6d0   :  { %3483 = vmatprep.subr.bf16.mxu1 %v8145_v40 }
 0x6d3   :  { %3484 = vmatpush1.bf16.msra.mxu1 %v8143_v41 }
 0x6d4   :  { %3485 = vmatprep.subr.bf16.mxu1 %v8148_v42 }
 0x6d7   :  { %3486 = vmatpush1.bf16.msra.mxu1 %v8146_v43 }
 0x6d8   :  { %3487 = vmatprep.subr.bf16.mxu1 %v8151_v44 }
 0x6db   :  { %3488 = vmatpush1.bf16.msra.mxu1 %v8149_v62 }
 0x6dc   :  { %3489 = vmatprep.subr.bf16.mxu1 %v8154_v15 }
 0x6df   :  { %3490 = vmatpush1.bf16.msra.mxu1 %v8152_v35 }
 0x6e0   :  { %3491 = vmatprep.subr.bf16.mxu1 %v8157_v45 }
 0x6e3   :  { %3492 = vmatpush1.bf16.msra.mxu1 %v8155_v46 }
 0x6e4   :  { %3493 = vmatprep.subr.bf16.mxu1 %v8160_v63 }
 0x6e7   :  { %3494 = vmatpush1.bf16.msra.mxu1 %v8158_v1 }
 0x6e8   :  { %3495 = vmatprep.subr.bf16.mxu1 %v8163_v47 }
 0x6eb   :  { %3496 = vmatpush1.bf16.msra.mxu1 %v8161_v48 }
 0x6ec   :  { %3497 = vmatprep.subr.bf16.mxu1 %v8166_v49 }
 0x6ef   :  { %3498 = vmatpush1.bf16.msra.mxu1 %v8164_v2 }
 0x6f0   :  { %3499 = vmatprep.subr.bf16.mxu1 %v8169_v50 }
 0x6f3   :  { %3500 = vmatpush1.bf16.msra.mxu1 %v8167_v51 }
 0x6f4   :  { %3501 = vmatprep.subr.bf16.mxu1 %v8172_v52 }
 0x6f7   :  { %3502 = vmatpush1.bf16.msra.mxu1 %v8170_v53 }
 0x6f8   :  { %3503 = vmatprep.subr.bf16.mxu1 %v8175_v54 }
 0x6fb   :  { %3504 = vmatpush1.bf16.msra.mxu1 %v8173_v56 }
 0x6fc   :  { %3505 = vmatprep.subr.bf16.mxu1 %v8178_v57 }
 0x6ff   :  { %3506 = vmatpush1.bf16.msra.mxu1 %v8176_v58 }
 0x700   :  { %3507 = vmatprep.subr.bf16.mxu1 %v8181_v59 }
 0x703   :  { %3508 = vmatpush1.bf16.msra.mxu1 %v8179_v60 }
 0x704   :  { %3509 = vmatprep.subr.bf16.mxu1 %v8184_v61 }
 0x707   :  { %3510 = vmatpush1.bf16.msra.mxu1 %v8182_v3 }
 0x79d   :  { %v3275_v4 = vpop.f32.mrb[44].mxu1 }
 0x79e   :  { %v3277_v5 = vpop.f32.mrb[45].mxu1 }
 0x79f   :  { %v3279_v6 = vpop.f32.mrb[46].mxu1 }
 0x7a0   :  { %v3284_v7 = vpack.c.bf16 %v3279_v6, %v3275_v4  ;;  %v3281_v8 = vpop.f32.mrb[47].mxu1 }
 0x7a1   :  { %v3285_v9 = vpack.c.bf16 %v3281_v8, %v3277_v5 }
 0x7a3   :  { %3511 = vmatprep.mubr.bf16.mxu1 %v3285_v9 }
 0x7a4   :  { %3512 = vmatmul.mubr.bf16.vlgmr.msra.gmra.mrb[40].mxu1 %v3284_v7 }
 0x7a5   :  { %3740 = vmatprep.mubr.bf16.mxu1 %v8526_v0 }
 0x877   :  { %v9875_v12 = vpop.f32.mrb[40].mxu1 }
 0x878   :  { %v9877_v13 = vpop.f32.mrb[41].mxu1  ;;  %v3549_v21 = vmul.f32 %v9875_v12, %v9875_v12 }
 0x879   :  { %v3550_v16 = vmul.f32 %v9877_v13, %v9877_v13  ;;  %v9881_v18 = vpop.f32.mrb[42].mxu1  ;;  %v3536_v55 = vsel %vm3535_vm8, %v9877_v13, 0.0 }
 0x87a   :  { %v3527_v17 = vsel %vm3526_vm7, %v9881_v18, 0.0  ;;  %v3551_v19 = vmul.f32 %v9881_v18, %v9881_v18  ;;  %v9889_v23 = vpop.f32.mrb[43].mxu1 }
 0x87b   :  { %v3528_v24 = vadd.f32 %v3527_v17, %v9875_v12  ;;  %v3538_v25 = vsel %vm3537_vm9, %v9889_v23, 0.0  ;;  %v3552_v10 = vmul.f32 %v9889_v23, %v9889_v23  ;;  %v3561_v11 = vsel %vm3535_vm8, %v3550_v16, 0.0 }
 0x87c   :  { %v3553_v26 = vsel %vm3526_vm7, %v3551_v19, 0.0  ;;  %v3539_v27 = vadd.f32 %v3538_v25, %v3536_v55 }
 0x87d   :  { %v3529_v28 = vrot.slane %v3528_v24, 4  ;;  %v3554_v29 = vadd.f32 %v3553_v26, %v3549_v21  ;;  %v3562_v30 = vsel %vm3537_vm9, %v3552_v10, 0.0 }
 0x87e   :  { %v3540_v31 = vrot.slane %v3539_v27, 4  ;;  %v3563_v32 = vadd.f32 %v3562_v30, %v3561_v11 }
 0x87f   :  { %v3530_v33 = vadd.f32 %v3529_v28, %v3528_v24  ;;  %v3555_v34 = vrot.slane %v3554_v29, 4 }
 0x880   :  { %v3564_v36 = vrot.slane %v3563_v32, 4  ;;  %v3541_v20 = vadd.f32 %v3540_v31, %v3539_v27 }
 0x881   :  { %v3531_v37 = vrot.slane %v3530_v33, 2  ;;  %v3556_v38 = vadd.f32 %v3555_v34, %v3554_v29 }
 0x882   :  { %v3565_v40 = vadd.f32 %v3564_v36, %v3563_v32  ;;  %v3542_v43 = vrot.slane %v3541_v20, 2 }
 0x883   :  { %v3532_v39 = vadd.f32 %v3531_v37, %v3530_v33  ;;  %v3557_v22 = vrot.slane %v3556_v38, 2 }
 0x884   :  { %v3566_v15 = vrot.slane %v3565_v40, 2  ;;  %v3543_v46 = vadd.f32 %v3542_v43, %v3541_v20 }
 0x885   :  { %v3533_v41 = vrot.slane %v3532_v39, 1  ;;  %v3558_v42 = vadd.f32 %v3557_v22, %v3556_v38 }
 0x886   :  { %v3567_v1 = vadd.f32 %v3566_v15, %v3565_v40  ;;  %v3544_v47 = vrot.slane %v3543_v46, 1 }
 0x887   :  { %v3534_v44 = vadd.f32 %v3533_v41, %v3532_v39  ;;  %v3559_v62 = vrot.slane %v3558_v42, 1 }
 0x888   :  { %v3568_v48 = vrot.slane %v3567_v1, 1  ;;  %v3545_v49 = vadd.f32 %v3544_v47, %v3543_v46 }
 0x889   :  { %v3547_v35 = vmul.f32 0.071428575, %v3534_v44  ;;  %v3560_v45 = vadd.f32 %v3559_v62, %v3558_v42 }
 0x88a   :  { %v3569_v2 = vadd.f32 %v3568_v48, %v3567_v1  ;;  %v3548_v50 = vmul.f32 0.071428575, %v3545_v49 }
 0x88b   :  { %3573 = vrot.lane.b32.xlu0 %v3547_v35, %s8528_s6  ;;  %v3570_v63 = vmul.f32 0.071428575, %v3560_v45 }
 0x88c   :  { %v3571_v51 = vmul.f32 0.071428575, %v3569_v2 }
 0x88d   :  { %3578 = vrot.lane.b32.xlu1 %v3570_v63, %s8528_s6 }
 0x88f   :  { %3582 = vrot.lane.b32.xlu0 %v3547_v35, %s8527_s4 }
 0x891   :  { %3586 = vrot.lane.b32.xlu1 %v3570_v63, %s8527_s4 }
 0x893   :  { %3590 = vrot.lane.b32.xlu0 %v3547_v35, %s8529_s30 }
 0x895   :  { %3594 = vrot.lane.b32.xlu1 %v3570_v63, %s8529_s30 }
 0x897   :  { %3601 = vrot.lane.b32.xlu0 %v3548_v50, %s8528_s6 }
 0x899   :  { %3606 = vrot.lane.b32.xlu1 %v3571_v51, %s8528_s6 }
 0x89b   :  { %3610 = vrot.lane.b32.xlu0 %v3548_v50, %s8527_s4 }
 0x89d   :  { %3614 = vrot.lane.b32.xlu1 %v3571_v51, %s8527_s4 }
 0x8fd   :  { %v3574_v52 = vpop.permute.xlu0 %3573 }
 0x8fe   :  { %v3576_v56 = vadd.f32 %v3574_v52, %v3547_v35  ;;  %v8187_v52 = vld [vmem:[%s10693_s7 + $0x10] sm:$0xff]  }
 0x8ff   :  { %v3579_v53 = vpop.permute.xlu1 %3578 }
 0x900   :  { %v3581_v58 = vadd.f32 %v3579_v53, %v3570_v63  ;;  %v8189_v53 = vld [vmem:[#allocation2 + $0xe0] ss:$8 sps:$4 sm:$0xff]  }
 0x901   :  { %v3583_v54 = vpop.permute.xlu0 %3582 }
 0x902   :  { %v3585_v59 = vadd.f32 %v3583_v54, %v3576_v56  ;;  %v8194_v54 = vld [vmem:[#allocation2 + $0xf4] ss:$8 sps:$4 sm:$0xff]   ;;  %v8192_v56 = vld [vmem:[#allocation2 + $0xf0] ss:$8 sps:$4 sm:$0xff]  }
 0x903   :  { %v3587_v57 = vpop.permute.xlu1 %3586 }
 0x904   :  { %v3589_v61 = vadd.f32 %v3587_v57, %v3581_v58  ;;  %v8197_v57 = vld [vmem:[#allocation2 + $0x104] ss:$8 sps:$4 sm:$0xff]   ;;  %v8188_v58 = vld [vmem:[%s10693_s7 + $0x18] sm:$0x3f]  }
 0x905   :  { %v3591_v60 = vpop.permute.xlu0 %3590 }
 0x906   :  { %v3593_v3 = vadd.f32 %v3591_v60, %v3585_v59  ;;  %v8195_v59 = vld [vmem:[#allocation2 + $0x100] ss:$8 sps:$4 sm:$0xff]   ;;  %v8200_v60 = vld [vmem:[#allocation2 + $0x114] ss:$8 sps:$4 sm:$0xff]  }
 0x907   :  { %v3595_v4 = vpop.permute.xlu1 %3594 }
 0x908   :  { %v3597_v5 = vadd.f32 %v3595_v4, %v3589_v61  ;;  %v3598_v6 = vadd.f32 %v3593_v3, %v3548_v50  ;;  %v8198_v61 = vld [vmem:[#allocation2 + $0x110] ss:$8 sps:$4 sm:$0xff]   ;;  %v8203_v3 = vld [vmem:[#allocation2 + $0x124] ss:$8 sps:$4 sm:$0xff]   ;;  %v8201_v4 = vld [vmem:[#allocation2 + $0x120] ss:$8 sps:$4 sm:$0xff]  }
 0x909   :  { %v3602_v7 = vpop.permute.xlu0 %3601 }
 0x90a   :  { %v3599_v8 = vadd.f32 %v3597_v5, %v3571_v51  ;;  %v3604_v16 = vadd.f32 %v3602_v7, %v3598_v6  ;;  %v8186_v51 = vld [vmem:[%s10693_s7 + $0x8] sm:$0x3f]   ;;  %v8206_v5 = vld [vmem:[#allocation2 + $0x134] ss:$8 sps:$4 sm:$0xff]   ;;  %v8204_v6 = vld [vmem:[#allocation2 + $0x130] ss:$8 sps:$4 sm:$0xff]  }
 0x90b   :  { %v3607_v9 = vpop.permute.xlu1 %3606  ;;  %v8209_v7 = vld [vmem:[#allocation2 + $0x144] ss:$8 sps:$4 sm:$0xff]  }
 0x90c   :  { %v3609_v17 = vadd.f32 %v3607_v9, %v3599_v8  ;;  %v8207_v8 = vld [vmem:[#allocation2 + $0x140] ss:$8 sps:$4 sm:$0xff]   ;;  %v8212_v9 = vld [vmem:[#allocation2 + $0x154] ss:$8 sps:$4 sm:$0xff]  }
 0x90d   :  { %v3611_v21 = vpop.permute.xlu0 %3610 }
 0x90e   :  { %v3613_v19 = vadd.f32 %v3611_v21, %v3604_v16  ;;  %v8210_v16 = vld [vmem:[#allocation2 + $0x150] ss:$8 sps:$4 sm:$0xff]   ;;  %v8215_v21 = vld [vmem:[#allocation2 + $0x164] ss:$8 sps:$4 sm:$0xff]  }
 0x90f   :  { %v3615_v55 = vpop.permute.xlu1 %3614 }
 0x910   :  { %v3618_v24 = vmul.f32 0.14285715, %v3613_v19  ;;  %v3617_v25 = vadd.f32 %v3615_v55, %v3609_v17  ;;  %v8213_v17 = vld [vmem:[#allocation2 + $0x160] ss:$8 sps:$4 sm:$0xff]   ;;  %v8218_v19 = vld [vmem:[#allocation2 + $0x174] ss:$8 sps:$4 sm:$0xff]  }
 0x911   :  { %v8216_v55 = vld [vmem:[#allocation2 + $0x170] ss:$8 sps:$4 sm:$0xff]  }
 0x912   :  { %v3619_v10 = vmul.f32 0.14285715, %v3617_v25  ;;  %v3620_v26 = vmul.f32 %v3618_v24, %v3618_v24  ;;  %3628 = vrot.lane.b32.xlu1 %v3618_v24, %s8527_s4  ;;  %3625 = vrot.lane.b32.xlu0 %v3618_v24, %s8529_s30  ;;  %v8221_v25 = vld [vmem:[#allocation2 + $0x184] ss:$8 sps:$4 sm:$0xff]  }
 0x914   :  { %v3621_v27 = vsub.f32 %v3619_v10, %v3620_v26  ;;  %v8224_v10 = vld [vmem:[#allocation2 + $0x194] ss:$8 sps:$4 sm:$0xff]   ;;  %v8222_v26 = vld [vmem:[#allocation2 + $0x190] ss:$8 sps:$4 sm:$0xff]  }
 0x916   :  { %v3622_v11 = vadd.f32 1e-05, %v3621_v27  ;;  %3631 = vrot.lane.b32.xlu0 %v3618_v24, %s8528_s6  ;;  %v8225_v27 = vld [vmem:[#allocation2 + $0x1a0] ss:$8 sps:$4 sm:$0xff]  }
 0x918   :  { %8443 = vrsqrt.f32 %v3622_v11  ;;  %v8227_v11 = vld [vmem:[#allocation2 + $0x1a4] ss:$8 sps:$4 sm:$0xff]  }
 0x922   :  { %v8444_v28 = vpop.eup %8443 }
 0x923   :  { %3641 = vrot.lane.b32.xlu0 %v8444_v28, %s8527_s4  ;;  %3638 = vrot.lane.b32.xlu1 %v8444_v28, %s8529_s30 }
 0x927   :  { %3644 = vrot.lane.b32.xlu1 %v8444_v28, %s8528_s6 }
 0x984   :  { %v3626_v29 = vpop.permute.xlu0 %3625  ;;  %v3629_v30 = vpop.permute.xlu1 %3628 }
 0x985   :  { %v3634_v31 = vsel %vm126_vm0, %v3618_v24, %v3626_v29  ;;  %v8219_v24 = vld [vmem:[#allocation2 + $0x180] ss:$8 sps:$4 sm:$0xff]   ;;  %v8228_v29 = vld [vmem:[#allocation2 + $0x1b0] ss:$8 sps:$4 sm:$0xff]  }
 0x986   :  { %v3635_v32 = vsel %vm2617_vm4, %v3634_v31, %v3629_v30  ;;  %v8233_v30 = vld [vmem:[#allocation2 + $0x4] ss:$8 sps:$4 sm:$0xff]  }
 0x987   :  { %v3657_v34 = vrot.slane %v3635_v32, %v8646_v14 }
 0x988   :  { %v3632_v33 = vpop.permute.xlu0 %3631 }
 0x989   :  { %v3636_v36 = vsel %vm3535_vm8, %v3635_v32, %v3632_v33  ;;  %v3659_v40 = vsub.f32 %v9877_v13, %v3657_v34  ;;  %v3661_v41 = vsub.f32 %v9889_v23, %v3657_v34 }
 0x98a   :  { %v3653_v39 = vrot.slane %v3636_v36, %v8646_v14 }
 0x98c   :  { %v3658_v35 = vsub.f32 %v9875_v12, %v3653_v39  ;;  %v3660_v45 = vsub.f32 %v9881_v18, %v3653_v39  ;;  %v8185_v12 = vld [vmem:[%s10693_s7] sm:$0xff]  }
 0x98d   :  { %v8191_v18 = vld [vmem:[#allocation2 + $0xe4] ss:$8 sps:$4 sm:$0xff]  }
 0x995   :  { %v3642_v37 = vpop.permute.xlu0 %3641  ;;  %v3639_v38 = vpop.permute.xlu1 %3638 }
 0x996   :  { %v3647_v20 = vsel %vm126_vm0, %v8444_v28, %v3639_v38  ;;  %v8230_v28 = vld [vmem:[#allocation2 + $0x1b4] ss:$8 sps:$4 sm:$0xff]  }
 0x997   :  { %v3648_v22 = vsel %vm2617_vm4, %v3647_v20, %v3642_v37 }
 0x998   :  { %v3669_v42 = vrot.slane %v3648_v22, %v8646_v14 }
 0x999   :  { %v3645_v43 = vpop.permute.xlu1 %3644 }
 0x99a   :  { %v3671_v44 = vmul.f32 %v3669_v42, %v3659_v40  ;;  %v3673_v62 = vmul.f32 %v3669_v42, %v3661_v41  ;;  %v3649_v15 = vsel %vm3535_vm8, %v3648_v22, %v3645_v43 }
 0x99b   :  { %v3665_v46 = vrot.slane %v3649_v15, %v8646_v14 }
 0x99c   :  { %v3675_v63 = vmax.f32 %v3671_v44, 0.0  ;;  %v3677_v1 = vmax.f32 %v3673_v62, 0.0 }
 0x99d   :  { %v3670_v47 = vmul.f32 %v3665_v46, %v3658_v35  ;;  %v3672_v48 = vmul.f32 %v3665_v46, %v3660_v45  ;;  %v8231_v45 = vld [vmem:[#allocation2] ss:$8 sps:$4 sm:$0xff]   ;;  %v8236_v46 = vld [vmem:[#allocation2 + $0x14] ss:$8 sps:$4 sm:$0xff]  }
 0x99e   :  { %v9931_v13 = vpack.c.bf16 %v3677_v1, %v3675_v63  ;;  %v8234_v1 = vld [vmem:[#allocation2 + $0x10] ss:$8 sps:$4 sm:$0xff]  }
 0x99f   :  { %v3674_v23 = vmax.f32 %v3670_v47, 0.0  ;;  %v3676_v49 = vmax.f32 %v3672_v48, 0.0  ;;  %v8239_v48 = vld [vmem:[#allocation2 + $0x24] ss:$8 sps:$4 sm:$0xff]  }
 0x9a0   :  { %7161 = vmatprep.subr.msk.bf16.mxu1 %vm3701_vm10, %v9931_v13 }
 0x9a1   :  { %v3678_v2 = vpack.c.bf16 %v3676_v49, %v3674_v23 }
 0x9a3   :  { %v9936_v50 = vsel %vm3701_vm10, %v3678_v2, 0 }
 0x9a4   :  { %3709 = vmatpush1.bf16.msra.mxu1 %v9936_v50 }
 0x9a5   :  { %7170 = vmatprep.subr.msk.bf16.mxu1 %vm3701_vm10, %v9931_v13 }
 0x9a7   :  { %7162 = vmatmul.mubr.msk.bf16.vlgmr.msra.gmra.mrb[48].mxu1 %vm3694_vm11, %v8185_v12 }
 0x9a8   :  { %3815 = vmatpush1.bf16.msra.mxu1 %v9936_v50  ;;  %3750 = vmatprep.mubr.bf16.mxu1 %v8526_v0 }
 0x9a9   :  { %4046 = vmatprep.subr.bf16.mxu1 %v8191_v18  ;;  %v8237_v18 = vld [vmem:[#allocation2 + $0x20] ss:$8 sps:$4 sm:$0xff]  }
 0x9af   :  { %7163 = vmatmul.mubr.msk.bf16.gmra.mrb[52].mxu1 %vm3694_vm11, %v8186_v51  ;;  %v8242_v51 = vld [vmem:[#allocation2 + $0x34] ss:$8 sps:$4 sm:$0xff]  }
 0x9b0   :  { %3846 = vmatprep.mubr.bf16.mxu1 %v8526_v0 }
 0x9b7   :  { %7171 = vmatmul.mubr.msk.bf16.vlgmr.msra.gmra.mrb[56].mxu1 %vm3694_vm11, %v8187_v52  ;;  %v8240_v52 = vld [vmem:[#allocation2 + $0x30] ss:$8 sps:$4 sm:$0xff]  }
 0x9b8   :  { %3856 = vmatprep.mubr.bf16.mxu1 %v8526_v0  ;;  %4047 = vmatpush1.bf16.msra.mxu1 %v8189_v53  ;;  %v8245_v53 = vld [vmem:[#allocation2 + $0x44] ss:$8 sps:$4 sm:$0xff]  }
 0x9b9   :  { %4048 = vmatprep.subr.bf16.mxu1 %v8194_v54  ;;  %v8243_v54 = vld [vmem:[#allocation2 + $0x40] ss:$8 sps:$4 sm:$0xff]  }
 0x9bc   :  { %4049 = vmatpush1.bf16.msra.mxu1 %v8192_v56  ;;  %v8248_v56 = vld [vmem:[#allocation2 + $0x54] ss:$8 sps:$4 sm:$0xff]  }
 0x9bd   :  { %4050 = vmatprep.subr.bf16.mxu1 %v8197_v57  ;;  %v8246_v57 = vld [vmem:[#allocation2 + $0x50] ss:$8 sps:$4 sm:$0xff]  }
 0x9bf   :  { %7172 = vmatmul.mubr.msk.bf16.gmra.mrb[60].mxu1 %vm3694_vm11, %v8188_v58  ;;  %v8251_v58 = vld [vmem:[#allocation2 + $0x64] ss:$8 sps:$4 sm:$0xff]  }
 0x9c0   :  { %4051 = vmatpush1.bf16.msra.mxu1 %v8195_v59  ;;  %v8249_v59 = vld [vmem:[#allocation2 + $0x60] ss:$8 sps:$4 sm:$0xff]  }
 0x9c1   :  { %4052 = vmatprep.subr.bf16.mxu1 %v8200_v60  ;;  %v8254_v60 = vld [vmem:[#allocation2 + $0x74] ss:$8 sps:$4 sm:$0xff]  }
 0x9c4   :  { %4053 = vmatpush1.bf16.msra.mxu1 %v8198_v61  ;;  %v8252_v61 = vld [vmem:[#allocation2 + $0x70] ss:$8 sps:$4 sm:$0xff]  }
 0x9c5   :  { %4054 = vmatprep.subr.bf16.mxu1 %v8203_v3  ;;  %v8257_v3 = vld [vmem:[#allocation2 + $0x84] ss:$8 sps:$4 sm:$0xff]  }
 0x9c8   :  { %4055 = vmatpush1.bf16.msra.mxu1 %v8201_v4  ;;  %v8255_v4 = vld [vmem:[#allocation2 + $0x80] ss:$8 sps:$4 sm:$0xff]  }
 0x9c9   :  { %4056 = vmatprep.subr.bf16.mxu1 %v8206_v5  ;;  %v8260_v5 = vld [vmem:[#allocation2 + $0x94] ss:$8 sps:$4 sm:$0xff]  }
 0x9cc   :  { %4057 = vmatpush1.bf16.msra.mxu1 %v8204_v6  ;;  %v8258_v6 = vld [vmem:[#allocation2 + $0x90] ss:$8 sps:$4 sm:$0xff]  }
 0x9cd   :  { %4058 = vmatprep.subr.bf16.mxu1 %v8209_v7  ;;  %v8263_v7 = vld [vmem:[#allocation2 + $0xa4] ss:$8 sps:$4 sm:$0xff]  }
 0x9d0   :  { %4059 = vmatpush1.bf16.msra.mxu1 %v8207_v8  ;;  %v8261_v8 = vld [vmem:[#allocation2 + $0xa0] ss:$8 sps:$4 sm:$0xff]  }
 0x9d1   :  { %4060 = vmatprep.subr.bf16.mxu1 %v8212_v9  ;;  %v8266_v9 = vld [vmem:[#allocation2 + $0xb4] ss:$8 sps:$4 sm:$0xff]  }
 0x9d4   :  { %4061 = vmatpush1.bf16.msra.mxu1 %v8210_v16  ;;  %v8264_v16 = vld [vmem:[#allocation2 + $0xb0] ss:$8 sps:$4 sm:$0xff]  }
 0x9d5   :  { %4062 = vmatprep.subr.bf16.mxu1 %v8215_v21  ;;  %v8269_v21 = vld [vmem:[#allocation2 + $0xc4] ss:$8 sps:$4 sm:$0xff]  }
 0x9d8   :  { %4063 = vmatpush1.bf16.msra.mxu1 %v8213_v17  ;;  %v8267_v17 = vld [vmem:[#allocation2 + $0xc0] ss:$8 sps:$4 sm:$0xff]  }
 0x9d9   :  { %4064 = vmatprep.subr.bf16.mxu1 %v8218_v19  ;;  %v8272_v19 = vld [vmem:[#allocation2 + $0xd4] ss:$8 sps:$4 sm:$0xff]  }
 0x9dc   :  { %4065 = vmatpush1.bf16.msra.mxu1 %v8216_v55  ;;  %v8270_v55 = vld [vmem:[#allocation2 + $0xd0] ss:$8 sps:$4 sm:$0xff]  }
 0x9dd   :  { %4066 = vmatprep.subr.bf16.mxu1 %v8221_v25  ;;  %v8276_v25 = vld [vmem:[%s10693_s7 + $0x20] sm:$0xff]  }
 0x9e0   :  { %4067 = vmatpush1.bf16.msra.mxu1 %v8219_v24  ;;  %v8275_v24 = vld [vmem:[#allocation2 + $0x1c4] ss:$8 sps:$4 sm:$0xff]  }
 0x9e1   :  { %4068 = vmatprep.subr.bf16.mxu1 %v8224_v10  ;;  %v8273_v10 = vld [vmem:[#allocation2 + $0x1c0] ss:$8 sps:$4 sm:$0xff]  }
 0x9e4   :  { %4069 = vmatpush1.bf16.msra.mxu1 %v8222_v26  ;;  %v8279_v26 = vld [vmem:[#allocation2 + $0x1d4] ss:$8 sps:$4 sm:$0xff]  }
 0x9e5   :  { %4070 = vmatprep.subr.bf16.mxu1 %v8227_v11  ;;  %v8282_v11 = vld [vmem:[#allocation2 + $0x1e4] ss:$8 sps:$4 sm:$0xff]  }
 0x9e8   :  { %4071 = vmatpush1.bf16.msra.mxu1 %v8225_v27  ;;  %v8277_v27 = vld [vmem:[#allocation2 + $0x1d0] ss:$8 sps:$4 sm:$0xff]  }
 0x9e9   :  { %4072 = vmatprep.subr.bf16.mxu1 %v8230_v28  ;;  %v8283_v28 = vld [vmem:[%s10693_s7 + $0x28] sm:$0x3f]  }
 0x9ec   :  { %4073 = vmatpush1.bf16.msra.mxu1 %v8228_v29  ;;  %v8280_v29 = vld [vmem:[#allocation2 + $0x1e0] ss:$8 sps:$4 sm:$0xff]  }
 0x9ed   :  { %4245 = vmatprep.subr.bf16.mxu1 %v8233_v30  ;;  %v8286_v30 = vld [vmem:[#allocation2 + $0x1f4] ss:$8 sps:$4 sm:$0xff]  }
 0xa7a   :  { %v9961_v31 = vpop.f32.mrb[48].mxu1 }
 0xa7b   :  { %v3744_v32 = vpop.f32.mrb[49].mxu1 }
 0xa7c   :  { %v9963_v33 = vpop.f32.mrb[50].mxu1 }
 0xa7d   :  { %v3761_v34 = vpack.c.bf16 %v9963_v33, %v9961_v31  ;;  %v3748_v36 = vpop.f32.mrb[51].mxu1  ;;  %v8284_v31 = vld [vmem:[#allocation2 + $0x1f0] ss:$8 sps:$4 sm:$0xff]   ;;  %v8287_v33 = vld [vmem:[#allocation2 + $0x200] ss:$8 sps:$4 sm:$0xff]  }
 0xa7e   :  { %v3762_v37 = vpack.c.bf16 %v3748_v36, %v3744_v32  ;;  %v8289_v32 = vld [vmem:[#allocation2 + $0x204] ss:$8 sps:$4 sm:$0xff]   ;;  %v8290_v36 = vld [vmem:[#allocation2 + $0x210] ss:$8 sps:$4 sm:$0xff]  }
 0xa82   :  { %v9967_v38 = vpop.f32.mrb[52].mxu1 }
 0xa83   :  { %v9969_v20 = vpop.f32.mrb[53].mxu1 }
 0xa84   :  { %v9971_v39 = vpop.f32.mrb[54].mxu1 }
 0xa85   :  { %v3763_v22 = vpack.c.bf16 %v9971_v39, %v9967_v38  ;;  %v9975_v40 = vpop.f32.mrb[55].mxu1  ;;  %v8293_v38 = vld [vmem:[#allocation2 + $0x220] ss:$8 sps:$4 sm:$0xff]   ;;  %v8296_v39 = vld [vmem:[#allocation2 + $0x230] ss:$8 sps:$4 sm:$0xff]  }
 0xa86   :  { %v3764_v41 = vpack.c.bf16 %v9975_v40, %v9969_v20  ;;  %v8298_v20 = vld [vmem:[#allocation2 + $0x234] ss:$8 sps:$4 sm:$0xff]   ;;  %v8299_v40 = vld [vmem:[#allocation2 + $0x240] ss:$8 sps:$4 sm:$0xff]  }
 0xa8a   :  { %v3848_v42 = vpop.f32.mrb[56].mxu1 }
 0xa8b   :  { %v3850_v43 = vpop.f32.mrb[57].mxu1 }
 0xa8c   :  { %v3852_v44 = vpop.f32.mrb[58].mxu1 }
 0xa8d   :  { %v3867_v62 = vpack.c.bf16 %v3852_v44, %v3848_v42  ;;  %v3854_v15 = vpop.f32.mrb[59].mxu1  ;;  %v8302_v42 = vld [vmem:[#allocation2 + $0x250] ss:$8 sps:$4 sm:$0xff]   ;;  %v8305_v44 = vld [vmem:[#allocation2 + $0x260] ss:$8 sps:$4 sm:$0xff]  }
 0xa8e   :  { %v3868_v35 = vpack.c.bf16 %v3854_v15, %v3850_v43  ;;  %v8307_v43 = vld [vmem:[#allocation2 + $0x264] ss:$8 sps:$4 sm:$0xff]   ;;  %v8308_v15 = vld [vmem:[#allocation2 + $0x270] ss:$8 sps:$4 sm:$0xff]  }
 0xa90   :  { %7201 = vmatprep.mubr.msk.bf16.mxu1 %vm3535_vm8, %v3868_v35  ;;  %v8313_v35 = vld [vmem:[#allocation2 + $0x284] ss:$8 sps:$4 sm:$0xff]  }
 0xa91   :  { %4079 = vmatmul.mubr.bf16.vlgmr.msra.gmra.mrb[64].mxu1 %v3867_v62  ;;  %v8310_v62 = vld [vmem:[#allocation2 + $0x274] ss:$8 sps:$4 sm:$0xff]  }
 0xa92   :  { %4246 = vmatpush1.bf16.msra.mxu1 %v8231_v45  ;;  %v3858_v63 = vpop.f32.mrb[60].mxu1  ;;  %v8311_v45 = vld [vmem:[#allocation2 + $0x280] ss:$8 sps:$4 sm:$0xff]  }
 0xa93   :  { %v3860_v47 = vpop.f32.mrb[61].mxu1  ;;  %4247 = vmatprep.subr.bf16.mxu1 %v8236_v46  ;;  %v8316_v46 = vld [vmem:[#allocation2 + $0x294] ss:$8 sps:$4 sm:$0xff]  }
 0xa94   :  { %v3862_v23 = vpop.f32.mrb[62].mxu1 }
 0xa95   :  { %v3869_v49 = vpack.c.bf16 %v3862_v23, %v3858_v63  ;;  %v3864_v2 = vpop.f32.mrb[63].mxu1  ;;  %v8314_v63 = vld [vmem:[#allocation2 + $0x290] ss:$8 sps:$4 sm:$0xff]  }
 0xa96   :  { %v3870_v12 = vpack.c.bf16 %v3864_v2, %v3860_v47  ;;  %4248 = vmatpush1.bf16.msra.mxu1 %v8234_v1 }
 0xa97   :  { %4249 = vmatprep.subr.bf16.mxu1 %v8239_v48 }
 0xa98   :  { %7202 = vmatprep.mubr.msk.bf16.mxu1 %vm3535_vm8, %v3870_v12  ;;  %v8321_v12 = vld [vmem:[#allocation2 + $0x2a4] ss:$8 sps:$4 sm:$0xff]  }
 0xa99   :  { %4089 = vmatmul.mubr.bf16.gmra.mrb[68].mxu1 %v3869_v49 }
 0xa9a   :  { %4250 = vmatpush1.bf16.msra.mxu1 %v8237_v18  ;;  %7231 = vmatprep.mubr.msk.bf16.mxu1 %vm3535_vm8, %v3762_v37  ;;  %v8295_v37 = vld [vmem:[#allocation2 + $0x224] ss:$8 sps:$4 sm:$0xff]  }
 0xa9b   :  { %4251 = vmatprep.subr.bf16.mxu1 %v8242_v51 }
 0xa9e   :  { %4252 = vmatpush1.bf16.msra.mxu1 %v8240_v52 }
 0xa9f   :  { %4253 = vmatprep.subr.bf16.mxu1 %v8245_v53 }
 0xaa2   :  { %4254 = vmatpush1.bf16.msra.mxu1 %v8243_v54 }
 0xaa3   :  { %4255 = vmatprep.subr.bf16.mxu1 %v8248_v56 }
 0xaa6   :  { %4256 = vmatpush1.bf16.msra.mxu1 %v8246_v57  ;;  %v8319_v57 = vld [vmem:[#allocation2 + $0x2a0] ss:$8 sps:$4 sm:$0xff]  }
 0xaa7   :  { %4257 = vmatprep.subr.bf16.mxu1 %v8251_v58  ;;  %v8324_v58 = vld [vmem:[#allocation2 + $0x2b4] ss:$8 sps:$4 sm:$0xff]  }
 0xaaa   :  { %4258 = vmatpush1.bf16.msra.mxu1 %v8249_v59  ;;  %v8327_v59 = vld [vmem:[#allocation2 + $0x2c4] ss:$8 sps:$4 sm:$0xff]  }
 0xaab   :  { %4259 = vmatprep.subr.bf16.mxu1 %v8254_v60  ;;  %v8318_v60 = vld [vmem:[%s10693_s7 + $0x38] sm:$0x3f]  }
 0xaae   :  { %4260 = vmatpush1.bf16.msra.mxu1 %v8252_v61  ;;  %v8325_v61 = vld [vmem:[#allocation2 + $0x2c0] ss:$8 sps:$4 sm:$0xff]  }
 0xaaf   :  { %4261 = vmatprep.subr.bf16.mxu1 %v8257_v3  ;;  %v8330_v3 = vld [vmem:[#allocation2 + $0x2d4] ss:$8 sps:$4 sm:$0xff]  }
 0xab2   :  { %4262 = vmatpush1.bf16.msra.mxu1 %v8255_v4  ;;  %v8328_v4 = vld [vmem:[#allocation2 + $0x2d0] ss:$8 sps:$4 sm:$0xff]  }
 0xab3   :  { %4263 = vmatprep.subr.bf16.mxu1 %v8260_v5  ;;  %v8333_v5 = vld [vmem:[#allocation2 + $0x2e4] ss:$8 sps:$4 sm:$0xff]  }
 0xab6   :  { %4264 = vmatpush1.bf16.msra.mxu1 %v8258_v6  ;;  %v8331_v6 = vld [vmem:[#allocation2 + $0x2e0] ss:$8 sps:$4 sm:$0xff]  }
 0xab7   :  { %4265 = vmatprep.subr.bf16.mxu1 %v8263_v7  ;;  %v8336_v7 = vld [vmem:[#allocation2 + $0x2f4] ss:$8 sps:$4 sm:$0xff]  }
 0xaba   :  { %4266 = vmatpush1.bf16.msra.mxu1 %v8261_v8  ;;  %v8334_v8 = vld [vmem:[#allocation2 + $0x2f0] ss:$8 sps:$4 sm:$0xff]  }
 0xabb   :  { %4267 = vmatprep.subr.bf16.mxu1 %v8266_v9  ;;  %v8339_v9 = vld [vmem:[#allocation2 + $0x304] ss:$8 sps:$4 sm:$0xff]  }
 0xabe   :  { %4268 = vmatpush1.bf16.msra.mxu1 %v8264_v16  ;;  %v8337_v16 = vld [vmem:[#allocation2 + $0x300] ss:$8 sps:$4 sm:$0xff]  }
 0xabf   :  { %4269 = vmatprep.subr.bf16.mxu1 %v8269_v21  ;;  %v8342_v21 = vld [vmem:[#allocation2 + $0x314] ss:$8 sps:$4 sm:$0xff]  }
 0xac2   :  { %4270 = vmatpush1.bf16.msra.mxu1 %v8267_v17  ;;  %v8340_v17 = vld [vmem:[#allocation2 + $0x310] ss:$8 sps:$4 sm:$0xff]  }
 0xac3   :  { %4271 = vmatprep.subr.bf16.mxu1 %v8272_v19  ;;  %v8345_v19 = vld [vmem:[#allocation2 + $0x324] ss:$8 sps:$4 sm:$0xff]  }
 0xac6   :  { %4272 = vmatpush1.bf16.msra.mxu1 %v8270_v55  ;;  %v8343_v55 = vld [vmem:[#allocation2 + $0x320] ss:$8 sps:$4 sm:$0xff]  }
 0xac7   :  { %7239 = vmatprep.subr.msk.bf16.mxu1 %vm3701_vm10, %v9931_v13 }
 0xac9   :  { %4278 = vmatmul.mubr.bf16.vlgmr.msra.gmra.mrb[64].mxu1 %v3761_v34  ;;  %v8292_v34 = vld [vmem:[#allocation2 + $0x214] ss:$8 sps:$4 sm:$0xff]  }
 0xaca   :  { %7232 = vmatprep.mubr.msk.bf16.mxu1 %vm3535_vm8, %v3764_v41  ;;  %4320 = vmatpush1.bf16.msra.mxu1 %v9936_v50  ;;  %v8304_v41 = vld [vmem:[#allocation2 + $0x254] ss:$8 sps:$4 sm:$0xff]  }
 0xacb   :  { %4551 = vmatprep.subr.bf16.mxu1 %v8275_v24  ;;  %v8348_v24 = vld [vmem:[#allocation2 + $0x334] ss:$8 sps:$4 sm:$0xff]  }
 0xad1   :  { %4288 = vmatmul.mubr.bf16.gmra.mrb[68].mxu1 %v3763_v22  ;;  %v8301_v22 = vld [vmem:[#allocation2 + $0x244] ss:$8 sps:$4 sm:$0xff]  }
 0xad2   :  { %4351 = vmatprep.mubr.bf16.mxu1 %v8526_v0 }
 0xad9   :  { %7240 = vmatmul.mubr.msk.bf16.vlgmr.msra.gmra.mrb[72].mxu1 %vm3694_vm11, %v8276_v25  ;;  %v8346_v25 = vld [vmem:[#allocation2 + $0x330] ss:$8 sps:$4 sm:$0xff]  }
 0xada   :  { %4552 = vmatpush1.bf16.msra.mxu1 %v8273_v10  ;;  %4361 = vmatprep.mubr.bf16.mxu1 %v8526_v0  ;;  %v8351_v10 = vld [vmem:[#allocation2 + $0x344] ss:$8 sps:$4 sm:$0xff]  }
 0xadb   :  { %4553 = vmatprep.subr.bf16.mxu1 %v8279_v26  ;;  %v8349_v26 = vld [vmem:[#allocation2 + $0x340] ss:$8 sps:$4 sm:$0xff]  }
 0xade   :  { %4554 = vmatpush1.bf16.msra.mxu1 %v8277_v27  ;;  %v8354_v27 = vld [vmem:[#allocation2 + $0x354] ss:$8 sps:$4 sm:$0xff]  }
 0xadf   :  { %4555 = vmatprep.subr.bf16.mxu1 %v8282_v11  ;;  %v8352_v11 = vld [vmem:[#allocation2 + $0x350] ss:$8 sps:$4 sm:$0xff]  }
 0xae1   :  { %7241 = vmatmul.mubr.msk.bf16.gmra.mrb[76].mxu1 %vm3694_vm11, %v8283_v28  ;;  %v8357_v28 = vld [vmem:[#allocation2 + $0x364] ss:$8 sps:$4 sm:$0xff]  }
 0xae2   :  { %4556 = vmatpush1.bf16.msra.mxu1 %v8280_v29  ;;  %v8355_v29 = vld [vmem:[#allocation2 + $0x360] ss:$8 sps:$4 sm:$0xff]  }
 0xae3   :  { %4557 = vmatprep.subr.bf16.mxu1 %v8286_v30  ;;  %v8360_v30 = vld [vmem:[#allocation2 + $0x374] ss:$8 sps:$4 sm:$0xff]  }
 0xae6   :  { %4558 = vmatpush1.bf16.msra.mxu1 %v8284_v31  ;;  %v8358_v31 = vld [vmem:[#allocation2 + $0x370] ss:$8 sps:$4 sm:$0xff]  }
 0xae7   :  { %4559 = vmatprep.subr.bf16.mxu1 %v8289_v32 }
 0xaea   :  { %4560 = vmatpush1.bf16.msra.mxu1 %v8287_v33 }
 0xaeb   :  { %4561 = vmatprep.subr.bf16.mxu1 %v8292_v34 }
 0xaee   :  { %4562 = vmatpush1.bf16.msra.mxu1 %v8290_v36 }
 0xaef   :  { %4563 = vmatprep.subr.bf16.mxu1 %v8295_v37 }
 0xaf2   :  { %4564 = vmatpush1.bf16.msra.mxu1 %v8293_v38 }
 0xaf3   :  { %4565 = vmatprep.subr.bf16.mxu1 %v8298_v20 }
 0xaf6   :  { %4566 = vmatpush1.bf16.msra.mxu1 %v8296_v39 }
 0xaf7   :  { %4567 = vmatprep.subr.bf16.mxu1 %v8301_v22 }
 0xafa   :  { %4568 = vmatpush1.bf16.msra.mxu1 %v8299_v40 }
 0xafb   :  { %4569 = vmatprep.subr.bf16.mxu1 %v8304_v41 }
 0xafe   :  { %4570 = vmatpush1.bf16.msra.mxu1 %v8302_v42 }
 0xaff   :  { %4571 = vmatprep.subr.bf16.mxu1 %v8307_v43 }
 0xb02   :  { %4572 = vmatpush1.bf16.msra.mxu1 %v8305_v44 }
 0xb03   :  { %4573 = vmatprep.subr.bf16.mxu1 %v8310_v62 }
 0xb06   :  { %4574 = vmatpush1.bf16.msra.mxu1 %v8308_v15 }
 0xb07   :  { %4575 = vmatprep.subr.bf16.mxu1 %v8313_v35 }
 0xb0a   :  { %4576 = vmatpush1.bf16.msra.mxu1 %v8311_v45 }
 0xb0b   :  { %4577 = vmatprep.subr.bf16.mxu1 %v8316_v46 }
 0xb0e   :  { %4578 = vmatpush1.bf16.msra.mxu1 %v8314_v63 }
 0xb0f   :  { %7278 = vmatprep.subr.msk.bf16.mxu1 %vm3701_vm10, %v9931_v13  ;;  %v8317_v13 = vld [vmem:[%s10693_s7 + $0x30] sm:$0xff]   ;;  %s8530_s7 = smov 112  }
 0xbac   :  { %v4353_v1 = vpop.f32.mrb[72].mxu1 }
 0xbad   :  { %v4355_v47 = vpop.f32.mrb[73].mxu1 }
 0xbae   :  { %v4357_v48 = vpop.f32.mrb[74].mxu1 }
 0xbaf   :  { %v4372_v23 = vpack.c.bf16 %v4357_v48, %v4353_v1  ;;  %v4359_v49 = vpop.f32.mrb[75].mxu1 }
 0xbb0   :  { %v4373_v2 = vpack.c.bf16 %v4359_v49, %v4355_v47 }
 0xbb2   :  { %7270 = vmatprep.mubr.msk.bf16.mxu1 %vm3535_vm8, %v4373_v2 }
 0xbb3   :  { %4584 = vmatmul.mubr.bf16.vlgmr.msra.gmra.mrb[64].mxu1 %v4372_v23 }
 0xbb4   :  { %4634 = vmatpush1.bf16.msra.mxu1 %v9936_v50  ;;  %v4363_v18 = vpop.f32.mrb[76].mxu1  ;;  %v8322_v50 = vld [vmem:[#allocation2 + $0x2b0] ss:$8 sps:$4 sm:$0xff]  }
 0xbb5   :  { %v4365_v51 = vpop.f32.mrb[77].mxu1  ;;  %4865 = vmatprep.subr.bf16.mxu1 %v8321_v12 }
 0xbb6   :  { %v4367_v52 = vpop.f32.mrb[78].mxu1 }
 0xbb7   :  { %v4374_v53 = vpack.c.bf16 %v4367_v52, %v4363_v18  ;;  %v4369_v54 = vpop.f32.mrb[79].mxu1 }
 0xbb8   :  { %v4375_v56 = vpack.c.bf16 %v4369_v54, %v4365_v51 }
 0xbba   :  { %7271 = vmatprep.mubr.msk.bf16.mxu1 %vm3535_vm8, %v4375_v56 }
 0xbbb   :  { %4594 = vmatmul.mubr.bf16.gmra.mrb[68].mxu1 %v4374_v53 }
 0xbbc   :  { %4665 = vmatprep.mubr.bf16.mxu1 %v8526_v0 }
 0xbc3   :  { %7279 = vmatmul.mubr.msk.bf16.vlgmr.msra.gmra.mrb[80].mxu1 %vm3694_vm11, %v8317_v13 }
 0xbc4   :  { %4675 = vmatprep.mubr.bf16.mxu1 %v8526_v0  ;;  %4866 = vmatpush1.bf16.msra.mxu1 %v8319_v57 }
 0xbc5   :  { %4867 = vmatprep.subr.bf16.mxu1 %v8324_v58 }
 0xbc8   :  { %4868 = vmatpush1.bf16.msra.mxu1 %v8322_v50 }
 0xbc9   :  { %4869 = vmatprep.subr.bf16.mxu1 %v8327_v59 }
 0xbcb   :  { %7280 = vmatmul.mubr.msk.bf16.gmra.mrb[84].mxu1 %vm3694_vm11, %v8318_v60 }
 0xbcc   :  { %4870 = vmatpush1.bf16.msra.mxu1 %v8325_v61 }
 0xbcd   :  { %4871 = vmatprep.subr.bf16.mxu1 %v8330_v3 }
 0xbd0   :  { %4872 = vmatpush1.bf16.msra.mxu1 %v8328_v4 }
 0xbd1   :  { %4873 = vmatprep.subr.bf16.mxu1 %v8333_v5 }
 0xbd4   :  { %4874 = vmatpush1.bf16.msra.mxu1 %v8331_v6 }
 0xbd5   :  { %4875 = vmatprep.subr.bf16.mxu1 %v8336_v7 }
 0xbd8   :  { %4876 = vmatpush1.bf16.msra.mxu1 %v8334_v8 }
 0xbd9   :  { %4877 = vmatprep.subr.bf16.mxu1 %v8339_v9 }
 0xbdc   :  { %4878 = vmatpush1.bf16.msra.mxu1 %v8337_v16 }
 0xbdd   :  { %4879 = vmatprep.subr.bf16.mxu1 %v8342_v21 }
 0xbe0   :  { %4880 = vmatpush1.bf16.msra.mxu1 %v8340_v17 }
 0xbe1   :  { %4881 = vmatprep.subr.bf16.mxu1 %v8345_v19 }
 0xbe4   :  { %4882 = vmatpush1.bf16.msra.mxu1 %v8343_v55 }
 0xbe5   :  { %4883 = vmatprep.subr.bf16.mxu1 %v8348_v24 }
 0xbe8   :  { %4884 = vmatpush1.bf16.msra.mxu1 %v8346_v25 }
 0xbe9   :  { %4885 = vmatprep.subr.bf16.mxu1 %v8351_v10 }
 0xbec   :  { %4886 = vmatpush1.bf16.msra.mxu1 %v8349_v26 }
 0xbed   :  { %4887 = vmatprep.subr.bf16.mxu1 %v8354_v27 }
 0xbf0   :  { %4888 = vmatpush1.bf16.msra.mxu1 %v8352_v11 }
 0xbf1   :  { %4889 = vmatprep.subr.bf16.mxu1 %v8357_v28 }
 0xbf4   :  { %4890 = vmatpush1.bf16.msra.mxu1 %v8355_v29 }
 0xbf5   :  { %4891 = vmatprep.subr.bf16.mxu1 %v8360_v30 }
 0xbf8   :  { %4892 = vmatpush1.bf16.msra.mxu1 %v8358_v31 }
 0xc96   :  { %v4667_v32 = vpop.f32.mrb[80].mxu1 }
 0xc97   :  { %v4669_v33 = vpop.f32.mrb[81].mxu1 }
 0xc98   :  { %v4671_v34 = vpop.f32.mrb[82].mxu1 }
 0xc99   :  { %v4686_v36 = vpack.c.bf16 %v4671_v34, %v4667_v32  ;;  %v4673_v37 = vpop.f32.mrb[83].mxu1 }
 0xc9a   :  { %v4687_v38 = vpack.c.bf16 %v4673_v37, %v4669_v33 }
 0xc9c   :  { %7309 = vmatprep.mubr.msk.bf16.mxu1 %vm3535_vm8, %v4687_v38 }
 0xc9d   :  { %4898 = vmatmul.mubr.bf16.vlgmr.msra.gmra.mrb[64].mxu1 %v4686_v36 }
 0xc9e   :  { %v4677_v20 = vpop.f32.mrb[84].mxu1 }
 0xc9f   :  { %v4679_v39 = vpop.f32.mrb[85].mxu1 }
 0xca0   :  { %v4681_v22 = vpop.f32.mrb[86].mxu1 }
 0xca1   :  { %v4688_v40 = vpack.c.bf16 %v4681_v22, %v4677_v20  ;;  %v4683_v41 = vpop.f32.mrb[87].mxu1 }
 0xca2   :  { %v4689_v42 = vpack.c.bf16 %v4683_v41, %v4679_v39 }
 0xca4   :  { %7310 = vmatprep.mubr.msk.bf16.mxu1 %vm3535_vm8, %v4689_v42 }
 0xca5   :  { %4908 = vmatmul.mubr.bf16.gmra.mrb[68].mxu1 %v4688_v40 }
 0xca6   :  { %5421 = vmatprep.mubr.bf16.mxu1 %v8526_v0 }
 0xd70   :  { %v10023_v43 = vpop.f32.mrb[64].mxu1 }
 0xd71   :  { %v10025_v44 = vpop.f32.mrb[65].mxu1  ;;  %v4953_v35 = vmul.f32 %v10023_v43, %v10023_v43 }
 0xd72   :  { %v4954_v62 = vmul.f32 %v10025_v44, %v10025_v44  ;;  %v10029_v15 = vpop.f32.mrb[66].mxu1  ;;  %v4936_v1 = vsel %vm3535_vm8, %v10025_v44, 0.0 }
 0xd73   :  { %v4926_v45 = vadd.f32 %v10029_v15, %v10023_v43  ;;  %v4955_v46 = vmul.f32 %v10029_v15, %v10029_v15  ;;  %v10037_v63 = vpop.f32.mrb[67].mxu1 }
 0xd74   :  { %v4937_v47 = vsel %vm3535_vm8, %v10037_v63, 0.0  ;;  %v4956_v48 = vmul.f32 %v10037_v63, %v10037_v63  ;;  %v4971_v2 = vsel %vm3535_vm8, %v4954_v62, 0.0 }
 0xd75   :  { %v4961_v23 = vadd.f32 %v4955_v46, %v4953_v35  ;;  %v4938_v49 = vadd.f32 %v4937_v47, %v4936_v1 }
 0xd76   :  { %v4972_v12 = vsel %vm3535_vm8, %v4956_v48, 0.0 }
 0xd77   :  { %v4973_v18 = vadd.f32 %v4972_v12, %v4971_v2 }
 0xd78   :  { %v10047_v51 = vpop.f32.mrb[68].mxu1 }
 0xd79   :  { %v4927_v52 = vadd.f32 %v4926_v45, %v10047_v51  ;;  %v4957_v53 = vmul.f32 %v10047_v51, %v10047_v51  ;;  %v10052_v54 = vpop.f32.mrb[69].mxu1 }
 0xd7a   :  { %v4939_v56 = vsel %vm3535_vm8, %v10052_v54, 0.0  ;;  %v4958_v13 = vmul.f32 %v10052_v54, %v10052_v54  ;;  %v10058_v57 = vpop.f32.mrb[70].mxu1 }
 0xd7b   :  { %v4962_v58 = vadd.f32 %v4961_v23, %v4957_v53  ;;  %v4940_v50 = vadd.f32 %v4939_v56, %v4938_v49  ;;  %v4928_v59 = vsel %vm2651_vm5, %v10058_v57, 0.0  ;;  %v4959_v60 = vmul.f32 %v10058_v57, %v10058_v57  ;;  %v10064_v61 = vpop.f32.mrb[71].mxu1 }
 0xd7c   :  { %v4974_v3 = vsel %vm3535_vm8, %v4958_v13, 0.0  ;;  %v4929_v4 = vadd.f32 %v4928_v59, %v4927_v52  ;;  %v4942_v5 = vsel %vm4941_vm12, %v10064_v61, 0.0  ;;  %v4960_v6 = vmul.f32 %v10064_v61, %v10064_v61 }
 0xd7d   :  { %v4975_v7 = vadd.f32 %v4974_v3, %v4973_v18  ;;  %v4963_v8 = vsel %vm2651_vm5, %v4959_v60, 0.0  ;;  %v4943_v9 = vadd.f32 %v4942_v5, %v4940_v50 }
 0xd7e   :  { %v4930_v16 = vrot.slane %v4929_v4, 4  ;;  %v4964_v21 = vadd.f32 %v4963_v8, %v4962_v58  ;;  %v4976_v17 = vsel %vm4941_vm12, %v4960_v6, 0.0 }
 0xd7f   :  { %v4977_v19 = vadd.f32 %v4976_v17, %v4975_v7  ;;  %v4944_v34 = vrot.slane %v4943_v9, 4 }
 0xd80   :  { %v4931_v55 = vadd.f32 %v4930_v16, %v4929_v4  ;;  %v4965_v24 = vrot.slane %v4964_v21, 4 }
 0xd81   :  { %v4978_v36 = vrot.slane %v4977_v19, 4  ;;  %v4945_v37 = vadd.f32 %v4944_v34, %v4943_v9 }
 0xd82   :  { %v4932_v25 = vrot.slane %v4931_v55, 2  ;;  %v4966_v10 = vadd.f32 %v4965_v24, %v4964_v21 }
 0xd83   :  { %v4979_v38 = vadd.f32 %v4978_v36, %v4977_v19  ;;  %v4946_v20 = vrot.slane %v4945_v37, 2 }
 0xd84   :  { %v4933_v26 = vadd.f32 %v4932_v25, %v4931_v55  ;;  %v4967_v27 = vrot.slane %v4966_v10, 2 }
 0xd85   :  { %v4980_v39 = vrot.slane %v4979_v38, 2  ;;  %v4947_v22 = vadd.f32 %v4946_v20, %v4945_v37 }
 0xd86   :  { %v4934_v11 = vrot.slane %v4933_v26, 1  ;;  %v4968_v28 = vadd.f32 %v4967_v27, %v4966_v10 }
 0xd87   :  { %v4981_v40 = vadd.f32 %v4980_v39, %v4979_v38  ;;  %v4948_v41 = vrot.slane %v4947_v22, 1 }
 0xd88   :  { %v4935_v29 = vadd.f32 %v4934_v11, %v4933_v26  ;;  %v4969_v30 = vrot.slane %v4968_v28, 1 }
 0xd89   :  { %v4982_v42 = vrot.slane %v4981_v40, 1  ;;  %v4949_v62 = vadd.f32 %v4948_v41, %v4947_v22 }
 0xd8a   :  { %v4951_v31 = vmul.f32 0.035714287, %v4935_v29  ;;  %v4970_v32 = vadd.f32 %v4969_v30, %v4968_v28 }
 0xd8b   :  { %v4983_v35 = vadd.f32 %v4982_v42, %v4981_v40  ;;  %v4952_v45 = vmul.f32 0.035714287, %v4949_v62 }
 0xd8c   :  { %v4984_v33 = vmul.f32 0.035714287, %v4970_v32  ;;  %4987 = vrot.lane.b32.xlu0 %v4951_v31, %s8530_s7 }
 0xd8d   :  { %v4985_v46 = vmul.f32 0.035714287, %v4983_v35 }
 0xd8e   :  { %4992 = vrot.lane.b32.xlu1 %v4984_v33, %s8530_s7 }
 0xd90   :  { %4996 = vrot.lane.b32.xlu0 %v4951_v31, %s8528_s6 }
 0xd92   :  { %5000 = vrot.lane.b32.xlu1 %v4984_v33, %s8528_s6 }
 0xd94   :  { %5004 = vrot.lane.b32.xlu0 %v4951_v31, %s8531_s22 }
 0xd96   :  { %5008 = vrot.lane.b32.xlu1 %v4984_v33, %s8531_s22 }
 0xd98   :  { %5012 = vrot.lane.b32.xlu0 %v4951_v31, %s8527_s4 }
 0xd9a   :  { %5016 = vrot.lane.b32.xlu1 %v4984_v33, %s8527_s4 }
 0xd9c   :  { %5020 = vrot.lane.b32.xlu0 %v4951_v31, %s8532_s23 }
 0xd9e   :  { %5024 = vrot.lane.b32.xlu1 %v4984_v33, %s8532_s23 }
 0xda0   :  { %5028 = vrot.lane.b32.xlu0 %v4951_v31, %s8529_s30 }
 0xda2   :  { %5032 = vrot.lane.b32.xlu1 %v4984_v33, %s8529_s30 }
 0xda4   :  { %5036 = vrot.lane.b32.xlu0 %v4951_v31, %s8533_s24 }
 0xda6   :  { %5040 = vrot.lane.b32.xlu1 %v4984_v33, %s8533_s24 }
 0xda8   :  { %5047 = vrot.lane.b32.xlu0 %v4952_v45, %s8530_s7 }
 0xdaa   :  { %5052 = vrot.lane.b32.xlu1 %v4985_v46, %s8530_s7 }
 0xdac   :  { %5056 = vrot.lane.b32.xlu0 %v4952_v45, %s8528_s6 }
 0xdae   :  { %5060 = vrot.lane.b32.xlu1 %v4985_v46, %s8528_s6 }
 0xdb0   :  { %5064 = vrot.lane.b32.xlu0 %v4952_v45, %s8531_s22 }
 0xdb2   :  { %5068 = vrot.lane.b32.xlu1 %v4985_v46, %s8531_s22 }
 0xdb4   :  { %5072 = vrot.lane.b32.xlu0 %v4952_v45, %s8527_s4 }
 0xdb6   :  { %5076 = vrot.lane.b32.xlu1 %v4985_v46, %s8527_s4 }
 0xdb8   :  { %5080 = vrot.lane.b32.xlu0 %v4952_v45, %s8532_s23 }
 0xdba   :  { %5084 = vrot.lane.b32.xlu1 %v4985_v46, %s8532_s23 }
 0xdfe   :  { %v4988_v1 = vpop.permute.xlu0 %4987 }
 0xdff   :  { %v4990_v53 = vadd.f32 %v4988_v1, %v4951_v31 }
 0xe00   :  { %v4993_v47 = vpop.permute.xlu1 %4992 }
 0xe01   :  { %v4995_v13 = vadd.f32 %v4993_v47, %v4984_v33 }
 0xe02   :  { %v4997_v48 = vpop.permute.xlu0 %4996 }
 0xe03   :  { %v4999_v58 = vadd.f32 %v4997_v48, %v4990_v53 }
 0xe04   :  { %v5001_v23 = vpop.permute.xlu1 %5000 }
 0xe05   :  { %v5003_v59 = vadd.f32 %v5001_v23, %v4995_v13 }
 0xe06   :  { %v5005_v49 = vpop.permute.xlu0 %5004 }
 0xe07   :  { %v5007_v60 = vadd.f32 %v5005_v49, %v4999_v58 }
 0xe08   :  { %v5009_v2 = vpop.permute.xlu1 %5008 }
 0xe09   :  { %v5011_v4 = vadd.f32 %v5009_v2, %v5003_v59 }
 0xe0a   :  { %v5013_v12 = vpop.permute.xlu0 %5012 }
 0xe0b   :  { %v5015_v5 = vadd.f32 %v5013_v12, %v5007_v60 }
 0xe0c   :  { %v5017_v18 = vpop.permute.xlu1 %5016 }
 0xe0d   :  { %v5019_v7 = vadd.f32 %v5017_v18, %v5011_v4 }
 0xe0e   :  { %v5021_v52 = vpop.permute.xlu0 %5020 }
 0xe0f   :  { %v5023_v8 = vadd.f32 %v5021_v52, %v5015_v5 }
 0xe10   :  { %v5025_v56 = vpop.permute.xlu1 %5024 }
 0xe11   :  { %v5027_v16 = vadd.f32 %v5025_v56, %v5019_v7 }
 0xe12   :  { %v5029_v50 = vpop.permute.xlu0 %5028 }
 0xe13   :  { %v5031_v21 = vadd.f32 %v5029_v50, %v5023_v8 }
 0xe14   :  { %v5033_v3 = vpop.permute.xlu1 %5032 }
 0xe15   :  { %v5035_v19 = vadd.f32 %v5033_v3, %v5027_v16 }
 0xe16   :  { %v5037_v6 = vpop.permute.xlu0 %5036 }
 0xe17   :  { %v5039_v55 = vadd.f32 %v5037_v6, %v5031_v21 }
 0xe18   :  { %v5041_v9 = vpop.permute.xlu1 %5040 }
 0xe19   :  { %v5043_v25 = vadd.f32 %v5041_v9, %v5035_v19  ;;  %v5044_v26 = vadd.f32 %v5039_v55, %v4952_v45 }
 0xe1a   :  { %v5048_v17 = vpop.permute.xlu0 %5047 }
 0xe1b   :  { %v5045_v11 = vadd.f32 %v5043_v25, %v4985_v46  ;;  %v5050_v29 = vadd.f32 %v5048_v17, %v5044_v26 }
 0xe1c   :  { %v5053_v24 = vpop.permute.xlu1 %5052 }
 0xe1d   :  { %v5055_v31 = vadd.f32 %v5053_v24, %v5045_v11 }
 0xe1e   :  { %v5057_v10 = vpop.permute.xlu0 %5056 }
 0xe1f   :  { %v5059_v32 = vadd.f32 %v5057_v10, %v5050_v29 }
 0xe20   :  { %v5061_v27 = vpop.permute.xlu1 %5060 }
 0xe21   :  { %v5063_v34 = vadd.f32 %v5061_v27, %v5055_v31 }
 0xe22   :  { %v5065_v28 = vpop.permute.xlu0 %5064 }
 0xe23   :  { %v5067_v36 = vadd.f32 %v5065_v28, %v5059_v32 }
 0xe24   :  { %v5069_v30 = vpop.permute.xlu1 %5068 }
 0xe25   :  { %v5071_v38 = vadd.f32 %v5069_v30, %v5063_v34 }
 0xe26   :  { %v5073_v33 = vpop.permute.xlu0 %5072 }
 0xe27   :  { %v5075_v20 = vadd.f32 %v5073_v33, %v5067_v36 }
 0xe28   :  { %v5077_v37 = vpop.permute.xlu1 %5076 }
 0xe29   :  { %v5079_v22 = vadd.f32 %v5077_v37, %v5071_v38 }
 0xe2a   :  { %v5081_v39 = vpop.permute.xlu0 %5080 }
 0xe2b   :  { %v5083_v40 = vadd.f32 %v5081_v39, %v5075_v20 }
 0xe2c   :  { %v5085_v41 = vpop.permute.xlu1 %5084 }
 0xe2d   :  { %v5088_v42 = vmul.f32 0.071428575, %v5083_v40  ;;  %v5087_v62 = vadd.f32 %v5085_v41, %v5079_v22 }
 0xe2f   :  { %v5089_v35 = vmul.f32 0.071428575, %v5087_v62  ;;  %v5090_v45 = vmul.f32 %v5088_v42, %v5088_v42  ;;  %5098 = vrot.lane.b32.xlu1 %v5088_v42, %s8529_s30  ;;  %5095 = vrot.lane.b32.xlu0 %v5088_v42, %s8533_s24 }
 0xe31   :  { %v5091_v46 = vsub.f32 %v5089_v35, %v5090_v45 }
 0xe33   :  { %v5092_v1 = vadd.f32 1e-05, %v5091_v46  ;;  %5101 = vrot.lane.b32.xlu0 %v5088_v42, %s8532_s23 }
 0xe35   :  { %8445 = vrsqrt.f32 %v5092_v1  ;;  %v8361_v1 = vld [vmem:[%s10695_s9 + $0x1c] sm:$0xff]  }
 0xe37   :  { %5104 = vrot.lane.b32.xlu0 %v5088_v42, %s8527_s4 }
 0xe3b   :  { %5107 = vrot.lane.b32.xlu0 %v5088_v42, %s8531_s22 }
 0xe3f   :  { %v8446_v47 = vpop.eup %8445  ;;  %5110 = vrot.lane.b32.xlu0 %v5088_v42, %s8528_s6 }
 0xe40   :  { %5128 = vrot.lane.b32.xlu1 %v8446_v47, %s8533_s24 }
 0xe43   :  { %5113 = vrot.lane.b32.xlu0 %v5088_v42, %s8530_s7 }
 0xe44   :  { %5131 = vrot.lane.b32.xlu1 %v8446_v47, %s8529_s30 }
 0xe47   :  { %5143 = vrot.lane.b32.xlu0 %v8446_v47, %s8528_s6 }
 0xe48   :  { %5134 = vrot.lane.b32.xlu1 %v8446_v47, %s8532_s23 }
 0xe4c   :  { %5137 = vrot.lane.b32.xlu1 %v8446_v47, %s8527_s4 }
 0xe50   :  { %5140 = vrot.lane.b32.xlu1 %v8446_v47, %s8531_s22 }
 0xe54   :  { %5146 = vrot.lane.b32.xlu1 %v8446_v47, %s8530_s7 }
 0xea1   :  { %v5096_v48 = vpop.permute.xlu0 %5095  ;;  %v5099_v2 = vpop.permute.xlu1 %5098 }
 0xea2   :  { %v5117_v52 = vsel %vm5116_vm13, %v5088_v42, %v5096_v48  ;;  %v8373_v48 = vld [vmem:[%s10696_s10 + $0x70] sm:$0xff]  }
 0xea3   :  { %v5118_v13 = vsel %vm126_vm0, %v5117_v52, %v5099_v2  ;;  %v8367_v2 = vld [vmem:[%s10695_s9 + $0x8] sm:$0xff]  }
 0xea4   :  { %v8363_v52 = vld [vmem:[%s10695_s9 + $0x2c] sm:$0xff]  }
 0xea5   :  { %v5102_v23 = vpop.permute.xlu0 %5101 }
 0xea6   :  { %v5120_v58 = vsel %vm5119_vm14, %v5118_v13, %v5102_v23  ;;  %v8374_v23 = vld [vmem:[%s10696_s10 + $0x78] sm:$0xff]  }
 0xea7   :  { %v8380_v13 = vld [vmem:[%s10696_s10 + $0x98] sm:$0xff]  }
 0xea9   :  { %v5105_v49 = vpop.permute.xlu0 %5104 }
 0xeaa   :  { %v5121_v59 = vsel %vm2617_vm4, %v5120_v58, %v5105_v49  ;;  %v8362_v49 = vld [vmem:[%s10695_s9 + $0x24] sm:$0xff]   ;;  %v8364_v58 = vld [vmem:[%s10695_s9 + $0x34] ss:$0 sps:$4 sm:$0xff]  }
 0xead   :  { %v5108_v12 = vpop.permute.xlu0 %5107 }
 0xeae   :  { %v5123_v60 = vsel %vm5122_vm15, %v5121_v59, %v5108_v12  ;;  %v8376_v12 = vld [vmem:[%s10696_s10 + $0x80] sm:$0xff]  }
 0xeaf   :  { %v5163_v5 = vrot.slane %v5123_v60, %v8646_v14  ;;  %v8382_v59 = vld [vmem:[%s10696_s10 + $0xa0] sm:$0xff]  }
 0xeb1   :  { %v5111_v56 = vpop.permute.xlu0 %5110  ;;  %v5165_v19 = vsub.f32 %v10025_v44, %v5163_v5  ;;  %v5167_v25 = vsub.f32 %v10037_v63, %v5163_v5  ;;  %v5169_v10 = vsub.f32 %v10052_v54, %v5163_v5  ;;  %v5171_v26 = vsub.f32 %v10064_v61, %v5163_v5  ;;  %v8386_v5 = vld [vmem:[%s10696_s10 + $0xb8] sm:$0xff]  }
 0xeb2   :  { %v5129_v18 = vpop.permute.xlu1 %5128  ;;  %v5124_v6 = vsel %vm3535_vm8, %v5123_v60, %v5111_v56  ;;  %v8379_v56 = vld [vmem:[%s10696_s10 + $0x90] sm:$0xff]   ;;  %v8383_v60 = vld [vmem:[%s10696_s10 + $0xa8] sm:$0xff]  }
 0xeb3   :  { %v5149_v7 = vsel %vm5116_vm13, %v8446_v47, %v5129_v18  ;;  %v8366_v47 = vld [vmem:[%s10695_s9] sm:$0xff]   ;;  %v8377_v18 = vld [vmem:[%s10696_s10 + $0x88] sm:$0xff]  }
 0xeb5   :  { %v5114_v3 = vpop.permute.xlu0 %5113 }
 0xeb6   :  { %v5132_v53 = vpop.permute.xlu1 %5131  ;;  %v5126_v8 = vsel %vm5125_vm1, %v5124_v6, %v5114_v3  ;;  %v8365_v3 = vld [vmem:[%s10695_s9 + $0x38] sm:$0xff]   ;;  %v8370_v6 = vld [vmem:[%s10695_s9 + $0x40] sm:$0xff]  }
 0xeb7   :  { %v5150_v9 = vsel %vm126_vm0, %v5149_v7, %v5132_v53  ;;  %v5159_v55 = vrot.slane %v5126_v8, %v8646_v14  ;;  %vm5225_vm0 = vcmask 228352   ;;  %v8368_v53 = vld [vmem:[%s10695_s9 + $0x10] sm:$0xff]   ;;  %v8387_v7 = vld [vmem:[%s10696_s10 + $0xc0] sm:$0xff]   ;;  %v8388_v8 = vld [vmem:[%s10696_s10 + $0xc8] sm:$0xff]  }
 0xeb9   :  { %v5144_v27 = vpop.permute.xlu0 %5143  ;;  %v5164_v33 = vsub.f32 %v10023_v43, %v5159_v55  ;;  %v5166_v34 = vsub.f32 %v10029_v15, %v5159_v55  ;;  %v5168_v54 = vsub.f32 %v10047_v51, %v5159_v55  ;;  %v5170_v39 = vsub.f32 %v10058_v57, %v5159_v55  ;;  %v8381_v55 = vld [vmem:[%s10695_s9 + $0x64] sm:$0xff]  }
 0xeba   :  { %v5135_v50 = vpop.permute.xlu1 %5134 }
 0xebb   :  { %v5151_v16 = vsel %vm5119_vm14, %v5150_v9, %v5135_v50  ;;  %v8369_v50 = vld [vmem:[%s10695_s9 + $0x18] ss:$0 sps:$4 sm:$0xff]   ;;  %v8371_v9 = vld [vmem:[%s10695_s9 + $0x48] sm:$0xff]  }
 0xebe   :  { %v5138_v4 = vpop.permute.xlu1 %5137 }
 0xebf   :  { %v5152_v21 = vsel %vm2617_vm4, %v5151_v16, %v5138_v4  ;;  %v8385_v4 = vld [vmem:[%s10696_s10 + $0xb0] sm:$0xff]  }
 0xec0   :  { %v8389_v16 = vld [vmem:[%s10696_s10 + $0xd0] sm:$0xff]  }
 0xec2   :  { %v5141_v17 = vpop.permute.xlu1 %5140 }
 0xec3   :  { %v5153_v24 = vsel %vm5122_vm15, %v5152_v21, %v5141_v17  ;;  %v8372_v21 = vld [vmem:[%s10695_s9 + $0x50] ss:$0 sps:$4 sm:$0xff]   ;;  %v8375_v17 = vld [vmem:[%s10695_s9 + $0x54] sm:$0xff]  }
 0xec4   :  { %v5179_v11 = vrot.slane %v5153_v24, %v8646_v14  ;;  %v5154_v28 = vsel %vm3535_vm8, %v5153_v24, %v5144_v27  ;;  %v8384_v24 = vld [vmem:[%s10695_s9 + $0x6c] ss:$0 sps:$4 sm:$0xff]  }
 0xec6   :  { %v5147_v29 = vpop.permute.xlu1 %5146  ;;  %v5181_v30 = vmul.f32 %v5179_v11, %v5165_v19  ;;  %v5183_v31 = vmul.f32 %v5179_v11, %v5167_v25  ;;  %v5185_v32 = vmul.f32 %v5179_v11, %v5169_v10  ;;  %v5187_v44 = vmul.f32 %v5179_v11, %v5171_v26  ;;  %v8378_v19 = vld [vmem:[%s10695_s9 + $0x5c] sm:$0xff]  }
 0xec7   :  { %v5155_v63 = vsel %vm5125_vm1, %v5154_v28, %v5147_v29  ;;  %v8390_v25 = vld [vmem:[%s10696_s10 + $0xd8] sm:$0xff]  }
 0xec8   :  { %v5175_v61 = vrot.slane %v5155_v63, %v8646_v14  ;;  %v5189_v36 = vmax.f32 %v5181_v30, 0.0  ;;  %v5191_v37 = vmax.f32 %v5183_v31, 0.0  ;;  %v5193_v38 = vmax.f32 %v5185_v32, 0.0 }
 0xec9   :  { %v5195_v20 = vmax.f32 %v5187_v44, 0.0 }
 0xeca   :  { %v5197_v22 = vpack.c.bf16 %v5191_v37, %v5189_v36  ;;  %v5180_v40 = vmul.f32 %v5175_v61, %v5164_v33  ;;  %v5182_v41 = vmul.f32 %v5175_v61, %v5166_v34  ;;  %v5184_v42 = vmul.f32 %v5175_v61, %v5168_v54  ;;  %v8391_v34 = vld [vmem:[%s10696_s10] sm:$0xff]   ;;  %v8392_v54 = vld [vmem:[%s10696_s10 + $0x8] sm:$0xff]  }
 0xecb   :  { %v10137_v62 = vpack.c.bf16 %v5195_v20, %v5193_v38  ;;  %v5186_v43 = vmul.f32 %v5175_v61, %v5170_v39 }
 0xecc   :  { %5244 = vmatprep.subr.bf16.mxu0 %v5197_v22  ;;  %5389 = vmatprep.subr.bf16.mxu1 %v5197_v22  ;;  %v5188_v15 = vmax.f32 %v5180_v40, 0.0  ;;  %v5190_v35 = vmax.f32 %v5182_v41, 0.0  ;;  %v5192_v51 = vmax.f32 %v5184_v42, 0.0 }
 0xecd   :  { %v5194_v45 = vmax.f32 %v5186_v43, 0.0 }
 0xece   :  { %v10139_v14 = vpack.c.bf16 %v5190_v35, %v5188_v15  ;;  %v8394_v35 = vld [vmem:[%s10696_s10 + $0x18] sm:$0xff]  }
 0xecf   :  { %v5198_v46 = vpack.c.bf16 %v5194_v45, %v5192_v51 }
 0xed0   :  { %5245 = vmatpush1.bf16.msra.mxu0 %v10139_v14  ;;  %5390 = vmatpush1.bf16.msra.mxu1 %v10139_v14 }
 0xed1   :  { %7315 = vmatprep.subr.msk.bf16.mxu0 %vm3526_vm7, %v10137_v62  ;;  %7331 = vmatprep.subr.msk.bf16.mxu1 %vm3526_vm7, %v10137_v62  ;;  %v10148_v57 = vsel %vm3526_vm7, %v5198_v46, 0 }
 0xed4   :  { %5247 = vmatpush1.bf16.msra.mxu0 %v10148_v57  ;;  %5392 = vmatpush1.bf16.msra.mxu1 %v10148_v57 }
 0xed5   :  { %5855 = vmatprep.subr.bf16.mxu1 %v5197_v22  ;;  %5593 = vmatprep.subr.bf16.mxu0 %v8526_v0 }
 0xed7   :  { %7332 = vmatmul.mubr.msk.bf16.vlgmr.msra.gmra.mrb[88].mxu1 %vm5225_vm0, %v8361_v1  ;;  %7316 = vmatmul.mubr.msk.bf16.vlgmr.msra.gmra.mrb[16].mxu0 %vm5225_vm0, %v8366_v47 }
 0xed8   :  { %5856 = vmatpush1.bf16.msra.mxu1 %v10139_v14  ;;  %5431 = vmatprep.mubr.bf16.mxu1 %v8526_v0 }
 0xed9   :  { %7411 = vmatprep.subr.msk.bf16.mxu1 %vm3526_vm7, %v10137_v62  ;;  %5286 = vmatprep.mubr.bf16.mxu0 %v8526_v0 }
 0xeda   :  { %5594 = vmatpush1.bf16.msra.mxu0 %v8373_v48 }
 0xedb   :  { %5595 = vmatprep.subr.bf16.mxu0 %v8526_v0 }
 0xedc   :  { %5858 = vmatpush1.bf16.msra.mxu1 %v10148_v57 }
 0xedd   :  { %6168 = vmatprep.subr.bf16.mxu1 %v5197_v22 }
 0xede   :  { %5596 = vmatpush1.bf16.msra.mxu0 %v8374_v23 }
 0xedf   :  { %7333 = vmatmul.mubr.msk.bf16.gmra.mrb[92].mxu1 %vm5225_vm0, %v8362_v49  ;;  %7317 = vmatmul.mubr.msk.bf16.gmra.mrb[20].mxu0 %vm5225_vm0, %v8367_v2  ;;  %v8395_v2 = vld [vmem:[%s10696_s10 + $0x20] sm:$0xff]  }
 0xee0   :  { %5441 = vmatprep.mubr.bf16.mxu1 %v8526_v0  ;;  %5296 = vmatprep.mubr.bf16.mxu0 %v8526_v0 }
 0xee1   :  { %5597 = vmatprep.subr.bf16.mxu0 %v8526_v0 }
 0xee2   :  { %5598 = vmatpush1.bf16.msra.mxu0 %v8376_v12 }
 0xee3   :  { %5599 = vmatprep.subr.bf16.mxu0 %v8526_v0 }
 0xee6   :  { %5600 = vmatpush1.bf16.msra.mxu0 %v8377_v18 }
 0xee7   :  { %7334 = vmatmul.mubr.msk.bf16.gmra.mrb[96].mxu1 %vm5225_vm0, %v8363_v52  ;;  %7318 = vmatmul.mubr.msk.bf16.gmra.mrb[24].mxu0 %vm5225_vm0, %v8368_v53  ;;  %v8396_v52 = vld [vmem:[%s10696_s10 + $0x28] sm:$0xff]  }
 0xee8   :  { %5451 = vmatprep.mubr.bf16.mxu1 %v8526_v0  ;;  %5306 = vmatprep.mubr.bf16.mxu0 %v8526_v0 }
 0xee9   :  { %5601 = vmatprep.subr.bf16.mxu0 %v8526_v0 }
 0xeea   :  { %5602 = vmatpush1.bf16.msra.mxu0 %v8379_v56 }
 0xeeb   :  { %5603 = vmatprep.subr.bf16.mxu0 %v8526_v0 }
 0xeee   :  { %5604 = vmatpush1.bf16.msra.mxu0 %v8380_v13 }
 0xeef   :  { %7335 = vmatmul.mubr.msk.bf16.gmra.mrb[100].mxu1 %vm5225_vm0, %v8364_v58  ;;  %7319 = vmatmul.mubr.msk.bf16.gmra.mrb[28].mxu0 %vm5225_vm0, %v8369_v50 }
 0xef0   :  { %5887 = vmatprep.mubr.bf16.mxu1 %v8526_v0  ;;  %5605 = vmatprep.subr.bf16.mxu0 %v8526_v0 }
 0xef2   :  { %5606 = vmatpush1.bf16.msra.mxu0 %v8382_v59 }
 0xef3   :  { %5607 = vmatprep.subr.bf16.mxu0 %v8526_v0 }
 0xef6   :  { %5608 = vmatpush1.bf16.msra.mxu0 %v8383_v60 }
 0xef7   :  { %7412 = vmatmul.mubr.msk.bf16.vlgmr.msra.gmra.mrb[104].mxu1 %vm5225_vm0, %v8365_v3  ;;  %5609 = vmatprep.subr.bf16.mxu0 %v8526_v0 }
 0xef8   :  { %6169 = vmatpush1.bf16.msra.mxu1 %v10139_v14  ;;  %5897 = vmatprep.mubr.bf16.mxu1 %v8526_v0 }
 0xef9   :  { %7473 = vmatprep.subr.msk.bf16.mxu1 %vm3526_vm7, %v10137_v62  ;;  %v8393_v62 = vld [vmem:[%s10696_s10 + $0x10] sm:$0xff]  }
 0xefa   :  { %5610 = vmatpush1.bf16.msra.mxu0 %v8385_v4 }
 0xefb   :  { %5611 = vmatprep.subr.bf16.mxu0 %v8526_v0 }
 0xefc   :  { %6171 = vmatpush1.bf16.msra.mxu1 %v10148_v57 }
 0xefe   :  { %5612 = vmatpush1.bf16.msra.mxu0 %v8386_v5 }
 0xeff   :  { %7413 = vmatmul.mubr.msk.bf16.gmra.mrb[108].mxu1 %vm5225_vm0, %v8370_v6  ;;  %5613 = vmatprep.subr.bf16.mxu0 %v8526_v0  ;;  %v8397_v6 = vld [vmem:[%s10696_s10 + $0x30] sm:$0xff]  }
 0xf00   :  { %5907 = vmatprep.mubr.bf16.mxu1 %v8526_v0 }
 0xf02   :  { %5614 = vmatpush1.bf16.msra.mxu0 %v8387_v7  ;;  %v8398_v7 = vld [vmem:[%s10696_s10 + $0x38] sm:$0xff]  }
 0xf03   :  { %5615 = vmatprep.subr.bf16.mxu0 %v8526_v0 }
 0xf06   :  { %5616 = vmatpush1.bf16.msra.mxu0 %v8388_v8 }
 0xf07   :  { %7414 = vmatmul.mubr.msk.bf16.gmra.mrb[112].mxu1 %vm5225_vm0, %v8371_v9  ;;  %5617 = vmatprep.subr.bf16.mxu0 %v8526_v0 }
 0xf08   :  { %5917 = vmatprep.mubr.bf16.mxu1 %v8526_v0 }
 0xf0a   :  { %5618 = vmatpush1.bf16.msra.mxu0 %v8389_v16 }
 0xf0b   :  { %5619 = vmatprep.subr.bf16.mxu0 %v8526_v0 }
 0xf0e   :  { %5620 = vmatpush1.bf16.msra.mxu0 %v8390_v25 }
 0xf0f   :  { %7415 = vmatmul.mubr.msk.bf16.gmra.mrb[116].mxu1 %vm5225_vm0, %v8372_v21  ;;  %5753 = vmatprep.subr.bf16.mxu0 %v8526_v0 }
 0xf10   :  { %6200 = vmatprep.mubr.bf16.mxu1 %v8526_v0 }
 0xf17   :  { %7474 = vmatmul.mubr.msk.bf16.vlgmr.msra.gmra.mrb[120].mxu1 %vm5225_vm0, %v8375_v17 }
 0xf18   :  { %6210 = vmatprep.mubr.bf16.mxu1 %v8526_v0 }
 0xf1f   :  { %7475 = vmatmul.mubr.msk.bf16.gmra.mrb[124].mxu1 %vm5225_vm0, %v8378_v19  ;;  %v8399_v19 = vld [vmem:[%s10696_s10 + $0x40] sm:$0xff]  }
 0xf20   :  { %6220 = vmatprep.mubr.bf16.mxu1 %v8526_v0 }
 0xf27   :  { %7476 = vmatmul.mubr.msk.bf16.gmra.mrb[128].mxu1 %vm5225_vm0, %v8381_v55 }
 0xf28   :  { %6230 = vmatprep.mubr.bf16.mxu1 %v8526_v0 }
 0xf2f   :  { %7477 = vmatmul.mubr.msk.bf16.gmra.mrb[132].mxu1 %vm5225_vm0, %v8384_v24  ;;  %v8400_v24 = vld [vmem:[%s10696_s10 + $0x48] sm:$0xff]  }
 0xfaa   :  { %v5423_v10 = vpop.f32.mrb[88].mxu1  ;;  %v10295_v26 = vpop.f32.mrb[16].mxu0 }
 0xfab   :  { %v5425_v27 = vpop.f32.mrb[89].mxu1  ;;  %v10297_v11 = vpop.f32.mrb[17].mxu0 }
 0xfac   :  { %v5427_v28 = vpop.f32.mrb[90].mxu1  ;;  %v10299_v29 = vpop.f32.mrb[18].mxu0 }
 0xfad   :  { %v5460_v30 = vpack.c.bf16 %v5427_v28, %v5423_v10  ;;  %v5429_v31 = vpop.f32.mrb[91].mxu1  ;;  %v5315_v32 = vpack.c.bf16 %v10299_v29, %v10295_v26  ;;  %v10303_v44 = vpop.f32.mrb[19].mxu0 }
 0xfae   :  { %v5461_v33 = vpack.c.bf16 %v5429_v31, %v5425_v27  ;;  %v5316_v63 = vpack.c.bf16 %v10303_v44, %v10297_v11  ;;  %v8402_v44 = vld [vmem:[%s10696_s10 + $0x58] sm:$0xff]  }
 0xfb0   :  { %7378 = vmatprep.mubr.msk.bf16.mxu0 %vm3535_vm8, %v5461_v33 }
 0xfb1   :  { %5626 = vmatmul.mubr.bf16.vlgmr.msra.gmra.mrb[32].mxu0 %v5460_v30  ;;  %v8401_v30 = vld [vmem:[%s10696_s10 + $0x50] sm:$0xff]  }
 0xfb2   :  { %5754 = vmatpush1.bf16.msra.mxu0 %v8391_v34  ;;  %v5433_v61 = vpop.f32.mrb[92].mxu1  ;;  %v10314_v36 = vpop.f32.mrb[20].mxu0 }
 0xfb3   :  { %5755 = vmatprep.subr.bf16.mxu0 %v8526_v0  ;;  %v5435_v37 = vpop.f32.mrb[93].mxu1  ;;  %v10317_v38 = vpop.f32.mrb[21].mxu0 }
 0xfb4   :  { %v5437_v20 = vpop.f32.mrb[94].mxu1  ;;  %v10319_v39 = vpop.f32.mrb[22].mxu0 }
 0xfb5   :  { %v5462_v22 = vpack.c.bf16 %v5437_v20, %v5433_v61  ;;  %v5439_v40 = vpop.f32.mrb[95].mxu1  ;;  %v5317_v41 = vpack.c.bf16 %v10319_v39, %v10314_v36  ;;  %v10323_v42 = vpop.f32.mrb[23].mxu0 }
 0xfb6   :  { %5756 = vmatpush1.bf16.msra.mxu0 %v8392_v54  ;;  %v5463_v43 = vpack.c.bf16 %v5439_v40, %v5435_v37  ;;  %v5318_v15 = vpack.c.bf16 %v10323_v42, %v10317_v38  ;;  %v8403_v37 = vld [vmem:[%s10696_s10 + $0x60] sm:$0xff]   ;;  %v8408_v42 = vld [vmem:[%s10696_s10 + $0xf8] sm:$0xff]  }
 0xfb7   :  { %5757 = vmatprep.subr.bf16.mxu0 %v8526_v0 }
 0xfb8   :  { %7379 = vmatprep.mubr.msk.bf16.mxu0 %vm3535_vm8, %v5463_v43 }
 0xfb9   :  { %5634 = vmatmul.mubr.bf16.gmra.mrb[36].mxu0 %v5462_v22  ;;  %v8404_v22 = vld [vmem:[%s10696_s10 + $0x68] sm:$0xff]  }
 0xfba   :  { %5758 = vmatpush1.bf16.msra.mxu0 %v8393_v62  ;;  %v5443_v51 = vpop.f32.mrb[96].mxu1  ;;  %v10335_v45 = vpop.f32.mrb[24].mxu0 }
 0xfbb   :  { %5759 = vmatprep.subr.bf16.mxu0 %v8526_v0  ;;  %v5445_v14 = vpop.f32.mrb[97].mxu1  ;;  %v10338_v46 = vpop.f32.mrb[25].mxu0 }
 0xfbc   :  { %v5447_v57 = vpop.f32.mrb[98].mxu1  ;;  %v10340_v1 = vpop.f32.mrb[26].mxu0 }
 0xfbd   :  { %v5464_v47 = vpack.c.bf16 %v5447_v57, %v5443_v51  ;;  %v5449_v48 = vpop.f32.mrb[99].mxu1  ;;  %v5319_v23 = vpack.c.bf16 %v10340_v1, %v10335_v45  ;;  %v10344_v49 = vpop.f32.mrb[27].mxu0  ;;  %v8405_v51 = vld [vmem:[%s10696_s10 + $0xe0] sm:$0xff]  }
 0xfbe   :  { %5760 = vmatpush1.bf16.msra.mxu0 %v8394_v35  ;;  %v5465_v12 = vpack.c.bf16 %v5449_v48, %v5445_v14  ;;  %v5320_v18 = vpack.c.bf16 %v10344_v49, %v10338_v46  ;;  %v8406_v14 = vld [vmem:[%s10696_s10 + $0xe8] sm:$0xff]  }
 0xfbf   :  { %5761 = vmatprep.subr.bf16.mxu0 %v8526_v0 }
 0xfc0   :  { %7380 = vmatprep.mubr.msk.bf16.mxu0 %vm3535_vm8, %v5465_v12 }
 0xfc1   :  { %5642 = vmatmul.mubr.bf16.gmra.mrb[40].mxu0 %v5464_v47 }
 0xfc2   :  { %5762 = vmatpush1.bf16.msra.mxu0 %v8395_v2  ;;  %v5453_v53 = vpop.f32.mrb[100].mxu1  ;;  %v10356_v56 = vpop.f32.mrb[28].mxu0 }
 0xfc3   :  { %5763 = vmatprep.subr.bf16.mxu0 %v8526_v0  ;;  %v5455_v13 = vpop.f32.mrb[101].mxu1  ;;  %v10359_v58 = vpop.f32.mrb[29].mxu0  ;;  %v5466_v3 = vpack.c.bf16 %v5453_v53, %v5453_v53 }
 0xfc4   :  { %v5467_v50 = vpack.c.bf16 %v5455_v13, %v5455_v13  ;;  %v5457_v59 = vpop.f32.mrb[102].mxu1  ;;  %v5312_v60 = vpop.f32.mrb[30].mxu0  ;;  %v5322_v46 = vpack.c.bf16 %v10359_v58, %v10359_v58  ;;  %v5321_v58 = vpack.c.bf16 %v10356_v56, %v10356_v56  ;;  %v8412_v56 = vld [vmem:[%s10696_s10 + $0x118] sm:$0xff]  }
 0xfc5   :  { %v5458_v4 = vpop.f32.mrb[103].mxu1  ;;  %v5313_v5 = vpop.f32.mrb[31].mxu0 }
 0xfc6   :  { %5764 = vmatpush1.bf16.msra.mxu0 %v8396_v52  ;;  %7381 = vmatprep.mubr.msk.bf16.mxu0 %vm3535_vm8, %v5467_v50  ;;  %v8413_v5 = vld [vmem:[%s10696_s10 + $0x120] sm:$0xff]  }
 0xfc7   :  { %5765 = vmatprep.subr.bf16.mxu0 %v8526_v0 }
 0xfc9   :  { %5650 = vmatmul.mubr.bf16.gmra.mrb[44].mxu0 %v5466_v3 }
 0xfca   :  { %5766 = vmatpush1.bf16.msra.mxu0 %v8397_v6  ;;  %7396 = vmatprep.mubr.msk.bf16.mxu0 %vm3535_vm8, %v5316_v63  ;;  %v10373_v8 = vpop.f32.mrb[104].mxu1  ;;  %v8414_v6 = vld [vmem:[%s10696_s10 + $0x128] sm:$0xff]  }
 0xfcb   :  { %5767 = vmatprep.subr.bf16.mxu0 %v8526_v0  ;;  %v10376_v9 = vpop.f32.mrb[105].mxu1 }
 0xfcc   :  { %v10378_v16 = vpop.f32.mrb[106].mxu1 }
 0xfcd   :  { %v5926_v21 = vpack.c.bf16 %v10378_v16, %v10373_v8  ;;  %v10382_v17 = vpop.f32.mrb[107].mxu1  ;;  %v8422_v8 = vld [vmem:[%s10696_s10 + $0x168] sm:$0xff]   ;;  %v8423_v16 = vld [vmem:[%s10696_s10 + $0x170] sm:$0xff]  }
 0xfce   :  { %5768 = vmatpush1.bf16.msra.mxu0 %v8398_v7  ;;  %v5927_v55 = vpack.c.bf16 %v10382_v17, %v10376_v9  ;;  %v8415_v7 = vld [vmem:[%s10696_s10 + $0x130] sm:$0xff]   ;;  %v8416_v9 = vld [vmem:[%s10696_s10 + $0x138] sm:$0xff]   ;;  %v8417_v17 = vld [vmem:[%s10696_s10 + $0x140] sm:$0xff]  }
 0xfcf   :  { %5769 = vmatprep.subr.bf16.mxu0 %v8526_v0 }
 0xfd2   :  { %5770 = vmatpush1.bf16.msra.mxu0 %v8399_v19  ;;  %v10393_v25 = vpop.f32.mrb[108].mxu1  ;;  %v8418_v19 = vld [vmem:[%s10696_s10 + $0x148] sm:$0xff]  }
 0xfd3   :  { %5771 = vmatprep.subr.bf16.mxu0 %v8526_v0  ;;  %v10396_v10 = vpop.f32.mrb[109].mxu1 }
 0xfd4   :  { %v10398_v27 = vpop.f32.mrb[110].mxu1 }
 0xfd5   :  { %v5928_v11 = vpack.c.bf16 %v10398_v27, %v10393_v25  ;;  %v10402_v28 = vpop.f32.mrb[111].mxu1  ;;  %v8424_v25 = vld [vmem:[%s10696_s10 + $0x178] sm:$0xff]   ;;  %v8425_v27 = vld [vmem:[%s10696_s10 + $0x180] sm:$0xff]  }
 0xfd6   :  { %5772 = vmatpush1.bf16.msra.mxu0 %v8400_v24  ;;  %v5929_v31 = vpack.c.bf16 %v10402_v28, %v10396_v10  ;;  %v8420_v24 = vld [vmem:[%s10696_s10 + $0x158] sm:$0xff]   ;;  %v8427_v28 = vld [vmem:[%s10696_s10 + $0x190] sm:$0xff]  }
 0xfd7   :  { %5773 = vmatprep.subr.bf16.mxu0 %v8526_v0 }
 0xfda   :  { %5774 = vmatpush1.bf16.msra.mxu0 %v8401_v30  ;;  %v10413_v33 = vpop.f32.mrb[112].mxu1  ;;  %v8421_v30 = vld [vmem:[%s10696_s10 + $0x160] sm:$0xff]  }
 0xfdb   :  { %5775 = vmatprep.subr.bf16.mxu0 %v8526_v0  ;;  %v10416_v34 = vpop.f32.mrb[113].mxu1 }
 0xfdc   :  { %v10418_v63 = vpop.f32.mrb[114].mxu1 }
 0xfdd   :  { %v5930_v54 = vpack.c.bf16 %v10418_v63, %v10413_v33  ;;  %v10422_v61 = vpop.f32.mrb[115].mxu1  ;;  %v8430_v33 = vld [vmem:[%s10696_s10 + $0x1a8] sm:$0xff]   ;;  %v8432_v63 = vld [vmem:[%s10696_s10 + $0x1b8] sm:$0xff]  }
 0xfde   :  { %5776 = vmatpush1.bf16.msra.mxu0 %v8402_v44  ;;  %v5931_v20 = vpack.c.bf16 %v10422_v61, %v10416_v34  ;;  %v8429_v44 = vld [vmem:[%s10696_s10 + $0x1a0] sm:$0xff]   ;;  %v8431_v34 = vld [vmem:[%s10696_s10 + $0x1b0] sm:$0xff]  }
 0xfdf   :  { %5777 = vmatprep.subr.bf16.mxu0 %v8526_v0 }
 0xfe2   :  { %5778 = vmatpush1.bf16.msra.mxu0 %v8403_v37  ;;  %v10433_v40 = vpop.f32.mrb[116].mxu1 }
 0xfe3   :  { %5779 = vmatprep.subr.bf16.mxu0 %v8526_v0  ;;  %v10436_v62 = vpop.f32.mrb[117].mxu1  ;;  %v5932_v10 = vpack.c.bf16 %v10433_v40, %v10433_v40 }
 0xfe4   :  { %v5923_v43 = vpop.f32.mrb[118].mxu1 }
 0xfe5   :  { %v5924_v35 = vpop.f32.mrb[119].mxu1 }
 0xfe6   :  { %5780 = vmatpush1.bf16.msra.mxu0 %v8404_v22 }
 0xfe7   :  { %6059 = vmatprep.subr.bf16.mxu0 %v8526_v0 }
 0xfe9   :  { %5786 = vmatmul.mubr.bf16.vlgmr.msra.gmra.mrb[32].mxu0 %v5315_v32  ;;  %v8407_v32 = vld [vmem:[%s10696_s10 + $0xf0] sm:$0xff]  }
 0xfea   :  { %6060 = vmatpush1.bf16.msra.mxu0 %v8405_v51  ;;  %7397 = vmatprep.mubr.msk.bf16.mxu0 %vm3535_vm8, %v5318_v15  ;;  %v10452_v57 = vpop.f32.mrb[120].mxu1 }
 0xfeb   :  { %6061 = vmatprep.subr.bf16.mxu0 %v8526_v0  ;;  %v10455_v47 = vpop.f32.mrb[121].mxu1 }
 0xfec   :  { %v10457_v48 = vpop.f32.mrb[122].mxu1 }
 0xfed   :  { %v6239_v26 = vpack.c.bf16 %v10457_v48, %v10452_v57  ;;  %v10461_v29 = vpop.f32.mrb[123].mxu1 }
 0xfee   :  { %6062 = vmatpush1.bf16.msra.mxu0 %v8406_v14  ;;  %v6240_v38 = vpack.c.bf16 %v10461_v29, %v10455_v47 }
 0xfef   :  { %6063 = vmatprep.subr.bf16.mxu0 %v8526_v0 }
 0xff1   :  { %5794 = vmatmul.mubr.bf16.gmra.mrb[36].mxu0 %v5317_v41  ;;  %v8409_v41 = vld [vmem:[%s10696_s10 + $0x100] sm:$0xff]  }
 0xff2   :  { %6064 = vmatpush1.bf16.msra.mxu0 %v8407_v32  ;;  %7398 = vmatprep.mubr.msk.bf16.mxu0 %vm3535_vm8, %v5320_v18  ;;  %v10479_v15 = vpop.f32.mrb[124].mxu1  ;;  %v8410_v18 = vld [vmem:[%s10696_s10 + $0x108] sm:$0xff]  }
 0xff3   :  { %6065 = vmatprep.subr.bf16.mxu0 %v8526_v0  ;;  %v10482_v2 = vpop.f32.mrb[125].mxu1 }
 0xff4   :  { %v10484_v12 = vpop.f32.mrb[126].mxu1 }
 0xff5   :  { %v6241_v36 = vpack.c.bf16 %v10484_v12, %v10479_v15  ;;  %v10488_v39 = vpop.f32.mrb[127].mxu1 }
 0xff6   :  { %6066 = vmatpush1.bf16.msra.mxu0 %v8408_v42  ;;  %v6242_v49 = vpack.c.bf16 %v10488_v39, %v10482_v2 }
 0xff7   :  { %6067 = vmatprep.subr.bf16.mxu0 %v8526_v0 }
 0xff9   :  { %5802 = vmatmul.mubr.bf16.gmra.mrb[40].mxu0 %v5319_v23  ;;  %v8411_v23 = vld [vmem:[%s10696_s10 + $0x110] sm:$0xff]  }
 0xffa   :  { %6068 = vmatpush1.bf16.msra.mxu0 %v8409_v41  ;;  %7399 = vmatprep.mubr.msk.bf16.mxu0 %vm3535_vm8, %v5322_v46  ;;  %v10505_v52 = vpop.f32.mrb[128].mxu1 }
 0xffb   :  { %6069 = vmatprep.subr.bf16.mxu0 %v8526_v0  ;;  %v10508_v53 = vpop.f32.mrb[129].mxu1 }
 0xffc   :  { %v10510_v13 = vpop.f32.mrb[130].mxu1 }
 0xffd   :  { %v6243_v45 = vpack.c.bf16 %v10510_v13, %v10505_v52  ;;  %v10516_v1 = vpop.f32.mrb[131].mxu1 }
 0xffe   :  { %6070 = vmatpush1.bf16.msra.mxu0 %v8410_v18  ;;  %v6244_v50 = vpack.c.bf16 %v10516_v1, %v10508_v53 }
 0xfff   :  { %6071 = vmatprep.subr.bf16.mxu0 %v8526_v0 }
0x1001   :  { %5810 = vmatmul.mubr.bf16.gmra.mrb[44].mxu0 %v5321_v58 }
0x1002   :  { %6072 = vmatpush1.bf16.msra.mxu0 %v8411_v23  ;;  %7458 = vmatprep.mubr.msk.bf16.mxu0 %vm3535_vm8, %v5927_v55  ;;  %v10531_v59 = vpop.f32.mrb[132].mxu1  ;;  %v8419_v55 = vld [vmem:[%s10696_s10 + $0x150] sm:$0xff]  }
0x1003   :  { %6073 = vmatprep.subr.bf16.mxu0 %v8526_v0  ;;  %v10534_v60 = vpop.f32.mrb[133].mxu1 }
0x1004   :  { %v6236_v3 = vpop.f32.mrb[134].mxu1 }
0x1005   :  { %v6237_v4 = vpop.f32.mrb[135].mxu1 }
0x1006   :  { %6074 = vmatpush1.bf16.msra.mxu0 %v8412_v56 }
0x1007   :  { %6075 = vmatprep.subr.bf16.mxu0 %v8526_v0 }
0x100a   :  { %6076 = vmatpush1.bf16.msra.mxu0 %v8413_v5 }
0x100b   :  { %6077 = vmatprep.subr.bf16.mxu0 %v8526_v0 }
0x100e   :  { %6078 = vmatpush1.bf16.msra.mxu0 %v8414_v6 }
0x100f   :  { %6079 = vmatprep.subr.bf16.mxu0 %v8526_v0 }
0x1012   :  { %6080 = vmatpush1.bf16.msra.mxu0 %v8415_v7 }
0x1013   :  { %6081 = vmatprep.subr.bf16.mxu0 %v8526_v0 }
0x1016   :  { %6082 = vmatpush1.bf16.msra.mxu0 %v8416_v9 }
0x1017   :  { %6083 = vmatprep.subr.bf16.mxu0 %v8526_v0 }
0x101a   :  { %6084 = vmatpush1.bf16.msra.mxu0 %v8417_v17 }
0x101b   :  { %6085 = vmatprep.subr.bf16.mxu0 %v8526_v0 }
0x101e   :  { %6086 = vmatpush1.bf16.msra.mxu0 %v8418_v19 }
0x101f   :  { %6372 = vmatprep.subr.bf16.mxu0 %v8526_v0 }
0x1021   :  { %6092 = vmatmul.mubr.bf16.vlgmr.msra.gmra.mrb[32].mxu0 %v5926_v21  ;;  %v5933_v21 = vpack.c.bf16 %v10436_v62, %v10436_v62 }
0x1022   :  { %6373 = vmatpush1.bf16.msra.mxu0 %v8419_v55  ;;  %7459 = vmatprep.mubr.msk.bf16.mxu0 %vm3535_vm8, %v5929_v31  ;;  %v8428_v31 = vld [vmem:[%s10696_s10 + $0x198] sm:$0xff]  }
0x1023   :  { %6374 = vmatprep.subr.bf16.mxu0 %v8526_v0 }
0x1026   :  { %6375 = vmatpush1.bf16.msra.mxu0 %v8420_v24 }
0x1027   :  { %6376 = vmatprep.subr.bf16.mxu0 %v8526_v0 }
0x1029   :  { %6100 = vmatmul.mubr.bf16.gmra.mrb[36].mxu0 %v5928_v11  ;;  %v8426_v11 = vld [vmem:[%s10696_s10 + $0x188] sm:$0xff]   ;;  %s8534_s10 = smov [#allocation5]  }
0x102a   :  { %6377 = vmatpush1.bf16.msra.mxu0 %v8421_v30  ;;  %7460 = vmatprep.mubr.msk.bf16.mxu0 %vm3535_vm8, %v5931_v20  ;;  %s6497_s2 = sshll.u32 %s8534_s10, 4  ;;  %s6498_s2 = int_to_ptr.vmem [resolvable:$true] %s6497_s2 }
0x102b   :  { %6378 = vmatprep.subr.bf16.mxu0 %v8526_v0  ;;  %s8497_s13 = scalar_lea.vmem %s6498_s2, 896  ;;  %p8502_p9 = scmp.lt.s32.totalorder %s6498_s2, %s6498_s2 }
0x102c   :  { %p8498_p8 = scmp.ne.s32.totalorder %s6498_s2, %s8497_s13  ;;  %p8503_p10 = scmp.lt.s32.totalorder %s8497_s13, %s8497_s13 }
0x102e   :  { %6379 = vmatpush1.bf16.msra.mxu0 %v8422_v8  ;;  %p8504_p11 = por %p8503_p10, %p8502_p9 }
0x102f   :  { %6380 = vmatprep.subr.bf16.mxu0 %v8526_v0 }
0x1030   :  { %p8505_p12 = pnand %p8504_p11, %p8498_p8 }
0x1031   :  { %6108 = vmatmul.mubr.bf16.gmra.mrb[40].mxu0 %v5930_v54  ;;  %v6245_v54 = vpack.c.bf16 %v10531_v59, %v10531_v59 }
0x1032   :  { %6381 = vmatpush1.bf16.msra.mxu0 %v8423_v16  ;;  %7461 = vmatprep.mubr.msk.bf16.mxu0 %vm3535_vm8, %v5933_v21 }
0x1033   :  { %6382 = vmatprep.subr.bf16.mxu0 %v8526_v0 }
0x1036   :  { %6383 = vmatpush1.bf16.msra.mxu0 %v8424_v25 }
0x1037   :  { %6384 = vmatprep.subr.bf16.mxu0 %v8526_v0 }
0x1039   :  { %6116 = vmatmul.mubr.bf16.gmra.mrb[44].mxu0 %v5932_v10 }
0x103a   :  { %6385 = vmatpush1.bf16.msra.mxu0 %v8425_v27  ;;  %7520 = vmatprep.mubr.msk.bf16.mxu0 %vm3535_vm8, %v6240_v38 }
0x103b   :  { %6386 = vmatprep.subr.bf16.mxu0 %v8526_v0 }
0x103e   :  { %6387 = vmatpush1.bf16.msra.mxu0 %v8426_v11 }
0x103f   :  { %6388 = vmatprep.subr.bf16.mxu0 %v8526_v0 }
0x1042   :  { %6389 = vmatpush1.bf16.msra.mxu0 %v8427_v28 }
0x1043   :  { %6390 = vmatprep.subr.bf16.mxu0 %v8526_v0 }
0x1046   :  { %6391 = vmatpush1.bf16.msra.mxu0 %v8428_v31 }
0x1047   :  { %6392 = vmatprep.subr.bf16.mxu0 %v8526_v0 }
0x104a   :  { %6393 = vmatpush1.bf16.msra.mxu0 %v8429_v44 }
0x104b   :  { %6394 = vmatprep.subr.bf16.mxu0 %v8526_v0 }
0x104e   :  { %6395 = vmatpush1.bf16.msra.mxu0 %v8430_v33 }
0x104f   :  { %6396 = vmatprep.subr.bf16.mxu0 %v8526_v0 }
0x1052   :  { %6397 = vmatpush1.bf16.msra.mxu0 %v8431_v34 }
0x1053   :  { %6398 = vmatprep.subr.bf16.mxu0 %v8526_v0  ;;  %v6246_v0 = vpack.c.bf16 %v10534_v60, %v10534_v60 }
0x1056   :  { %6399 = vmatpush1.bf16.msra.mxu0 %v8432_v63 }
0x1059   :  { %6405 = vmatmul.mubr.bf16.vlgmr.msra.gmra.mrb[32].mxu0 %v6239_v26 }
0x105a   :  { %7521 = vmatprep.mubr.msk.bf16.mxu0 %vm3535_vm8, %v6242_v49 }
0x1061   :  { %6413 = vmatmul.mubr.bf16.gmra.mrb[36].mxu0 %v6241_v36 }
0x1062   :  { %7522 = vmatprep.mubr.msk.bf16.mxu0 %vm3535_vm8, %v6244_v50 }
0x1069   :  { %6421 = vmatmul.mubr.bf16.gmra.mrb[40].mxu0 %v6243_v45 }
0x106a   :  { %7523 = vmatprep.mubr.msk.bf16.mxu0 %vm3535_vm8, %v6246_v0 }
0x1071   :  { %6429 = vmatmul.mubr.bf16.gmra.mrb[44].mxu0 %v6245_v54 }
0x112c   :  { %v6406_v61 = vpop.f32.mrb[32].mxu0 }
0x112d   :  { %v6443_v37 = vsub.f32 0.0, %v6406_v61  ;;  %v6408_v20 = vpop.f32.mrb[33].mxu0 }
0x112e   :  { %v6409_v22 = vpop.f32.mrb[34].mxu0 }
0x112f   :  { %v6450_v40 = vmul.f32 1.442695, %v6443_v37  ;;  %v6444_v62 = vsub.f32 0.0, %v6409_v22  ;;  %v6411_v43 = vpop.f32.mrb[35].mxu0 }
0x1131   :  { %8447 = vpow2.f32 %v6450_v40  ;;  %v6452_v35 = vmul.f32 1.442695, %v6444_v62 }
0x1133   :  { %8449 = vpow2.f32 %v6452_v35 }
0x1134   :  { %v6414_v51 = vpop.f32.mrb[36].mxu0 }
0x1135   :  { %v6445_v14 = vsub.f32 0.0, %v6414_v51  ;;  %v6416_v57 = vpop.f32.mrb[37].mxu0 }
0x1136   :  { %v6417_v47 = vpop.f32.mrb[38].mxu0 }
0x1137   :  { %v6454_v48 = vmul.f32 1.442695, %v6445_v14  ;;  %v6446_v26 = vsub.f32 0.0, %v6417_v47  ;;  %v6419_v29 = vpop.f32.mrb[39].mxu0 }
0x1139   :  { %8451 = vpow2.f32 %v6454_v48  ;;  %v6456_v32 = vmul.f32 1.442695, %v6446_v26 }
0x113b   :  { %v8448_v38 = vpop.eup %8447  ;;  %8453 = vpow2.f32 %v6456_v32 }
0x113c   :  { %v6464_v42 = vadd.f32 1.0, %v8448_v38  ;;  %v6422_v15 = vpop.f32.mrb[40].mxu0 }
0x113d   :  { %v8450_v2 = vpop.eup %8449  ;;  %v6447_v12 = vsub.f32 0.0, %v6422_v15  ;;  %v6424_v36 = vpop.f32.mrb[41].mxu0 }
0x113e   :  { %8455 = vrcp.f32 %v6464_v42  ;;  %v6465_v39 = vadd.f32 1.0, %v8450_v2  ;;  %v6425_v41 = vpop.f32.mrb[42].mxu0 }
0x113f   :  { %v6458_v46 = vmul.f32 1.442695, %v6447_v12  ;;  %v6448_v49 = vsub.f32 0.0, %v6425_v41  ;;  %v6427_v18 = vpop.f32.mrb[43].mxu0 }
0x1140   :  { %8457 = vrcp.f32 %v6465_v39 }
0x1141   :  { %8459 = vpow2.f32 %v6458_v46  ;;  %v6460_v52 = vmul.f32 1.442695, %v6448_v49 }
0x1143   :  { %v8452_v53 = vpop.eup %8451  ;;  %8461 = vpow2.f32 %v6460_v52 }
0x1144   :  { %v6466_v13 = vadd.f32 1.0, %v8452_v53  ;;  %v6430_v58 = vpop.f32.mrb[44].mxu0 }
0x1145   :  { %v8454_v45 = vpop.eup %8453  ;;  %v6449_v1 = vsub.f32 0.0, %v6430_v58  ;;  %v6432_v23 = vpop.f32.mrb[45].mxu0 }
0x1146   :  { %8463 = vrcp.f32 %v6466_v13  ;;  %v6467_v50 = vadd.f32 1.0, %v8454_v45  ;;  %v6433_v56 = vpop.f32.mrb[46].mxu0 }
0x1147   :  { %v6462_v59 = vmul.f32 1.442695, %v6449_v1  ;;  %v6434_v60 = vpop.f32.mrb[47].mxu0 }
0x1148   :  { %v8456_v3 = vpop.eup %8455  ;;  %8465 = vrcp.f32 %v6467_v50 }
0x1149   :  { %v6478_v4 = vmin.f32 %v8456_v3, 1.0  ;;  %8467 = vpow2.f32 %v6462_v59 }
0x114a   :  { %v8458_v5 = vpop.eup %8457 }
0x114b   :  { %v8460_v6 = vpop.eup %8459  ;;  %6485 = vst.msk [vmem:[#allocation5] sm:$0xff] %vm5225_vm0, %v6478_v4  ;;  %v6479_v7 = vmin.f32 %v8458_v5, 1.0 }
0x114c   :  { %v6468_v9 = vadd.f32 1.0, %v8460_v6 }
0x114d   :  { %v8462_v17 = vpop.eup %8461  ;;  %6486 = vst.msk [vmem:[#allocation5 + $0x8] sm:$0xff] %vm5225_vm0, %v6479_v7 }
0x114e   :  { %8469 = vrcp.f32 %v6468_v9  ;;  %v6469_v19 = vadd.f32 1.0, %v8462_v17 }
0x1150   :  { %v8464_v55 = vpop.eup %8463  ;;  %8471 = vrcp.f32 %v6469_v19 }
0x1151   :  { %v6480_v24 = vmin.f32 %v8464_v55, 1.0 }
0x1152   :  { %v8466_v30 = vpop.eup %8465 }
0x1153   :  { %v8468_v8 = vpop.eup %8467  ;;  %6487 = vst.msk [vmem:[#allocation5 + $0x10] sm:$0xff] %vm5225_vm0, %v6480_v24  ;;  %v6481_v16 = vmin.f32 %v8466_v30, 1.0 }
0x1154   :  { %v6470_v21 = vadd.f32 1.0, %v8468_v8 }
0x1155   :  { %6488 = vst.msk [vmem:[#allocation5 + $0x18] sm:$0xff] %vm5225_vm0, %v6481_v16 }
0x1156   :  { %8473 = vrcp.f32 %v6470_v21 }
0x1158   :  { %v8470_v25 = vpop.eup %8469 }
0x1159   :  { %v6482_v10 = vmin.f32 %v8470_v25, 1.0 }
0x115a   :  { %v8472_v27 = vpop.eup %8471 }
0x115b   :  { %6489 = vst.msk [vmem:[#allocation5 + $0x20] sm:$0xff] %vm5225_vm0, %v6482_v10  ;;  %v6483_v11 = vmin.f32 %v8472_v27, 1.0 }
0x115d   :  { %6490 = vst.msk [vmem:[#allocation5 + $0x28] sm:$0xff] %vm5225_vm0, %v6483_v11 }
0x1160   :  { %v8474_v28 = vpop.eup %8473 }
0x1161   :  { %v6484_v31 = vmin.f32 %v8474_v28, 1.0 }
0x1163   :  { %6491 = vst.msk [vmem:[#allocation5 + $0x30] sm:$0xff] %vm5225_vm0, %v6484_v31 }
0x1164   :  { %8508 = shalt.err (!%p8505_p12)
}
0x1165   :  { %s8509_s16 = scalar_lea.hbm %s10697_s11, 896 }
0x1166   :  { %p8510_p13 = scmp.ne.s32.totalorder %s10697_s11, %s8509_s16  ;;  %p8513_p0 = scmp.lt.u32.totalorder %s8509_s16, %s10697_s11 }
0x1168   :  { %p8515_p1 = pnand %p8513_p0, %p8510_p13 }
0x116a   :  { %8518 = shalt.err (!%p8515_p1)
}
0x116b   :  { %6503 = dma.vmem_to_hbm [thread:$0]  %s6498_s2, 896, %s10697_s11, [#allocation4], %s8524_s27, %s8524_s27, %s8525_s28  }
0x116c   :  { %8521 = dma.done.wait [#allocation4], 896  }
0x116d   :  { %8522 = vsyncadd [#allocation4], 4294966400 }
0x116e   :  { %6507 = vsyncpa [#allocation3], 1 }
0x116f   :  { %6508 = vsyncpa [#allocation4], 1 }

</bundles_post_ra>
